<compile_context>
chip_gen: v6e
topology: v6e:2x2x1
jax: 0.10.0
libtpu: 0.0.40
codegen_flags: <defaults>
</compile_context>

<pallas_src>
import functools

import jax
import jax.numpy as jnp
from jax.experimental import pallas as pl
from jax.experimental.pallas import tpu as pltpu

# ----------------------------- model config ---------------------------------
VOCAB_SIZE = 4       # small so the final `[:, -vocab_size:]` slice is non-trivial
OUTPUT_SIZE = 1      # head / output packing assume output_size == 1 (as in the module use)
EMBED_DIM = 16
HIDDEN_DIM = 32
N_LAYERS = 2
BATCH = 2
SEQ = 8

assert OUTPUT_SIZE == 1, "head and sig_out[:, -vocab:] emulation assume output_size == 1"
assert N_LAYERS == 2, "fused kernel is specialized to the module's 2-layer LSTM"
assert HIDDEN_DIM % 8 == 0 and (4 * HIDDEN_DIM) % 128 == 0

# --------------------- packed-weight layout (single operand) -----------------
# Rows of the single (PACK_ROWS, 4H) f32 weight operand (all 8-row aligned):
#   [0 : VOCAB)        A0 = embedding @ W_ih0 + (b_ih0 + b_hh0)   (folded)
#   [B1_ROW]           b1 = b_ih1 + b_hh1
#   [FC_ROW]           lanes [0:H) = fc_w, lane H = fc_b
#   [WHH0_OFF : +H)    W_hh0
#   [W1_OFF   : +2H)   [W_ih1 ; W_hh1]   (the wavefront concat operand)
HEAD_ROWS = 8
B1_ROW = VOCAB_SIZE
FC_ROW = VOCAB_SIZE + 1
WHH0_OFF = HEAD_ROWS
W1_OFF = HEAD_ROWS + HIDDEN_DIM
PACK_ROWS = HEAD_ROWS + 3 * HIDDEN_DIM
assert VOCAB_SIZE + 2 <= HEAD_ROWS


# ------------------------- fused Pallas kernel --------------------------------
def _fused_lstm_kernel(ids_ref, w_ref, h0_ref, c0_ref, out_ref,
                       *, seq_len, batch, hidden_dim, keep, vocab):
    T, B, H = seq_len, batch, hidden_dim

    # Single packed output tile: zero padding rows/lanes once up front.
    out_ref[...] = jnp.zeros_like(out_ref)

    # Static views into the single packed weight operand (cheap slices).
    a0 = w_ref[0:vocab, :]                           # (V, 4H)  emb@W_ih0 + b0
    b1 = w_ref[B1_ROW:B1_ROW + 1, :]                 # (1, 4H)
    fc_w = w_ref[FC_ROW:FC_ROW + 1, 0:H]             # (1, H)
    fc_b = w_ref[FC_ROW:FC_ROW + 1, H:H + 1]         # (1, 1)
    whh0 = w_ref[WHH0_OFF:WHH0_OFF + H, :]           # (H, 4H)
    w1 = w_ref[W1_OFF:W1_OFF + 2 * H, :]             # (2H, 4H) = [W_ih1; W_hh1]

    # Hoisted lane mask (JAX does not CSE broadcast_in_dim inside the unroll).
    lane = jax.lax.broadcasted_iota(jnp.int32, (B, 4 * H), 1)
    g_mask = jnp.logical_and(lane >= 2 * H, lane < 3 * H)

    ids = ids_ref[...]                               # (B, T) int32 token ids

    # Layer-0 input projection (embedding gather folded with x@W_ih0 + b0):
    # select-sum over the tiny pre-folded table (VPU only, no dynamic gather).
    # Independent of the recurrence -> off the serial critical path.
    def embed_proj(t):
        acc = jnp.where(ids[:, t:t + 1] == 0, a0[0:1, :], 0.0)
        for v in range(1, vocab):
            acc = acc + jnp.where(ids[:, t:t + 1] == v, a0[v:v + 1, :], 0.0)
        return acc                                   # (B, 4H)

    xp0 = [embed_proj(t) for t in range(T)]

    def gate_step(gates, c_prev):
        # Single full-width EUP pass: tanh(x) = 2*sigmoid(2x) - 1 on the g lanes
        # (PyTorch gate order i, f, g, o).
        y = jax.nn.sigmoid(jnp.where(g_mask, gates * 2.0, gates))
        act = jnp.where(g_mask, y * 2.0 - 1.0, y)
        i_g = act[:, 0 * H:1 * H]
        f_g = act[:, 1 * H:2 * H]
        g_g = act[:, 2 * H:3 * H]
        o_g = act[:, 3 * H:4 * H]
        c_new = f_g * c_prev + i_g * g_g
        h_new = o_g * jnp.tanh(c_new)
        return h_new, c_new

    h_l0, c_l0 = h0_ref[0], c0_ref[0]
    h_l1, c_l1 = h0_ref[1], c0_ref[1]

    # TODO(synk): inter-layer dropout (p=0.5) and head dropout (p=0.3) are
    # train-only in the reference module; this kernel implements eval mode.
    sig_cols = []
    for t in range(T):                               # static, fully unrolled
        # Layer 0: only h @ W_hh0 sits on the serial path (xp0 is hoisted).
        gates0 = xp0[t] + jnp.dot(h_l0, whh0, preferred_element_type=jnp.float32)
        h_l0, c_l0 = gate_step(gates0, c_l0)
        # Layer 1 wavefront: one merged (B,2H)@(2H,4H) matmul per step, issued
        # right after layer-0 step t (overlaps with layer-0 step t+1).
        gates1 = jnp.dot(jnp.concatenate([h_l0, h_l1], axis=1), w1,
                         preferred_element_type=jnp.float32) + b1
        h_l1, c_l1 = gate_step(gates1, c_l1)
        # fc + sigmoid head only for timesteps kept by sig_out[:, -vocab:];
        # h stays in vregs (no scratch stores); VPU multiply + lane reduce.
        if t >= T - keep:
            logit = jnp.sum(h_l1 * fc_w, axis=-1, keepdims=True) + fc_b
            sig_cols.append(jax.nn.sigmoid(logit))

    # Pack everything into the single lane-dense output tile:
    #   rows [0, L*B)      lanes [0,H)       -> h_n (layer-major)
    #   rows [L*B, 2*L*B)  lanes [0,H)       -> c_n (layer-major)
    #   rows [0, B)        lanes [H, H+keep) -> sig (already in (B, keep) layout)
    out_ref[0 * B:1 * B, 0:H] = h_l0
    out_ref[1 * B:2 * B, 0:H] = h_l1
    out_ref[2 * B:3 * B, 0:H] = c_l0
    out_ref[3 * B:4 * B, 0:H] = c_l1
    out_ref[0:B, H:H + keep] = jnp.concatenate(sig_cols, axis=1)


def fused_forward(ids, packed_w, h0, c0, *, seq_len, batch, hidden_dim, keep, vocab):
    """Single fused pallas_call: embedding + both LSTM layers + fc + sigmoid.

    ids      : (B, T) int32 token ids
    packed_w : (PACK_ROWS, 4H) f32 packed weights (see layout above)
    h0, c0   : (n_layers, B, H) f32 initial states
    returns  : (2*n_layers*B, 4H) packed output tile
    """
    T, B, H = seq_len, batch, hidden_dim
    out_rows = 2 * N_LAYERS * B
    kernel = functools.partial(_fused_lstm_kernel, seq_len=T, batch=B,
                               hidden_dim=H, keep=keep, vocab=vocab)
    grid_spec = pltpu.PrefetchScalarGridSpec(
        num_scalar_prefetch=0,
        grid=(1,),  # single invocation; whole problem (<100 KB) lives in VMEM
        in_specs=[
            pl.BlockSpec((B, T), lambda i: (0, 0)),                # token ids
            pl.BlockSpec((PACK_ROWS, 4 * H), lambda i: (0, 0)),    # packed weights
            pl.BlockSpec((N_LAYERS, B, H), lambda i: (0, 0, 0)),   # h0
            pl.BlockSpec((N_LAYERS, B, H), lambda i: (0, 0, 0)),   # c0
        ],
        out_specs=pl.BlockSpec((out_rows, 4 * H), lambda i: (0, 0)),
    )
    # Note(v7x/scaling): no "parallel" grid axis at B=2 -> one TensorCore; add a
    # parallel batch-tile axis (time recurrence stays "arbitrary") if batch grows.
    return pl.pallas_call(
        kernel,
        out_shape=jax.ShapeDtypeStruct((out_rows, 4 * H), jnp.float32),
        grid_spec=grid_spec,
        compiler_params=pltpu.CompilerParams(
            dimension_semantics=("arbitrary",)),
    )(ids, packed_w, h0, c0)


# ------------------------------- parameters ----------------------------------
def init_params(key):
    keys = jax.random.split(key, 3 + 4 * N_LAYERS)
    k = iter(keys)
    scale = 0.1
    params = {
        "embedding": scale * jax.random.normal(next(k), (VOCAB_SIZE, EMBED_DIM), jnp.float32),
        # fc weight in PyTorch Linear layout (out, in) = (1, H).
        "fc_w": scale * jax.random.normal(next(k), (OUTPUT_SIZE, HIDDEN_DIM), jnp.float32),
        "fc_b": scale * jax.random.normal(next(k), (1, OUTPUT_SIZE), jnp.float32),
        "layers": [],
    }
    for layer in range(N_LAYERS):
        e_in = EMBED_DIM if layer == 0 else HIDDEN_DIM
        w_ih = scale * jax.random.normal(next(k), (e_in, 4 * HIDDEN_DIM), jnp.float32)
        w_hh = scale * jax.random.normal(next(k), (HIDDEN_DIM, 4 * HIDDEN_DIM), jnp.float32)
        b_ih = scale * jax.random.normal(next(k), (1, 4 * HIDDEN_DIM), jnp.float32)
        b_hh = scale * jax.random.normal(next(k), (1, 4 * HIDDEN_DIM), jnp.float32)
        params["layers"].append({"w_ih": w_ih, "w_hh": w_hh, "b": b_ih + b_hh})
    return params


def pack_params(params):
    """Pack ALL weights into one (PACK_ROWS, 4H) f32 operand. Done ONCE, outside jit."""
    H = HIDDEN_DIM
    p0, p1 = params["layers"]
    hi = jax.lax.Precision.HIGHEST
    # Fold embedding lookup + layer-0 input projection + bias:  A0[v] = emb[v] @ W_ih0 + b0
    a0 = jnp.dot(params["embedding"], p0["w_ih"], precision=hi) + p0["b"]   # (V, 4H)
    head = jnp.zeros((HEAD_ROWS, 4 * H), jnp.float32)
    head = head.at[0:VOCAB_SIZE, :].set(a0)
    head = head.at[B1_ROW, :].set(p1["b"][0])
    head = head.at[FC_ROW, 0:H].set(params["fc_w"][0])
    head = head.at[FC_ROW, H].set(params["fc_b"][0, 0])
    packed = jnp.concatenate([head, p0["w_hh"], p1["w_ih"], p1["w_hh"]], axis=0)
    assert packed.shape == (PACK_ROWS, 4 * H)
    return packed


def init_hidden(batch_size):
    h = jnp.zeros((N_LAYERS, batch_size, HIDDEN_DIM), jnp.float32)
    c = jnp.zeros((N_LAYERS, batch_size, HIDDEN_DIM), jnp.float32)
    return (h, c)


# ------------------------------- full model ----------------------------------
@jax.jit
def lstm_forward(packed_w, x, hidden):
    """Eval-mode forward. x: (B, T) int32 token ids; hidden: (h0, c0) each (L, B, H)."""
    B, T = x.shape
    H = HIDDEN_DIM
    h0, c0 = hidden
    keep = min(VOCAB_SIZE, T * OUTPUT_SIZE)   # columns kept by sig_out[:, -vocab_size:]

    out = fused_forward(x.astype(jnp.int32), packed_w, h0, c0,
                        seq_len=T, batch=B, hidden_dim=H, keep=keep,
                        vocab=VOCAB_SIZE)

    nb = N_LAYERS * B
    h_n = out[0:nb, 0:H].reshape(N_LAYERS, B, H)
    c_n = out[nb:2 * nb, 0:H].reshape(N_LAYERS, B, H)
    sig_out = out[0:B, H:H + keep]            # already (B, keep); no reshape/transpose
    return sig_out, (h_n, c_n)


# ----------------------------- pure-JAX reference -----------------------------
def lstm_reference(params, x, hidden):
    """Eval-mode reference matching the PyTorch module (dropout = identity)."""
    hi = jax.lax.Precision.HIGHEST
    B, T = x.shape
    H = HIDDEN_DIM
    h, c = hidden
    hs = [h[l] for l in range(N_LAYERS)]
    cs = [c[l] for l in range(N_LAYERS)]
    emb = jnp.take(params["embedding"], x, axis=0)          # (B, T, E)
    outs = []
    for t in range(T):
        inp = emb[:, t, :]
        for l, p in enumerate(params["layers"]):
            gates = (jnp.dot(inp, p["w_ih"], precision=hi)
                     + jnp.dot(hs[l], p["w_hh"], precision=hi) + p["b"])
            i_g = jax.nn.sigmoid(gates[:, 0:H])
            f_g = jax.nn.sigmoid(gates[:, H:2 * H])
            g_g = jnp.tanh(gates[:, 2 * H:3 * H])
            o_g = jax.nn.sigmoid(gates[:, 3 * H:4 * H])
            cs[l] = f_g * cs[l] + i_g * g_g
            hs[l] = o_g * jnp.tanh(cs[l])
            inp = hs[l]                                      # inter-layer dropout: identity (eval)
        outs.append(inp)
    lstm_out = jnp.stack(outs, axis=1).reshape(-1, H)        # (B*T, H), batch-major
    logits = jnp.dot(lstm_out, params["fc_w"].T, precision=hi) + params["fc_b"]
    sig = jax.nn.sigmoid(logits).reshape(B, -1)[:, -VOCAB_SIZE:]
    return sig, (jnp.stack(hs), jnp.stack(cs))


# ----------------------------------- main -------------------------------------
if __name__ == "__main__":
    key = jax.random.PRNGKey(0)
    pkey, xkey = jax.random.split(key)

    params = init_params(pkey)
    packed_w = pack_params(params)            # packed ONCE, outside the jitted forward
    x = jax.random.randint(xkey, (BATCH, SEQ), 0, VOCAB_SIZE, dtype=jnp.int32)
    hidden = init_hidden(BATCH)

    sig_out, (h_n, c_n) = lstm_forward(packed_w, x, hidden)
    jax.block_until_ready((sig_out, h_n, c_n))

    keep = min(VOCAB_SIZE, SEQ * OUTPUT_SIZE)
    assert sig_out.shape == (BATCH, keep)
    assert h_n.shape == (N_LAYERS, BATCH, HIDDEN_DIM)
    assert c_n.shape == (N_LAYERS, BATCH, HIDDEN_DIM)

    # Correctness vs. the pure-JAX eval-mode reference of the PyTorch module.
    sig_ref, (h_ref, c_ref) = lstm_reference(params, x, hidden)
    assert jnp.allclose(sig_out, sig_ref, rtol=2e-3, atol=2e-3), \
        f"sig mismatch: {float(jnp.max(jnp.abs(sig_out - sig_ref)))}"
    assert jnp.allclose(h_n, h_ref, rtol=2e-3, atol=2e-3), \
        f"h_n mismatch: {float(jnp.max(jnp.abs(h_n - h_ref)))}"
    assert jnp.allclose(c_n, c_ref, rtol=2e-3, atol=2e-3), \
        f"c_n mismatch: {float(jnp.max(jnp.abs(c_n - c_ref)))}"

    print("KERNEL_OK")
</pallas_src>

<mosaic_0001>
module attributes {stable_mosaic.version = 11 : i64} {
  func.func @_fused_lstm_kernel(%arg0: i32, %arg1: memref<2x8xi32, #tpu.memory_space<vmem>>, %arg2: memref<104x128xf32, #tpu.memory_space<vmem>>, %arg3: memref<2x2x32xf32, #tpu.memory_space<vmem>>, %arg4: memref<2x2x32xf32, #tpu.memory_space<vmem>>, %arg5: memref<8x128xf32, #tpu.memory_space<vmem>>) attributes {dimension_semantics = [#tpu.dimension_semantics<arbitrary>], iteration_bounds = array<i64: 1>, scalar_prefetch = 0 : i64, scratch_operands = 0 : i64, tpu.core_type = #tpu.core_type<tc>, window_params = [{pipeline_mode = #tpu.pipeline_mode<synchronous>, transform_indices = @transform_0, window_bounds = array<i64: 2, 8>}, {pipeline_mode = #tpu.pipeline_mode<synchronous>, transform_indices = @transform_1, window_bounds = array<i64: 104, 128>}, {pipeline_mode = #tpu.pipeline_mode<synchronous>, transform_indices = @transform_2, window_bounds = array<i64: 2, 2, 32>}, {pipeline_mode = #tpu.pipeline_mode<synchronous>, transform_indices = @transform_3, window_bounds = array<i64: 2, 2, 32>}, {pipeline_mode = #tpu.pipeline_mode<synchronous>, transform_indices = @transform_4, window_bounds = array<i64: 8, 128>}]} {
    %cst = arith.constant 0.000000e+00 : f32
    %0 = vector.broadcast %cst : f32 to vector<8x128xf32>
    %c0 = arith.constant 0 : index
    %c0_0 = arith.constant 0 : index
    %1 = vector.load %arg5[%c0, %c0_0] : memref<8x128xf32, #tpu.memory_space<vmem>>, vector<8x128xf32>
    tpu.vector_store %arg5[%c0, %c0_0], %0 {strides = array<i32>} : memref<8x128xf32, #tpu.memory_space<vmem>>, vector<8x128xf32>,
    %c0_1 = arith.constant 0 : index
    %c0_2 = arith.constant 0 : index
    %2 = vector.load %arg2[%c0_1, %c0_2] : memref<104x128xf32, #tpu.memory_space<vmem>>, vector<4x128xf32>
    %c4 = arith.constant 4 : index
    %c0_3 = arith.constant 0 : index
    %3 = vector.load %arg2[%c4, %c0_3] : memref<104x128xf32, #tpu.memory_space<vmem>>, vector<1x128xf32>
    %c5 = arith.constant 5 : index
    %c0_4 = arith.constant 0 : index
    %4 = vector.load %arg2[%c5, %c0_4] : memref<104x128xf32, #tpu.memory_space<vmem>>, vector<1x32xf32>
    %c5_5 = arith.constant 5 : index
    %c32 = arith.constant 32 : index
    %5 = vector.load %arg2[%c5_5, %c32] : memref<104x128xf32, #tpu.memory_space<vmem>>, vector<1x1xf32>
    %c8 = arith.constant 8 : index
    %c0_6 = arith.constant 0 : index
    %6 = vector.load %arg2[%c8, %c0_6] : memref<104x128xf32, #tpu.memory_space<vmem>>, vector<32x128xf32>
    %c40 = arith.constant 40 : index
    %c0_7 = arith.constant 0 : index
    %7 = vector.load %arg2[%c40, %c0_7] : memref<104x128xf32, #tpu.memory_space<vmem>>, vector<64x128xf32>
    %8 = tpu.iota {dimensions = array<i32: 1>} : vector<2x128xi32>
    %c64_i32 = arith.constant 64 : i32
    %9 = vector.broadcast %c64_i32 : i32 to vector<2x128xi32>
    %10 = arith.cmpi sge, %8, %9 : vector<2x128xi32>
    %c96_i32 = arith.constant 96 : i32
    %11 = vector.broadcast %c96_i32 : i32 to vector<2x128xi32>
    %12 = arith.cmpi slt, %8, %11 : vector<2x128xi32>
    %13 = arith.andi %10, %12 : vector<2x128xi1>
    %c0_8 = arith.constant 0 : index
    %c0_9 = arith.constant 0 : index
    %14 = vector.load %arg1[%c0_8, %c0_9] : memref<2x8xi32, #tpu.memory_space<vmem>>, vector<2x8xi32>
    %15 = vector.extract_strided_slice %14 {offsets = [0, 0], sizes = [2, 1], strides = [1, 1]} : vector<2x8xi32> to vector<2x1xi32>
    %c0_i32 = arith.constant 0 : i32
    %16 = vector.broadcast %c0_i32 : i32 to vector<2x1xi32>
    %17 = arith.cmpi eq, %15, %16 : vector<2x1xi32>
    %18 = vector.extract_strided_slice %2 {offsets = [0, 0], sizes = [1, 128], strides = [1, 1]} : vector<4x128xf32> to vector<1x128xf32>
    %cst_10 = arith.constant 0.000000e+00 : f32
    %19 = vector.shape_cast %17 : vector<2x1xi1> to vector<2x1xi1>
    %20 = vector.broadcast %19 : vector<2x1xi1> to vector<2x128xi1>
    %21 = vector.shape_cast %18 : vector<1x128xf32> to vector<1x128xf32>
    %22 = vector.broadcast %21 : vector<1x128xf32> to vector<2x128xf32>
    %23 = vector.broadcast %cst_10 : f32 to vector<2x128xf32>
    %24 = arith.select %20, %22, %23 : vector<2x128xi1>, vector<2x128xf32>
    %25 = vector.extract_strided_slice %14 {offsets = [0, 0], sizes = [2, 1], strides = [1, 1]} : vector<2x8xi32> to vector<2x1xi32>
    %c1_i32 = arith.constant 1 : i32
    %26 = vector.broadcast %c1_i32 : i32 to vector<2x1xi32>
    %27 = arith.cmpi eq, %25, %26 : vector<2x1xi32>
    %28 = vector.extract_strided_slice %2 {offsets = [1, 0], sizes = [1, 128], strides = [1, 1]} : vector<4x128xf32> to vector<1x128xf32>
    %cst_11 = arith.constant 0.000000e+00 : f32
    %29 = vector.shape_cast %27 : vector<2x1xi1> to vector<2x1xi1>
    %30 = vector.broadcast %29 : vector<2x1xi1> to vector<2x128xi1>
    %31 = vector.shape_cast %28 : vector<1x128xf32> to vector<1x128xf32>
    %32 = vector.broadcast %31 : vector<1x128xf32> to vector<2x128xf32>
    %33 = vector.broadcast %cst_11 : f32 to vector<2x128xf32>
    %34 = arith.select %30, %32, %33 : vector<2x128xi1>, vector<2x128xf32>
    %35 = arith.addf %24, %34 : vector<2x128xf32>
    %36 = vector.extract_strided_slice %14 {offsets = [0, 0], sizes = [2, 1], strides = [1, 1]} : vector<2x8xi32> to vector<2x1xi32>
    %c2_i32 = arith.constant 2 : i32
    %37 = vector.broadcast %c2_i32 : i32 to vector<2x1xi32>
    %38 = arith.cmpi eq, %36, %37 : vector<2x1xi32>
    %39 = vector.extract_strided_slice %2 {offsets = [2, 0], sizes = [1, 128], strides = [1, 1]} : vector<4x128xf32> to vector<1x128xf32>
    %cst_12 = arith.constant 0.000000e+00 : f32
    %40 = vector.shape_cast %38 : vector<2x1xi1> to vector<2x1xi1>
    %41 = vector.broadcast %40 : vector<2x1xi1> to vector<2x128xi1>
    %42 = vector.shape_cast %39 : vector<1x128xf32> to vector<1x128xf32>
    %43 = vector.broadcast %42 : vector<1x128xf32> to vector<2x128xf32>
    %44 = vector.broadcast %cst_12 : f32 to vector<2x128xf32>
    %45 = arith.select %41, %43, %44 : vector<2x128xi1>, vector<2x128xf32>
    %46 = arith.addf %35, %45 : vector<2x128xf32>
    %47 = vector.extract_strided_slice %14 {offsets = [0, 0], sizes = [2, 1], strides = [1, 1]} : vector<2x8xi32> to vector<2x1xi32>
    %c3_i32 = arith.constant 3 : i32
    %48 = vector.broadcast %c3_i32 : i32 to vector<2x1xi32>
    %49 = arith.cmpi eq, %47, %48 : vector<2x1xi32>
    %50 = vector.extract_strided_slice %2 {offsets = [3, 0], sizes = [1, 128], strides = [1, 1]} : vector<4x128xf32> to vector<1x128xf32>
    %cst_13 = arith.constant 0.000000e+00 : f32
    %51 = vector.shape_cast %49 : vector<2x1xi1> to vector<2x1xi1>
    %52 = vector.broadcast %51 : vector<2x1xi1> to vector<2x128xi1>
    %53 = vector.shape_cast %50 : vector<1x128xf32> to vector<1x128xf32>
    %54 = vector.broadcast %53 : vector<1x128xf32> to vector<2x128xf32>
    %55 = vector.broadcast %cst_13 : f32 to vector<2x128xf32>
    %56 = arith.select %52, %54, %55 : vector<2x128xi1>, vector<2x128xf32>
    %57 = arith.addf %46, %56 : vector<2x128xf32>
    %58 = vector.extract_strided_slice %14 {offsets = [0, 1], sizes = [2, 1], strides = [1, 1]} : vector<2x8xi32> to vector<2x1xi32>
    %c0_i32_14 = arith.constant 0 : i32
    %59 = vector.broadcast %c0_i32_14 : i32 to vector<2x1xi32>
    %60 = arith.cmpi eq, %58, %59 : vector<2x1xi32>
    %61 = vector.extract_strided_slice %2 {offsets = [0, 0], sizes = [1, 128], strides = [1, 1]} : vector<4x128xf32> to vector<1x128xf32>
    %cst_15 = arith.constant 0.000000e+00 : f32
    %62 = vector.shape_cast %60 : vector<2x1xi1> to vector<2x1xi1>
    %63 = vector.broadcast %62 : vector<2x1xi1> to vector<2x128xi1>
    %64 = vector.shape_cast %61 : vector<1x128xf32> to vector<1x128xf32>
    %65 = vector.broadcast %64 : vector<1x128xf32> to vector<2x128xf32>
    %66 = vector.broadcast %cst_15 : f32 to vector<2x128xf32>
    %67 = arith.select %63, %65, %66 : vector<2x128xi1>, vector<2x128xf32>
    %68 = vector.extract_strided_slice %14 {offsets = [0, 1], sizes = [2, 1], strides = [1, 1]} : vector<2x8xi32> to vector<2x1xi32>
    %c1_i32_16 = arith.constant 1 : i32
    %69 = vector.broadcast %c1_i32_16 : i32 to vector<2x1xi32>
    %70 = arith.cmpi eq, %68, %69 : vector<2x1xi32>
    %71 = vector.extract_strided_slice %2 {offsets = [1, 0], sizes = [1, 128], strides = [1, 1]} : vector<4x128xf32> to vector<1x128xf32>
    %cst_17 = arith.constant 0.000000e+00 : f32
    %72 = vector.shape_cast %70 : vector<2x1xi1> to vector<2x1xi1>
    %73 = vector.broadcast %72 : vector<2x1xi1> to vector<2x128xi1>
    %74 = vector.shape_cast %71 : vector<1x128xf32> to vector<1x128xf32>
    %75 = vector.broadcast %74 : vector<1x128xf32> to vector<2x128xf32>
    %76 = vector.broadcast %cst_17 : f32 to vector<2x128xf32>
    %77 = arith.select %73, %75, %76 : vector<2x128xi1>, vector<2x128xf32>
    %78 = arith.addf %67, %77 : vector<2x128xf32>
    %79 = vector.extract_strided_slice %14 {offsets = [0, 1], sizes = [2, 1], strides = [1, 1]} : vector<2x8xi32> to vector<2x1xi32>
    %c2_i32_18 = arith.constant 2 : i32
    %80 = vector.broadcast %c2_i32_18 : i32 to vector<2x1xi32>
    %81 = arith.cmpi eq, %79, %80 : vector<2x1xi32>
    %82 = vector.extract_strided_slice %2 {offsets = [2, 0], sizes = [1, 128], strides = [1, 1]} : vector<4x128xf32> to vector<1x128xf32>
    %cst_19 = arith.constant 0.000000e+00 : f32
    %83 = vector.shape_cast %81 : vector<2x1xi1> to vector<2x1xi1>
    %84 = vector.broadcast %83 : vector<2x1xi1> to vector<2x128xi1>
    %85 = vector.shape_cast %82 : vector<1x128xf32> to vector<1x128xf32>
    %86 = vector.broadcast %85 : vector<1x128xf32> to vector<2x128xf32>
    %87 = vector.broadcast %cst_19 : f32 to vector<2x128xf32>
    %88 = arith.select %84, %86, %87 : vector<2x128xi1>, vector<2x128xf32>
    %89 = arith.addf %78, %88 : vector<2x128xf32>
    %90 = vector.extract_strided_slice %14 {offsets = [0, 1], sizes = [2, 1], strides = [1, 1]} : vector<2x8xi32> to vector<2x1xi32>
    %c3_i32_20 = arith.constant 3 : i32
    %91 = vector.broadcast %c3_i32_20 : i32 to vector<2x1xi32>
    %92 = arith.cmpi eq, %90, %91 : vector<2x1xi32>
    %93 = vector.extract_strided_slice %2 {offsets = [3, 0], sizes = [1, 128], strides = [1, 1]} : vector<4x128xf32> to vector<1x128xf32>
    %cst_21 = arith.constant 0.000000e+00 : f32
    %94 = vector.shape_cast %92 : vector<2x1xi1> to vector<2x1xi1>
    %95 = vector.broadcast %94 : vector<2x1xi1> to vector<2x128xi1>
    %96 = vector.shape_cast %93 : vector<1x128xf32> to vector<1x128xf32>
    %97 = vector.broadcast %96 : vector<1x128xf32> to vector<2x128xf32>
    %98 = vector.broadcast %cst_21 : f32 to vector<2x128xf32>
    %99 = arith.select %95, %97, %98 : vector<2x128xi1>, vector<2x128xf32>
    %100 = arith.addf %89, %99 : vector<2x128xf32>
    %101 = vector.extract_strided_slice %14 {offsets = [0, 2], sizes = [2, 1], strides = [1, 1]} : vector<2x8xi32> to vector<2x1xi32>
    %c0_i32_22 = arith.constant 0 : i32
    %102 = vector.broadcast %c0_i32_22 : i32 to vector<2x1xi32>
    %103 = arith.cmpi eq, %101, %102 : vector<2x1xi32>
    %104 = vector.extract_strided_slice %2 {offsets = [0, 0], sizes = [1, 128], strides = [1, 1]} : vector<4x128xf32> to vector<1x128xf32>
    %cst_23 = arith.constant 0.000000e+00 : f32
    %105 = vector.shape_cast %103 : vector<2x1xi1> to vector<2x1xi1>
    %106 = vector.broadcast %105 : vector<2x1xi1> to vector<2x128xi1>
    %107 = vector.shape_cast %104 : vector<1x128xf32> to vector<1x128xf32>
    %108 = vector.broadcast %107 : vector<1x128xf32> to vector<2x128xf32>
    %109 = vector.broadcast %cst_23 : f32 to vector<2x128xf32>
    %110 = arith.select %106, %108, %109 : vector<2x128xi1>, vector<2x128xf32>
    %111 = vector.extract_strided_slice %14 {offsets = [0, 2], sizes = [2, 1], strides = [1, 1]} : vector<2x8xi32> to vector<2x1xi32>
    %c1_i32_24 = arith.constant 1 : i32
    %112 = vector.broadcast %c1_i32_24 : i32 to vector<2x1xi32>
    %113 = arith.cmpi eq, %111, %112 : vector<2x1xi32>
    %114 = vector.extract_strided_slice %2 {offsets = [1, 0], sizes = [1, 128], strides = [1, 1]} : vector<4x128xf32> to vector<1x128xf32>
    %cst_25 = arith.constant 0.000000e+00 : f32
    %115 = vector.shape_cast %113 : vector<2x1xi1> to vector<2x1xi1>
    %116 = vector.broadcast %115 : vector<2x1xi1> to vector<2x128xi1>
    %117 = vector.shape_cast %114 : vector<1x128xf32> to vector<1x128xf32>
    %118 = vector.broadcast %117 : vector<1x128xf32> to vector<2x128xf32>
    %119 = vector.broadcast %cst_25 : f32 to vector<2x128xf32>
    %120 = arith.select %116, %118, %119 : vector<2x128xi1>, vector<2x128xf32>
    %121 = arith.addf %110, %120 : vector<2x128xf32>
    %122 = vector.extract_strided_slice %14 {offsets = [0, 2], sizes = [2, 1], strides = [1, 1]} : vector<2x8xi32> to vector<2x1xi32>
    %c2_i32_26 = arith.constant 2 : i32
    %123 = vector.broadcast %c2_i32_26 : i32 to vector<2x1xi32>
    %124 = arith.cmpi eq, %122, %123 : vector<2x1xi32>
    %125 = vector.extract_strided_slice %2 {offsets = [2, 0], sizes = [1, 128], strides = [1, 1]} : vector<4x128xf32> to vector<1x128xf32>
    %cst_27 = arith.constant 0.000000e+00 : f32
    %126 = vector.shape_cast %124 : vector<2x1xi1> to vector<2x1xi1>
    %127 = vector.broadcast %126 : vector<2x1xi1> to vector<2x128xi1>
    %128 = vector.shape_cast %125 : vector<1x128xf32> to vector<1x128xf32>
    %129 = vector.broadcast %128 : vector<1x128xf32> to vector<2x128xf32>
    %130 = vector.broadcast %cst_27 : f32 to vector<2x128xf32>
    %131 = arith.select %127, %129, %130 : vector<2x128xi1>, vector<2x128xf32>
    %132 = arith.addf %121, %131 : vector<2x128xf32>
    %133 = vector.extract_strided_slice %14 {offsets = [0, 2], sizes = [2, 1], strides = [1, 1]} : vector<2x8xi32> to vector<2x1xi32>
    %c3_i32_28 = arith.constant 3 : i32
    %134 = vector.broadcast %c3_i32_28 : i32 to vector<2x1xi32>
    %135 = arith.cmpi eq, %133, %134 : vector<2x1xi32>
    %136 = vector.extract_strided_slice %2 {offsets = [3, 0], sizes = [1, 128], strides = [1, 1]} : vector<4x128xf32> to vector<1x128xf32>
    %cst_29 = arith.constant 0.000000e+00 : f32
    %137 = vector.shape_cast %135 : vector<2x1xi1> to vector<2x1xi1>
    %138 = vector.broadcast %137 : vector<2x1xi1> to vector<2x128xi1>
    %139 = vector.shape_cast %136 : vector<1x128xf32> to vector<1x128xf32>
    %140 = vector.broadcast %139 : vector<1x128xf32> to vector<2x128xf32>
    %141 = vector.broadcast %cst_29 : f32 to vector<2x128xf32>
    %142 = arith.select %138, %140, %141 : vector<2x128xi1>, vector<2x128xf32>
    %143 = arith.addf %132, %142 : vector<2x128xf32>
    %144 = vector.extract_strided_slice %14 {offsets = [0, 3], sizes = [2, 1], strides = [1, 1]} : vector<2x8xi32> to vector<2x1xi32>
    %c0_i32_30 = arith.constant 0 : i32
    %145 = vector.broadcast %c0_i32_30 : i32 to vector<2x1xi32>
    %146 = arith.cmpi eq, %144, %145 : vector<2x1xi32>
    %147 = vector.extract_strided_slice %2 {offsets = [0, 0], sizes = [1, 128], strides = [1, 1]} : vector<4x128xf32> to vector<1x128xf32>
    %cst_31 = arith.constant 0.000000e+00 : f32
    %148 = vector.shape_cast %146 : vector<2x1xi1> to vector<2x1xi1>
    %149 = vector.broadcast %148 : vector<2x1xi1> to vector<2x128xi1>
    %150 = vector.shape_cast %147 : vector<1x128xf32> to vector<1x128xf32>
    %151 = vector.broadcast %150 : vector<1x128xf32> to vector<2x128xf32>
    %152 = vector.broadcast %cst_31 : f32 to vector<2x128xf32>
    %153 = arith.select %149, %151, %152 : vector<2x128xi1>, vector<2x128xf32>
    %154 = vector.extract_strided_slice %14 {offsets = [0, 3], sizes = [2, 1], strides = [1, 1]} : vector<2x8xi32> to vector<2x1xi32>
    %c1_i32_32 = arith.constant 1 : i32
    %155 = vector.broadcast %c1_i32_32 : i32 to vector<2x1xi32>
    %156 = arith.cmpi eq, %154, %155 : vector<2x1xi32>
    %157 = vector.extract_strided_slice %2 {offsets = [1, 0], sizes = [1, 128], strides = [1, 1]} : vector<4x128xf32> to vector<1x128xf32>
    %cst_33 = arith.constant 0.000000e+00 : f32
    %158 = vector.shape_cast %156 : vector<2x1xi1> to vector<2x1xi1>
    %159 = vector.broadcast %158 : vector<2x1xi1> to vector<2x128xi1>
    %160 = vector.shape_cast %157 : vector<1x128xf32> to vector<1x128xf32>
    %161 = vector.broadcast %160 : vector<1x128xf32> to vector<2x128xf32>
    %162 = vector.broadcast %cst_33 : f32 to vector<2x128xf32>
    %163 = arith.select %159, %161, %162 : vector<2x128xi1>, vector<2x128xf32>
    %164 = arith.addf %153, %163 : vector<2x128xf32>
    %165 = vector.extract_strided_slice %14 {offsets = [0, 3], sizes = [2, 1], strides = [1, 1]} : vector<2x8xi32> to vector<2x1xi32>
    %c2_i32_34 = arith.constant 2 : i32
    %166 = vector.broadcast %c2_i32_34 : i32 to vector<2x1xi32>
    %167 = arith.cmpi eq, %165, %166 : vector<2x1xi32>
    %168 = vector.extract_strided_slice %2 {offsets = [2, 0], sizes = [1, 128], strides = [1, 1]} : vector<4x128xf32> to vector<1x128xf32>
    %cst_35 = arith.constant 0.000000e+00 : f32
    %169 = vector.shape_cast %167 : vector<2x1xi1> to vector<2x1xi1>
    %170 = vector.broadcast %169 : vector<2x1xi1> to vector<2x128xi1>
    %171 = vector.shape_cast %168 : vector<1x128xf32> to vector<1x128xf32>
    %172 = vector.broadcast %171 : vector<1x128xf32> to vector<2x128xf32>
    %173 = vector.broadcast %cst_35 : f32 to vector<2x128xf32>
    %174 = arith.select %170, %172, %173 : vector<2x128xi1>, vector<2x128xf32>
    %175 = arith.addf %164, %174 : vector<2x128xf32>
    %176 = vector.extract_strided_slice %14 {offsets = [0, 3], sizes = [2, 1], strides = [1, 1]} : vector<2x8xi32> to vector<2x1xi32>
    %c3_i32_36 = arith.constant 3 : i32
    %177 = vector.broadcast %c3_i32_36 : i32 to vector<2x1xi32>
    %178 = arith.cmpi eq, %176, %177 : vector<2x1xi32>
    %179 = vector.extract_strided_slice %2 {offsets = [3, 0], sizes = [1, 128], strides = [1, 1]} : vector<4x128xf32> to vector<1x128xf32>
    %cst_37 = arith.constant 0.000000e+00 : f32
    %180 = vector.shape_cast %178 : vector<2x1xi1> to vector<2x1xi1>
    %181 = vector.broadcast %180 : vector<2x1xi1> to vector<2x128xi1>
    %182 = vector.shape_cast %179 : vector<1x128xf32> to vector<1x128xf32>
    %183 = vector.broadcast %182 : vector<1x128xf32> to vector<2x128xf32>
    %184 = vector.broadcast %cst_37 : f32 to vector<2x128xf32>
    %185 = arith.select %181, %183, %184 : vector<2x128xi1>, vector<2x128xf32>
    %186 = arith.addf %175, %185 : vector<2x128xf32>
    %187 = vector.extract_strided_slice %14 {offsets = [0, 4], sizes = [2, 1], strides = [1, 1]} : vector<2x8xi32> to vector<2x1xi32>
    %c0_i32_38 = arith.constant 0 : i32
    %188 = vector.broadcast %c0_i32_38 : i32 to vector<2x1xi32>
    %189 = arith.cmpi eq, %187, %188 : vector<2x1xi32>
    %190 = vector.extract_strided_slice %2 {offsets = [0, 0], sizes = [1, 128], strides = [1, 1]} : vector<4x128xf32> to vector<1x128xf32>
    %cst_39 = arith.constant 0.000000e+00 : f32
    %191 = vector.shape_cast %189 : vector<2x1xi1> to vector<2x1xi1>
    %192 = vector.broadcast %191 : vector<2x1xi1> to vector<2x128xi1>
    %193 = vector.shape_cast %190 : vector<1x128xf32> to vector<1x128xf32>
    %194 = vector.broadcast %193 : vector<1x128xf32> to vector<2x128xf32>
    %195 = vector.broadcast %cst_39 : f32 to vector<2x128xf32>
    %196 = arith.select %192, %194, %195 : vector<2x128xi1>, vector<2x128xf32>
    %197 = vector.extract_strided_slice %14 {offsets = [0, 4], sizes = [2, 1], strides = [1, 1]} : vector<2x8xi32> to vector<2x1xi32>
    %c1_i32_40 = arith.constant 1 : i32
    %198 = vector.broadcast %c1_i32_40 : i32 to vector<2x1xi32>
    %199 = arith.cmpi eq, %197, %198 : vector<2x1xi32>
    %200 = vector.extract_strided_slice %2 {offsets = [1, 0], sizes = [1, 128], strides = [1, 1]} : vector<4x128xf32> to vector<1x128xf32>
    %cst_41 = arith.constant 0.000000e+00 : f32
    %201 = vector.shape_cast %199 : vector<2x1xi1> to vector<2x1xi1>
    %202 = vector.broadcast %201 : vector<2x1xi1> to vector<2x128xi1>
    %203 = vector.shape_cast %200 : vector<1x128xf32> to vector<1x128xf32>
    %204 = vector.broadcast %203 : vector<1x128xf32> to vector<2x128xf32>
    %205 = vector.broadcast %cst_41 : f32 to vector<2x128xf32>
    %206 = arith.select %202, %204, %205 : vector<2x128xi1>, vector<2x128xf32>
    %207 = arith.addf %196, %206 : vector<2x128xf32>
    %208 = vector.extract_strided_slice %14 {offsets = [0, 4], sizes = [2, 1], strides = [1, 1]} : vector<2x8xi32> to vector<2x1xi32>
    %c2_i32_42 = arith.constant 2 : i32
    %209 = vector.broadcast %c2_i32_42 : i32 to vector<2x1xi32>
    %210 = arith.cmpi eq, %208, %209 : vector<2x1xi32>
    %211 = vector.extract_strided_slice %2 {offsets = [2, 0], sizes = [1, 128], strides = [1, 1]} : vector<4x128xf32> to vector<1x128xf32>
    %cst_43 = arith.constant 0.000000e+00 : f32
    %212 = vector.shape_cast %210 : vector<2x1xi1> to vector<2x1xi1>
    %213 = vector.broadcast %212 : vector<2x1xi1> to vector<2x128xi1>
    %214 = vector.shape_cast %211 : vector<1x128xf32> to vector<1x128xf32>
    %215 = vector.broadcast %214 : vector<1x128xf32> to vector<2x128xf32>
    %216 = vector.broadcast %cst_43 : f32 to vector<2x128xf32>
    %217 = arith.select %213, %215, %216 : vector<2x128xi1>, vector<2x128xf32>
    %218 = arith.addf %207, %217 : vector<2x128xf32>
    %219 = vector.extract_strided_slice %14 {offsets = [0, 4], sizes = [2, 1], strides = [1, 1]} : vector<2x8xi32> to vector<2x1xi32>
    %c3_i32_44 = arith.constant 3 : i32
    %220 = vector.broadcast %c3_i32_44 : i32 to vector<2x1xi32>
    %221 = arith.cmpi eq, %219, %220 : vector<2x1xi32>
    %222 = vector.extract_strided_slice %2 {offsets = [3, 0], sizes = [1, 128], strides = [1, 1]} : vector<4x128xf32> to vector<1x128xf32>
    %cst_45 = arith.constant 0.000000e+00 : f32
    %223 = vector.shape_cast %221 : vector<2x1xi1> to vector<2x1xi1>
    %224 = vector.broadcast %223 : vector<2x1xi1> to vector<2x128xi1>
    %225 = vector.shape_cast %222 : vector<1x128xf32> to vector<1x128xf32>
    %226 = vector.broadcast %225 : vector<1x128xf32> to vector<2x128xf32>
    %227 = vector.broadcast %cst_45 : f32 to vector<2x128xf32>
    %228 = arith.select %224, %226, %227 : vector<2x128xi1>, vector<2x128xf32>
    %229 = arith.addf %218, %228 : vector<2x128xf32>
    %230 = vector.extract_strided_slice %14 {offsets = [0, 5], sizes = [2, 1], strides = [1, 1]} : vector<2x8xi32> to vector<2x1xi32>
    %c0_i32_46 = arith.constant 0 : i32
    %231 = vector.broadcast %c0_i32_46 : i32 to vector<2x1xi32>
    %232 = arith.cmpi eq, %230, %231 : vector<2x1xi32>
    %233 = vector.extract_strided_slice %2 {offsets = [0, 0], sizes = [1, 128], strides = [1, 1]} : vector<4x128xf32> to vector<1x128xf32>
    %cst_47 = arith.constant 0.000000e+00 : f32
    %234 = vector.shape_cast %232 : vector<2x1xi1> to vector<2x1xi1>
    %235 = vector.broadcast %234 : vector<2x1xi1> to vector<2x128xi1>
    %236 = vector.shape_cast %233 : vector<1x128xf32> to vector<1x128xf32>
    %237 = vector.broadcast %236 : vector<1x128xf32> to vector<2x128xf32>
    %238 = vector.broadcast %cst_47 : f32 to vector<2x128xf32>
    %239 = arith.select %235, %237, %238 : vector<2x128xi1>, vector<2x128xf32>
    %240 = vector.extract_strided_slice %14 {offsets = [0, 5], sizes = [2, 1], strides = [1, 1]} : vector<2x8xi32> to vector<2x1xi32>
    %c1_i32_48 = arith.constant 1 : i32
    %241 = vector.broadcast %c1_i32_48 : i32 to vector<2x1xi32>
    %242 = arith.cmpi eq, %240, %241 : vector<2x1xi32>
    %243 = vector.extract_strided_slice %2 {offsets = [1, 0], sizes = [1, 128], strides = [1, 1]} : vector<4x128xf32> to vector<1x128xf32>
    %cst_49 = arith.constant 0.000000e+00 : f32
    %244 = vector.shape_cast %242 : vector<2x1xi1> to vector<2x1xi1>
    %245 = vector.broadcast %244 : vector<2x1xi1> to vector<2x128xi1>
    %246 = vector.shape_cast %243 : vector<1x128xf32> to vector<1x128xf32>
    %247 = vector.broadcast %246 : vector<1x128xf32> to vector<2x128xf32>
    %248 = vector.broadcast %cst_49 : f32 to vector<2x128xf32>
    %249 = arith.select %245, %247, %248 : vector<2x128xi1>, vector<2x128xf32>
    %250 = arith.addf %239, %249 : vector<2x128xf32>
    %251 = vector.extract_strided_slice %14 {offsets = [0, 5], sizes = [2, 1], strides = [1, 1]} : vector<2x8xi32> to vector<2x1xi32>
    %c2_i32_50 = arith.constant 2 : i32
    %252 = vector.broadcast %c2_i32_50 : i32 to vector<2x1xi32>
    %253 = arith.cmpi eq, %251, %252 : vector<2x1xi32>
    %254 = vector.extract_strided_slice %2 {offsets = [2, 0], sizes = [1, 128], strides = [1, 1]} : vector<4x128xf32> to vector<1x128xf32>
    %cst_51 = arith.constant 0.000000e+00 : f32
    %255 = vector.shape_cast %253 : vector<2x1xi1> to vector<2x1xi1>
    %256 = vector.broadcast %255 : vector<2x1xi1> to vector<2x128xi1>
    %257 = vector.shape_cast %254 : vector<1x128xf32> to vector<1x128xf32>
    %258 = vector.broadcast %257 : vector<1x128xf32> to vector<2x128xf32>
    %259 = vector.broadcast %cst_51 : f32 to vector<2x128xf32>
    %260 = arith.select %256, %258, %259 : vector<2x128xi1>, vector<2x128xf32>
    %261 = arith.addf %250, %260 : vector<2x128xf32>
    %262 = vector.extract_strided_slice %14 {offsets = [0, 5], sizes = [2, 1], strides = [1, 1]} : vector<2x8xi32> to vector<2x1xi32>
    %c3_i32_52 = arith.constant 3 : i32
    %263 = vector.broadcast %c3_i32_52 : i32 to vector<2x1xi32>
    %264 = arith.cmpi eq, %262, %263 : vector<2x1xi32>
    %265 = vector.extract_strided_slice %2 {offsets = [3, 0], sizes = [1, 128], strides = [1, 1]} : vector<4x128xf32> to vector<1x128xf32>
    %cst_53 = arith.constant 0.000000e+00 : f32
    %266 = vector.shape_cast %264 : vector<2x1xi1> to vector<2x1xi1>
    %267 = vector.broadcast %266 : vector<2x1xi1> to vector<2x128xi1>
    %268 = vector.shape_cast %265 : vector<1x128xf32> to vector<1x128xf32>
    %269 = vector.broadcast %268 : vector<1x128xf32> to vector<2x128xf32>
    %270 = vector.broadcast %cst_53 : f32 to vector<2x128xf32>
    %271 = arith.select %267, %269, %270 : vector<2x128xi1>, vector<2x128xf32>
    %272 = arith.addf %261, %271 : vector<2x128xf32>
    %273 = vector.extract_strided_slice %14 {offsets = [0, 6], sizes = [2, 1], strides = [1, 1]} : vector<2x8xi32> to vector<2x1xi32>
    %c0_i32_54 = arith.constant 0 : i32
    %274 = vector.broadcast %c0_i32_54 : i32 to vector<2x1xi32>
    %275 = arith.cmpi eq, %273, %274 : vector<2x1xi32>
    %276 = vector.extract_strided_slice %2 {offsets = [0, 0], sizes = [1, 128], strides = [1, 1]} : vector<4x128xf32> to vector<1x128xf32>
    %cst_55 = arith.constant 0.000000e+00 : f32
    %277 = vector.shape_cast %275 : vector<2x1xi1> to vector<2x1xi1>
    %278 = vector.broadcast %277 : vector<2x1xi1> to vector<2x128xi1>
    %279 = vector.shape_cast %276 : vector<1x128xf32> to vector<1x128xf32>
    %280 = vector.broadcast %279 : vector<1x128xf32> to vector<2x128xf32>
    %281 = vector.broadcast %cst_55 : f32 to vector<2x128xf32>
    %282 = arith.select %278, %280, %281 : vector<2x128xi1>, vector<2x128xf32>
    %283 = vector.extract_strided_slice %14 {offsets = [0, 6], sizes = [2, 1], strides = [1, 1]} : vector<2x8xi32> to vector<2x1xi32>
    %c1_i32_56 = arith.constant 1 : i32
    %284 = vector.broadcast %c1_i32_56 : i32 to vector<2x1xi32>
    %285 = arith.cmpi eq, %283, %284 : vector<2x1xi32>
    %286 = vector.extract_strided_slice %2 {offsets = [1, 0], sizes = [1, 128], strides = [1, 1]} : vector<4x128xf32> to vector<1x128xf32>
    %cst_57 = arith.constant 0.000000e+00 : f32
    %287 = vector.shape_cast %285 : vector<2x1xi1> to vector<2x1xi1>
    %288 = vector.broadcast %287 : vector<2x1xi1> to vector<2x128xi1>
    %289 = vector.shape_cast %286 : vector<1x128xf32> to vector<1x128xf32>
    %290 = vector.broadcast %289 : vector<1x128xf32> to vector<2x128xf32>
    %291 = vector.broadcast %cst_57 : f32 to vector<2x128xf32>
    %292 = arith.select %288, %290, %291 : vector<2x128xi1>, vector<2x128xf32>
    %293 = arith.addf %282, %292 : vector<2x128xf32>
    %294 = vector.extract_strided_slice %14 {offsets = [0, 6], sizes = [2, 1], strides = [1, 1]} : vector<2x8xi32> to vector<2x1xi32>
    %c2_i32_58 = arith.constant 2 : i32
    %295 = vector.broadcast %c2_i32_58 : i32 to vector<2x1xi32>
    %296 = arith.cmpi eq, %294, %295 : vector<2x1xi32>
    %297 = vector.extract_strided_slice %2 {offsets = [2, 0], sizes = [1, 128], strides = [1, 1]} : vector<4x128xf32> to vector<1x128xf32>
    %cst_59 = arith.constant 0.000000e+00 : f32
    %298 = vector.shape_cast %296 : vector<2x1xi1> to vector<2x1xi1>
    %299 = vector.broadcast %298 : vector<2x1xi1> to vector<2x128xi1>
    %300 = vector.shape_cast %297 : vector<1x128xf32> to vector<1x128xf32>
    %301 = vector.broadcast %300 : vector<1x128xf32> to vector<2x128xf32>
    %302 = vector.broadcast %cst_59 : f32 to vector<2x128xf32>
    %303 = arith.select %299, %301, %302 : vector<2x128xi1>, vector<2x128xf32>
    %304 = arith.addf %293, %303 : vector<2x128xf32>
    %305 = vector.extract_strided_slice %14 {offsets = [0, 6], sizes = [2, 1], strides = [1, 1]} : vector<2x8xi32> to vector<2x1xi32>
    %c3_i32_60 = arith.constant 3 : i32
    %306 = vector.broadcast %c3_i32_60 : i32 to vector<2x1xi32>
    %307 = arith.cmpi eq, %305, %306 : vector<2x1xi32>
    %308 = vector.extract_strided_slice %2 {offsets = [3, 0], sizes = [1, 128], strides = [1, 1]} : vector<4x128xf32> to vector<1x128xf32>
    %cst_61 = arith.constant 0.000000e+00 : f32
    %309 = vector.shape_cast %307 : vector<2x1xi1> to vector<2x1xi1>
    %310 = vector.broadcast %309 : vector<2x1xi1> to vector<2x128xi1>
    %311 = vector.shape_cast %308 : vector<1x128xf32> to vector<1x128xf32>
    %312 = vector.broadcast %311 : vector<1x128xf32> to vector<2x128xf32>
    %313 = vector.broadcast %cst_61 : f32 to vector<2x128xf32>
    %314 = arith.select %310, %312, %313 : vector<2x128xi1>, vector<2x128xf32>
    %315 = arith.addf %304, %314 : vector<2x128xf32>
    %316 = vector.extract_strided_slice %14 {offsets = [0, 7], sizes = [2, 1], strides = [1, 1]} : vector<2x8xi32> to vector<2x1xi32>
    %c0_i32_62 = arith.constant 0 : i32
    %317 = vector.broadcast %c0_i32_62 : i32 to vector<2x1xi32>
    %318 = arith.cmpi eq, %316, %317 : vector<2x1xi32>
    %319 = vector.extract_strided_slice %2 {offsets = [0, 0], sizes = [1, 128], strides = [1, 1]} : vector<4x128xf32> to vector<1x128xf32>
    %cst_63 = arith.constant 0.000000e+00 : f32
    %320 = vector.shape_cast %318 : vector<2x1xi1> to vector<2x1xi1>
    %321 = vector.broadcast %320 : vector<2x1xi1> to vector<2x128xi1>
    %322 = vector.shape_cast %319 : vector<1x128xf32> to vector<1x128xf32>
    %323 = vector.broadcast %322 : vector<1x128xf32> to vector<2x128xf32>
    %324 = vector.broadcast %cst_63 : f32 to vector<2x128xf32>
    %325 = arith.select %321, %323, %324 : vector<2x128xi1>, vector<2x128xf32>
    %326 = vector.extract_strided_slice %14 {offsets = [0, 7], sizes = [2, 1], strides = [1, 1]} : vector<2x8xi32> to vector<2x1xi32>
    %c1_i32_64 = arith.constant 1 : i32
    %327 = vector.broadcast %c1_i32_64 : i32 to vector<2x1xi32>
    %328 = arith.cmpi eq, %326, %327 : vector<2x1xi32>
    %329 = vector.extract_strided_slice %2 {offsets = [1, 0], sizes = [1, 128], strides = [1, 1]} : vector<4x128xf32> to vector<1x128xf32>
    %cst_65 = arith.constant 0.000000e+00 : f32
    %330 = vector.shape_cast %328 : vector<2x1xi1> to vector<2x1xi1>
    %331 = vector.broadcast %330 : vector<2x1xi1> to vector<2x128xi1>
    %332 = vector.shape_cast %329 : vector<1x128xf32> to vector<1x128xf32>
    %333 = vector.broadcast %332 : vector<1x128xf32> to vector<2x128xf32>
    %334 = vector.broadcast %cst_65 : f32 to vector<2x128xf32>
    %335 = arith.select %331, %333, %334 : vector<2x128xi1>, vector<2x128xf32>
    %336 = arith.addf %325, %335 : vector<2x128xf32>
    %337 = vector.extract_strided_slice %14 {offsets = [0, 7], sizes = [2, 1], strides = [1, 1]} : vector<2x8xi32> to vector<2x1xi32>
    %c2_i32_66 = arith.constant 2 : i32
    %338 = vector.broadcast %c2_i32_66 : i32 to vector<2x1xi32>
    %339 = arith.cmpi eq, %337, %338 : vector<2x1xi32>
    %340 = vector.extract_strided_slice %2 {offsets = [2, 0], sizes = [1, 128], strides = [1, 1]} : vector<4x128xf32> to vector<1x128xf32>
    %cst_67 = arith.constant 0.000000e+00 : f32
    %341 = vector.shape_cast %339 : vector<2x1xi1> to vector<2x1xi1>
    %342 = vector.broadcast %341 : vector<2x1xi1> to vector<2x128xi1>
    %343 = vector.shape_cast %340 : vector<1x128xf32> to vector<1x128xf32>
    %344 = vector.broadcast %343 : vector<1x128xf32> to vector<2x128xf32>
    %345 = vector.broadcast %cst_67 : f32 to vector<2x128xf32>
    %346 = arith.select %342, %344, %345 : vector<2x128xi1>, vector<2x128xf32>
    %347 = arith.addf %336, %346 : vector<2x128xf32>
    %348 = vector.extract_strided_slice %14 {offsets = [0, 7], sizes = [2, 1], strides = [1, 1]} : vector<2x8xi32> to vector<2x1xi32>
    %c3_i32_68 = arith.constant 3 : i32
    %349 = vector.broadcast %c3_i32_68 : i32 to vector<2x1xi32>
    %350 = arith.cmpi eq, %348, %349 : vector<2x1xi32>
    %351 = vector.extract_strided_slice %2 {offsets = [3, 0], sizes = [1, 128], strides = [1, 1]} : vector<4x128xf32> to vector<1x128xf32>
    %cst_69 = arith.constant 0.000000e+00 : f32
    %352 = vector.shape_cast %350 : vector<2x1xi1> to vector<2x1xi1>
    %353 = vector.broadcast %352 : vector<2x1xi1> to vector<2x128xi1>
    %354 = vector.shape_cast %351 : vector<1x128xf32> to vector<1x128xf32>
    %355 = vector.broadcast %354 : vector<1x128xf32> to vector<2x128xf32>
    %356 = vector.broadcast %cst_69 : f32 to vector<2x128xf32>
    %357 = arith.select %353, %355, %356 : vector<2x128xi1>, vector<2x128xf32>
    %358 = arith.addf %347, %357 : vector<2x128xf32>
    %c0_70 = arith.constant 0 : index
    %c0_71 = arith.constant 0 : index
    %c0_72 = arith.constant 0 : index
    %359 = vector.load %arg3[%c0_70, %c0_71, %c0_72] : memref<2x2x32xf32, #tpu.memory_space<vmem>>, vector<1x2x32xf32>
    %360 = vector.shape_cast %359 : vector<1x2x32xf32> to vector<2x32xf32>
    %c0_73 = arith.constant 0 : index
    %c0_74 = arith.constant 0 : index
    %c0_75 = arith.constant 0 : index
    %361 = vector.load %arg4[%c0_73, %c0_74, %c0_75] : memref<2x2x32xf32, #tpu.memory_space<vmem>>, vector<1x2x32xf32>
    %362 = vector.shape_cast %361 : vector<1x2x32xf32> to vector<2x32xf32>
    %c1 = arith.constant 1 : index
    %c0_76 = arith.constant 0 : index
    %c0_77 = arith.constant 0 : index
    %363 = vector.load %arg3[%c1, %c0_76, %c0_77] : memref<2x2x32xf32, #tpu.memory_space<vmem>>, vector<1x2x32xf32>
    %364 = vector.shape_cast %363 : vector<1x2x32xf32> to vector<2x32xf32>
    %c1_78 = arith.constant 1 : index
    %c0_79 = arith.constant 0 : index
    %c0_80 = arith.constant 0 : index
    %365 = vector.load %arg4[%c1_78, %c0_79, %c0_80] : memref<2x2x32xf32, #tpu.memory_space<vmem>>, vector<1x2x32xf32>
    %366 = vector.shape_cast %365 : vector<1x2x32xf32> to vector<2x32xf32>
    %cst_81 = arith.constant dense<0.000000e+00> : vector<2x128xf32>
    %367 = tpu.matmul %360, %6, %cst_81 {dimension_numbers = #tpu.dot_dimension_numbers<[1], [0], [0], [1], [0, 0, 1, 1], [], []>} : vector<2x32xf32>, vector<32x128xf32>, vector<2x128xf32> -> vector<2x128xf32>
    %368 = arith.addf %57, %367 : vector<2x128xf32>
    %cst_82 = arith.constant 2.000000e+00 : f32
    %369 = vector.broadcast %cst_82 : f32 to vector<2x128xf32>
    %370 = arith.mulf %368, %369 : vector<2x128xf32>
    %371 = arith.select %13, %370, %368 : vector<2x128xi1>, vector<2x128xf32>
    %372 = arith.negf %371 : vector<2x128xf32>
    %373 = math.exp %372 : vector<2x128xf32>
    %cst_83 = arith.constant 1.000000e+00 : f32
    %374 = vector.broadcast %cst_83 : f32 to vector<2x128xf32>
    %375 = arith.addf %374, %373 : vector<2x128xf32>
    %376 = arith.divf %374, %375 : vector<2x128xf32>
    %cst_84 = arith.constant 2.000000e+00 : f32
    %377 = vector.broadcast %cst_84 : f32 to vector<2x128xf32>
    %378 = arith.mulf %376, %377 : vector<2x128xf32>
    %cst_85 = arith.constant 1.000000e+00 : f32
    %379 = vector.broadcast %cst_85 : f32 to vector<2x128xf32>
    %380 = arith.subf %378, %379 : vector<2x128xf32>
    %381 = arith.select %13, %380, %376 : vector<2x128xi1>, vector<2x128xf32>
    %382 = vector.extract_strided_slice %381 {offsets = [0, 0], sizes = [2, 32], strides = [1, 1]} : vector<2x128xf32> to vector<2x32xf32>
    %383 = vector.extract_strided_slice %381 {offsets = [0, 32], sizes = [2, 32], strides = [1, 1]} : vector<2x128xf32> to vector<2x32xf32>
    %384 = vector.extract_strided_slice %381 {offsets = [0, 64], sizes = [2, 32], strides = [1, 1]} : vector<2x128xf32> to vector<2x32xf32>
    %385 = vector.extract_strided_slice %381 {offsets = [0, 96], sizes = [2, 32], strides = [1, 1]} : vector<2x128xf32> to vector<2x32xf32>
    %386 = arith.mulf %383, %362 : vector<2x32xf32>
    %387 = arith.mulf %382, %384 : vector<2x32xf32>
    %388 = arith.addf %386, %387 : vector<2x32xf32>
    %389 = math.tanh %388 : vector<2x32xf32>
    %390 = arith.mulf %385, %389 : vector<2x32xf32>
    %391 = tpu.concatenate %390, %364 in 1 : vector<2x32xf32>, vector<2x32xf32> -> vector<2x64xf32>
    %cst_86 = arith.constant dense<0.000000e+00> : vector<2x128xf32>
    %392 = tpu.matmul %391, %7, %cst_86 {dimension_numbers = #tpu.dot_dimension_numbers<[1], [0], [0], [1], [0, 0, 1, 1], [], []>} : vector<2x64xf32>, vector<64x128xf32>, vector<2x128xf32> -> vector<2x128xf32>
    %393 = vector.broadcast %3 : vector<1x128xf32> to vector<2x128xf32>
    %394 = arith.addf %392, %393 : vector<2x128xf32>
    %cst_87 = arith.constant 2.000000e+00 : f32
    %395 = vector.broadcast %cst_87 : f32 to vector<2x128xf32>
    %396 = arith.mulf %394, %395 : vector<2x128xf32>
    %397 = arith.select %13, %396, %394 : vector<2x128xi1>, vector<2x128xf32>
    %398 = arith.negf %397 : vector<2x128xf32>
    %399 = math.exp %398 : vector<2x128xf32>
    %cst_88 = arith.constant 1.000000e+00 : f32
    %400 = vector.broadcast %cst_88 : f32 to vector<2x128xf32>
    %401 = arith.addf %400, %399 : vector<2x128xf32>
    %402 = arith.divf %400, %401 : vector<2x128xf32>
    %cst_89 = arith.constant 2.000000e+00 : f32
    %403 = vector.broadcast %cst_89 : f32 to vector<2x128xf32>
    %404 = arith.mulf %402, %403 : vector<2x128xf32>
    %cst_90 = arith.constant 1.000000e+00 : f32
    %405 = vector.broadcast %cst_90 : f32 to vector<2x128xf32>
    %406 = arith.subf %404, %405 : vector<2x128xf32>
    %407 = arith.select %13, %406, %402 : vector<2x128xi1>, vector<2x128xf32>
    %408 = vector.extract_strided_slice %407 {offsets = [0, 0], sizes = [2, 32], strides = [1, 1]} : vector<2x128xf32> to vector<2x32xf32>
    %409 = vector.extract_strided_slice %407 {offsets = [0, 32], sizes = [2, 32], strides = [1, 1]} : vector<2x128xf32> to vector<2x32xf32>
    %410 = vector.extract_strided_slice %407 {offsets = [0, 64], sizes = [2, 32], strides = [1, 1]} : vector<2x128xf32> to vector<2x32xf32>
    %411 = vector.extract_strided_slice %407 {offsets = [0, 96], sizes = [2, 32], strides = [1, 1]} : vector<2x128xf32> to vector<2x32xf32>
    %412 = arith.mulf %409, %366 : vector<2x32xf32>
    %413 = arith.mulf %408, %410 : vector<2x32xf32>
    %414 = arith.addf %412, %413 : vector<2x32xf32>
    %415 = math.tanh %414 : vector<2x32xf32>
    %416 = arith.mulf %411, %415 : vector<2x32xf32>
    %cst_91 = arith.constant dense<0.000000e+00> : vector<2x128xf32>
    %417 = tpu.matmul %390, %6, %cst_91 {dimension_numbers = #tpu.dot_dimension_numbers<[1], [0], [0], [1], [0, 0, 1, 1], [], []>} : vector<2x32xf32>, vector<32x128xf32>, vector<2x128xf32> -> vector<2x128xf32>
    %418 = arith.addf %100, %417 : vector<2x128xf32>
    %cst_92 = arith.constant 2.000000e+00 : f32
    %419 = vector.broadcast %cst_92 : f32 to vector<2x128xf32>
    %420 = arith.mulf %418, %419 : vector<2x128xf32>
    %421 = arith.select %13, %420, %418 : vector<2x128xi1>, vector<2x128xf32>
    %422 = arith.negf %421 : vector<2x128xf32>
    %423 = math.exp %422 : vector<2x128xf32>
    %cst_93 = arith.constant 1.000000e+00 : f32
    %424 = vector.broadcast %cst_93 : f32 to vector<2x128xf32>
    %425 = arith.addf %424, %423 : vector<2x128xf32>
    %426 = arith.divf %424, %425 : vector<2x128xf32>
    %cst_94 = arith.constant 2.000000e+00 : f32
    %427 = vector.broadcast %cst_94 : f32 to vector<2x128xf32>
    %428 = arith.mulf %426, %427 : vector<2x128xf32>
    %cst_95 = arith.constant 1.000000e+00 : f32
    %429 = vector.broadcast %cst_95 : f32 to vector<2x128xf32>
    %430 = arith.subf %428, %429 : vector<2x128xf32>
    %431 = arith.select %13, %430, %426 : vector<2x128xi1>, vector<2x128xf32>
    %432 = vector.extract_strided_slice %431 {offsets = [0, 0], sizes = [2, 32], strides = [1, 1]} : vector<2x128xf32> to vector<2x32xf32>
    %433 = vector.extract_strided_slice %431 {offsets = [0, 32], sizes = [2, 32], strides = [1, 1]} : vector<2x128xf32> to vector<2x32xf32>
    %434 = vector.extract_strided_slice %431 {offsets = [0, 64], sizes = [2, 32], strides = [1, 1]} : vector<2x128xf32> to vector<2x32xf32>
    %435 = vector.extract_strided_slice %431 {offsets = [0, 96], sizes = [2, 32], strides = [1, 1]} : vector<2x128xf32> to vector<2x32xf32>
    %436 = arith.mulf %433, %388 : vector<2x32xf32>
    %437 = arith.mulf %432, %434 : vector<2x32xf32>
    %438 = arith.addf %436, %437 : vector<2x32xf32>
    %439 = math.tanh %438 : vector<2x32xf32>
    %440 = arith.mulf %435, %439 : vector<2x32xf32>
    %441 = tpu.concatenate %440, %416 in 1 : vector<2x32xf32>, vector<2x32xf32> -> vector<2x64xf32>
    %cst_96 = arith.constant dense<0.000000e+00> : vector<2x128xf32>
    %442 = tpu.matmul %441, %7, %cst_96 {dimension_numbers = #tpu.dot_dimension_numbers<[1], [0], [0], [1], [0, 0, 1, 1], [], []>} : vector<2x64xf32>, vector<64x128xf32>, vector<2x128xf32> -> vector<2x128xf32>
    %443 = vector.broadcast %3 : vector<1x128xf32> to vector<2x128xf32>
    %444 = arith.addf %442, %443 : vector<2x128xf32>
    %cst_97 = arith.constant 2.000000e+00 : f32
    %445 = vector.broadcast %cst_97 : f32 to vector<2x128xf32>
    %446 = arith.mulf %444, %445 : vector<2x128xf32>
    %447 = arith.select %13, %446, %444 : vector<2x128xi1>, vector<2x128xf32>
    %448 = arith.negf %447 : vector<2x128xf32>
    %449 = math.exp %448 : vector<2x128xf32>
    %cst_98 = arith.constant 1.000000e+00 : f32
    %450 = vector.broadcast %cst_98 : f32 to vector<2x128xf32>
    %451 = arith.addf %450, %449 : vector<2x128xf32>
    %452 = arith.divf %450, %451 : vector<2x128xf32>
    %cst_99 = arith.constant 2.000000e+00 : f32
    %453 = vector.broadcast %cst_99 : f32 to vector<2x128xf32>
    %454 = arith.mulf %452, %453 : vector<2x128xf32>
    %cst_100 = arith.constant 1.000000e+00 : f32
    %455 = vector.broadcast %cst_100 : f32 to vector<2x128xf32>
    %456 = arith.subf %454, %455 : vector<2x128xf32>
    %457 = arith.select %13, %456, %452 : vector<2x128xi1>, vector<2x128xf32>
    %458 = vector.extract_strided_slice %457 {offsets = [0, 0], sizes = [2, 32], strides = [1, 1]} : vector<2x128xf32> to vector<2x32xf32>
    %459 = vector.extract_strided_slice %457 {offsets = [0, 32], sizes = [2, 32], strides = [1, 1]} : vector<2x128xf32> to vector<2x32xf32>
    %460 = vector.extract_strided_slice %457 {offsets = [0, 64], sizes = [2, 32], strides = [1, 1]} : vector<2x128xf32> to vector<2x32xf32>
    %461 = vector.extract_strided_slice %457 {offsets = [0, 96], sizes = [2, 32], strides = [1, 1]} : vector<2x128xf32> to vector<2x32xf32>
    %462 = arith.mulf %459, %414 : vector<2x32xf32>
    %463 = arith.mulf %458, %460 : vector<2x32xf32>
    %464 = arith.addf %462, %463 : vector<2x32xf32>
    %465 = math.tanh %464 : vector<2x32xf32>
    %466 = arith.mulf %461, %465 : vector<2x32xf32>
    %cst_101 = arith.constant dense<0.000000e+00> : vector<2x128xf32>
    %467 = tpu.matmul %440, %6, %cst_101 {dimension_numbers = #tpu.dot_dimension_numbers<[1], [0], [0], [1], [0, 0, 1, 1], [], []>} : vector<2x32xf32>, vector<32x128xf32>, vector<2x128xf32> -> vector<2x128xf32>
    %468 = arith.addf %143, %467 : vector<2x128xf32>
    %cst_102 = arith.constant 2.000000e+00 : f32
    %469 = vector.broadcast %cst_102 : f32 to vector<2x128xf32>
    %470 = arith.mulf %468, %469 : vector<2x128xf32>
    %471 = arith.select %13, %470, %468 : vector<2x128xi1>, vector<2x128xf32>
    %472 = arith.negf %471 : vector<2x128xf32>
    %473 = math.exp %472 : vector<2x128xf32>
    %cst_103 = arith.constant 1.000000e+00 : f32
    %474 = vector.broadcast %cst_103 : f32 to vector<2x128xf32>
    %475 = arith.addf %474, %473 : vector<2x128xf32>
    %476 = arith.divf %474, %475 : vector<2x128xf32>
    %cst_104 = arith.constant 2.000000e+00 : f32
    %477 = vector.broadcast %cst_104 : f32 to vector<2x128xf32>
    %478 = arith.mulf %476, %477 : vector<2x128xf32>
    %cst_105 = arith.constant 1.000000e+00 : f32
    %479 = vector.broadcast %cst_105 : f32 to vector<2x128xf32>
    %480 = arith.subf %478, %479 : vector<2x128xf32>
    %481 = arith.select %13, %480, %476 : vector<2x128xi1>, vector<2x128xf32>
    %482 = vector.extract_strided_slice %481 {offsets = [0, 0], sizes = [2, 32], strides = [1, 1]} : vector<2x128xf32> to vector<2x32xf32>
    %483 = vector.extract_strided_slice %481 {offsets = [0, 32], sizes = [2, 32], strides = [1, 1]} : vector<2x128xf32> to vector<2x32xf32>
    %484 = vector.extract_strided_slice %481 {offsets = [0, 64], sizes = [2, 32], strides = [1, 1]} : vector<2x128xf32> to vector<2x32xf32>
    %485 = vector.extract_strided_slice %481 {offsets = [0, 96], sizes = [2, 32], strides = [1, 1]} : vector<2x128xf32> to vector<2x32xf32>
    %486 = arith.mulf %483, %438 : vector<2x32xf32>
    %487 = arith.mulf %482, %484 : vector<2x32xf32>
    %488 = arith.addf %486, %487 : vector<2x32xf32>
    %489 = math.tanh %488 : vector<2x32xf32>
    %490 = arith.mulf %485, %489 : vector<2x32xf32>
    %491 = tpu.concatenate %490, %466 in 1 : vector<2x32xf32>, vector<2x32xf32> -> vector<2x64xf32>
    %cst_106 = arith.constant dense<0.000000e+00> : vector<2x128xf32>
    %492 = tpu.matmul %491, %7, %cst_106 {dimension_numbers = #tpu.dot_dimension_numbers<[1], [0], [0], [1], [0, 0, 1, 1], [], []>} : vector<2x64xf32>, vector<64x128xf32>, vector<2x128xf32> -> vector<2x128xf32>
    %493 = vector.broadcast %3 : vector<1x128xf32> to vector<2x128xf32>
    %494 = arith.addf %492, %493 : vector<2x128xf32>
    %cst_107 = arith.constant 2.000000e+00 : f32
    %495 = vector.broadcast %cst_107 : f32 to vector<2x128xf32>
    %496 = arith.mulf %494, %495 : vector<2x128xf32>
    %497 = arith.select %13, %496, %494 : vector<2x128xi1>, vector<2x128xf32>
    %498 = arith.negf %497 : vector<2x128xf32>
    %499 = math.exp %498 : vector<2x128xf32>
    %cst_108 = arith.constant 1.000000e+00 : f32
    %500 = vector.broadcast %cst_108 : f32 to vector<2x128xf32>
    %501 = arith.addf %500, %499 : vector<2x128xf32>
    %502 = arith.divf %500, %501 : vector<2x128xf32>
    %cst_109 = arith.constant 2.000000e+00 : f32
    %503 = vector.broadcast %cst_109 : f32 to vector<2x128xf32>
    %504 = arith.mulf %502, %503 : vector<2x128xf32>
    %cst_110 = arith.constant 1.000000e+00 : f32
    %505 = vector.broadcast %cst_110 : f32 to vector<2x128xf32>
    %506 = arith.subf %504, %505 : vector<2x128xf32>
    %507 = arith.select %13, %506, %502 : vector<2x128xi1>, vector<2x128xf32>
    %508 = vector.extract_strided_slice %507 {offsets = [0, 0], sizes = [2, 32], strides = [1, 1]} : vector<2x128xf32> to vector<2x32xf32>
    %509 = vector.extract_strided_slice %507 {offsets = [0, 32], sizes = [2, 32], strides = [1, 1]} : vector<2x128xf32> to vector<2x32xf32>
    %510 = vector.extract_strided_slice %507 {offsets = [0, 64], sizes = [2, 32], strides = [1, 1]} : vector<2x128xf32> to vector<2x32xf32>
    %511 = vector.extract_strided_slice %507 {offsets = [0, 96], sizes = [2, 32], strides = [1, 1]} : vector<2x128xf32> to vector<2x32xf32>
    %512 = arith.mulf %509, %464 : vector<2x32xf32>
    %513 = arith.mulf %508, %510 : vector<2x32xf32>
    %514 = arith.addf %512, %513 : vector<2x32xf32>
    %515 = math.tanh %514 : vector<2x32xf32>
    %516 = arith.mulf %511, %515 : vector<2x32xf32>
    %cst_111 = arith.constant dense<0.000000e+00> : vector<2x128xf32>
    %517 = tpu.matmul %490, %6, %cst_111 {dimension_numbers = #tpu.dot_dimension_numbers<[1], [0], [0], [1], [0, 0, 1, 1], [], []>} : vector<2x32xf32>, vector<32x128xf32>, vector<2x128xf32> -> vector<2x128xf32>
    %518 = arith.addf %186, %517 : vector<2x128xf32>
    %cst_112 = arith.constant 2.000000e+00 : f32
    %519 = vector.broadcast %cst_112 : f32 to vector<2x128xf32>
    %520 = arith.mulf %518, %519 : vector<2x128xf32>
    %521 = arith.select %13, %520, %518 : vector<2x128xi1>, vector<2x128xf32>
    %522 = arith.negf %521 : vector<2x128xf32>
    %523 = math.exp %522 : vector<2x128xf32>
    %cst_113 = arith.constant 1.000000e+00 : f32
    %524 = vector.broadcast %cst_113 : f32 to vector<2x128xf32>
    %525 = arith.addf %524, %523 : vector<2x128xf32>
    %526 = arith.divf %524, %525 : vector<2x128xf32>
    %cst_114 = arith.constant 2.000000e+00 : f32
    %527 = vector.broadcast %cst_114 : f32 to vector<2x128xf32>
    %528 = arith.mulf %526, %527 : vector<2x128xf32>
    %cst_115 = arith.constant 1.000000e+00 : f32
    %529 = vector.broadcast %cst_115 : f32 to vector<2x128xf32>
    %530 = arith.subf %528, %529 : vector<2x128xf32>
    %531 = arith.select %13, %530, %526 : vector<2x128xi1>, vector<2x128xf32>
    %532 = vector.extract_strided_slice %531 {offsets = [0, 0], sizes = [2, 32], strides = [1, 1]} : vector<2x128xf32> to vector<2x32xf32>
    %533 = vector.extract_strided_slice %531 {offsets = [0, 32], sizes = [2, 32], strides = [1, 1]} : vector<2x128xf32> to vector<2x32xf32>
    %534 = vector.extract_strided_slice %531 {offsets = [0, 64], sizes = [2, 32], strides = [1, 1]} : vector<2x128xf32> to vector<2x32xf32>
    %535 = vector.extract_strided_slice %531 {offsets = [0, 96], sizes = [2, 32], strides = [1, 1]} : vector<2x128xf32> to vector<2x32xf32>
    %536 = arith.mulf %533, %488 : vector<2x32xf32>
    %537 = arith.mulf %532, %534 : vector<2x32xf32>
    %538 = arith.addf %536, %537 : vector<2x32xf32>
    %539 = math.tanh %538 : vector<2x32xf32>
    %540 = arith.mulf %535, %539 : vector<2x32xf32>
    %541 = tpu.concatenate %540, %516 in 1 : vector<2x32xf32>, vector<2x32xf32> -> vector<2x64xf32>
    %cst_116 = arith.constant dense<0.000000e+00> : vector<2x128xf32>
    %542 = tpu.matmul %541, %7, %cst_116 {dimension_numbers = #tpu.dot_dimension_numbers<[1], [0], [0], [1], [0, 0, 1, 1], [], []>} : vector<2x64xf32>, vector<64x128xf32>, vector<2x128xf32> -> vector<2x128xf32>
    %543 = vector.broadcast %3 : vector<1x128xf32> to vector<2x128xf32>
    %544 = arith.addf %542, %543 : vector<2x128xf32>
    %cst_117 = arith.constant 2.000000e+00 : f32
    %545 = vector.broadcast %cst_117 : f32 to vector<2x128xf32>
    %546 = arith.mulf %544, %545 : vector<2x128xf32>
    %547 = arith.select %13, %546, %544 : vector<2x128xi1>, vector<2x128xf32>
    %548 = arith.negf %547 : vector<2x128xf32>
    %549 = math.exp %548 : vector<2x128xf32>
    %cst_118 = arith.constant 1.000000e+00 : f32
    %550 = vector.broadcast %cst_118 : f32 to vector<2x128xf32>
    %551 = arith.addf %550, %549 : vector<2x128xf32>
    %552 = arith.divf %550, %551 : vector<2x128xf32>
    %cst_119 = arith.constant 2.000000e+00 : f32
    %553 = vector.broadcast %cst_119 : f32 to vector<2x128xf32>
    %554 = arith.mulf %552, %553 : vector<2x128xf32>
    %cst_120 = arith.constant 1.000000e+00 : f32
    %555 = vector.broadcast %cst_120 : f32 to vector<2x128xf32>
    %556 = arith.subf %554, %555 : vector<2x128xf32>
    %557 = arith.select %13, %556, %552 : vector<2x128xi1>, vector<2x128xf32>
    %558 = vector.extract_strided_slice %557 {offsets = [0, 0], sizes = [2, 32], strides = [1, 1]} : vector<2x128xf32> to vector<2x32xf32>
    %559 = vector.extract_strided_slice %557 {offsets = [0, 32], sizes = [2, 32], strides = [1, 1]} : vector<2x128xf32> to vector<2x32xf32>
    %560 = vector.extract_strided_slice %557 {offsets = [0, 64], sizes = [2, 32], strides = [1, 1]} : vector<2x128xf32> to vector<2x32xf32>
    %561 = vector.extract_strided_slice %557 {offsets = [0, 96], sizes = [2, 32], strides = [1, 1]} : vector<2x128xf32> to vector<2x32xf32>
    %562 = arith.mulf %559, %514 : vector<2x32xf32>
    %563 = arith.mulf %558, %560 : vector<2x32xf32>
    %564 = arith.addf %562, %563 : vector<2x32xf32>
    %565 = math.tanh %564 : vector<2x32xf32>
    %566 = arith.mulf %561, %565 : vector<2x32xf32>
    %cst_121 = arith.constant dense<0.000000e+00> : vector<2x128xf32>
    %567 = tpu.matmul %540, %6, %cst_121 {dimension_numbers = #tpu.dot_dimension_numbers<[1], [0], [0], [1], [0, 0, 1, 1], [], []>} : vector<2x32xf32>, vector<32x128xf32>, vector<2x128xf32> -> vector<2x128xf32>
    %568 = arith.addf %229, %567 : vector<2x128xf32>
    %cst_122 = arith.constant 2.000000e+00 : f32
    %569 = vector.broadcast %cst_122 : f32 to vector<2x128xf32>
    %570 = arith.mulf %568, %569 : vector<2x128xf32>
    %571 = arith.select %13, %570, %568 : vector<2x128xi1>, vector<2x128xf32>
    %572 = arith.negf %571 : vector<2x128xf32>
    %573 = math.exp %572 : vector<2x128xf32>
    %cst_123 = arith.constant 1.000000e+00 : f32
    %574 = vector.broadcast %cst_123 : f32 to vector<2x128xf32>
    %575 = arith.addf %574, %573 : vector<2x128xf32>
    %576 = arith.divf %574, %575 : vector<2x128xf32>
    %cst_124 = arith.constant 2.000000e+00 : f32
    %577 = vector.broadcast %cst_124 : f32 to vector<2x128xf32>
    %578 = arith.mulf %576, %577 : vector<2x128xf32>
    %cst_125 = arith.constant 1.000000e+00 : f32
    %579 = vector.broadcast %cst_125 : f32 to vector<2x128xf32>
    %580 = arith.subf %578, %579 : vector<2x128xf32>
    %581 = arith.select %13, %580, %576 : vector<2x128xi1>, vector<2x128xf32>
    %582 = vector.extract_strided_slice %581 {offsets = [0, 0], sizes = [2, 32], strides = [1, 1]} : vector<2x128xf32> to vector<2x32xf32>
    %583 = vector.extract_strided_slice %581 {offsets = [0, 32], sizes = [2, 32], strides = [1, 1]} : vector<2x128xf32> to vector<2x32xf32>
    %584 = vector.extract_strided_slice %581 {offsets = [0, 64], sizes = [2, 32], strides = [1, 1]} : vector<2x128xf32> to vector<2x32xf32>
    %585 = vector.extract_strided_slice %581 {offsets = [0, 96], sizes = [2, 32], strides = [1, 1]} : vector<2x128xf32> to vector<2x32xf32>
    %586 = arith.mulf %583, %538 : vector<2x32xf32>
    %587 = arith.mulf %582, %584 : vector<2x32xf32>
    %588 = arith.addf %586, %587 : vector<2x32xf32>
    %589 = math.tanh %588 : vector<2x32xf32>
    %590 = arith.mulf %585, %589 : vector<2x32xf32>
    %591 = tpu.concatenate %590, %566 in 1 : vector<2x32xf32>, vector<2x32xf32> -> vector<2x64xf32>
    %cst_126 = arith.constant dense<0.000000e+00> : vector<2x128xf32>
    %592 = tpu.matmul %591, %7, %cst_126 {dimension_numbers = #tpu.dot_dimension_numbers<[1], [0], [0], [1], [0, 0, 1, 1], [], []>} : vector<2x64xf32>, vector<64x128xf32>, vector<2x128xf32> -> vector<2x128xf32>
    %593 = vector.broadcast %3 : vector<1x128xf32> to vector<2x128xf32>
    %594 = arith.addf %592, %593 : vector<2x128xf32>
    %cst_127 = arith.constant 2.000000e+00 : f32
    %595 = vector.broadcast %cst_127 : f32 to vector<2x128xf32>
    %596 = arith.mulf %594, %595 : vector<2x128xf32>
    %597 = arith.select %13, %596, %594 : vector<2x128xi1>, vector<2x128xf32>
    %598 = arith.negf %597 : vector<2x128xf32>
    %599 = math.exp %598 : vector<2x128xf32>
    %cst_128 = arith.constant 1.000000e+00 : f32
    %600 = vector.broadcast %cst_128 : f32 to vector<2x128xf32>
    %601 = arith.addf %600, %599 : vector<2x128xf32>
    %602 = arith.divf %600, %601 : vector<2x128xf32>
    %cst_129 = arith.constant 2.000000e+00 : f32
    %603 = vector.broadcast %cst_129 : f32 to vector<2x128xf32>
    %604 = arith.mulf %602, %603 : vector<2x128xf32>
    %cst_130 = arith.constant 1.000000e+00 : f32
    %605 = vector.broadcast %cst_130 : f32 to vector<2x128xf32>
    %606 = arith.subf %604, %605 : vector<2x128xf32>
    %607 = arith.select %13, %606, %602 : vector<2x128xi1>, vector<2x128xf32>
    %608 = vector.extract_strided_slice %607 {offsets = [0, 0], sizes = [2, 32], strides = [1, 1]} : vector<2x128xf32> to vector<2x32xf32>
    %609 = vector.extract_strided_slice %607 {offsets = [0, 32], sizes = [2, 32], strides = [1, 1]} : vector<2x128xf32> to vector<2x32xf32>
    %610 = vector.extract_strided_slice %607 {offsets = [0, 64], sizes = [2, 32], strides = [1, 1]} : vector<2x128xf32> to vector<2x32xf32>
    %611 = vector.extract_strided_slice %607 {offsets = [0, 96], sizes = [2, 32], strides = [1, 1]} : vector<2x128xf32> to vector<2x32xf32>
    %612 = arith.mulf %609, %564 : vector<2x32xf32>
    %613 = arith.mulf %608, %610 : vector<2x32xf32>
    %614 = arith.addf %612, %613 : vector<2x32xf32>
    %615 = math.tanh %614 : vector<2x32xf32>
    %616 = arith.mulf %611, %615 : vector<2x32xf32>
    %617 = vector.broadcast %4 : vector<1x32xf32> to vector<2x32xf32>
    %618 = arith.mulf %616, %617 : vector<2x32xf32>
    %cst_131 = arith.constant dense<0.000000e+00> : vector<2xf32>
    %619 = vector.multi_reduction <add>, %618, %cst_131 [1] : vector<2x32xf32> to vector<2xf32>
    %620 = vector.shape_cast %619 : vector<2xf32> to vector<2x1xf32>
    %621 = vector.broadcast %5 : vector<1x1xf32> to vector<2x1xf32>
    %622 = arith.addf %620, %621 : vector<2x1xf32>
    %623 = arith.negf %622 : vector<2x1xf32>
    %624 = math.exp %623 : vector<2x1xf32>
    %cst_132 = arith.constant 1.000000e+00 : f32
    %625 = vector.broadcast %cst_132 : f32 to vector<2x1xf32>
    %626 = arith.addf %625, %624 : vector<2x1xf32>
    %627 = arith.divf %625, %626 : vector<2x1xf32>
    %cst_133 = arith.constant dense<0.000000e+00> : vector<2x128xf32>
    %628 = tpu.matmul %590, %6, %cst_133 {dimension_numbers = #tpu.dot_dimension_numbers<[1], [0], [0], [1], [0, 0, 1, 1], [], []>} : vector<2x32xf32>, vector<32x128xf32>, vector<2x128xf32> -> vector<2x128xf32>
    %629 = arith.addf %272, %628 : vector<2x128xf32>
    %cst_134 = arith.constant 2.000000e+00 : f32
    %630 = vector.broadcast %cst_134 : f32 to vector<2x128xf32>
    %631 = arith.mulf %629, %630 : vector<2x128xf32>
    %632 = arith.select %13, %631, %629 : vector<2x128xi1>, vector<2x128xf32>
    %633 = arith.negf %632 : vector<2x128xf32>
    %634 = math.exp %633 : vector<2x128xf32>
    %cst_135 = arith.constant 1.000000e+00 : f32
    %635 = vector.broadcast %cst_135 : f32 to vector<2x128xf32>
    %636 = arith.addf %635, %634 : vector<2x128xf32>
    %637 = arith.divf %635, %636 : vector<2x128xf32>
    %cst_136 = arith.constant 2.000000e+00 : f32
    %638 = vector.broadcast %cst_136 : f32 to vector<2x128xf32>
    %639 = arith.mulf %637, %638 : vector<2x128xf32>
    %cst_137 = arith.constant 1.000000e+00 : f32
    %640 = vector.broadcast %cst_137 : f32 to vector<2x128xf32>
    %641 = arith.subf %639, %640 : vector<2x128xf32>
    %642 = arith.select %13, %641, %637 : vector<2x128xi1>, vector<2x128xf32>
    %643 = vector.extract_strided_slice %642 {offsets = [0, 0], sizes = [2, 32], strides = [1, 1]} : vector<2x128xf32> to vector<2x32xf32>
    %644 = vector.extract_strided_slice %642 {offsets = [0, 32], sizes = [2, 32], strides = [1, 1]} : vector<2x128xf32> to vector<2x32xf32>
    %645 = vector.extract_strided_slice %642 {offsets = [0, 64], sizes = [2, 32], strides = [1, 1]} : vector<2x128xf32> to vector<2x32xf32>
    %646 = vector.extract_strided_slice %642 {offsets = [0, 96], sizes = [2, 32], strides = [1, 1]} : vector<2x128xf32> to vector<2x32xf32>
    %647 = arith.mulf %644, %588 : vector<2x32xf32>
    %648 = arith.mulf %643, %645 : vector<2x32xf32>
    %649 = arith.addf %647, %648 : vector<2x32xf32>
    %650 = math.tanh %649 : vector<2x32xf32>
    %651 = arith.mulf %646, %650 : vector<2x32xf32>
    %652 = tpu.concatenate %651, %616 in 1 : vector<2x32xf32>, vector<2x32xf32> -> vector<2x64xf32>
    %cst_138 = arith.constant dense<0.000000e+00> : vector<2x128xf32>
    %653 = tpu.matmul %652, %7, %cst_138 {dimension_numbers = #tpu.dot_dimension_numbers<[1], [0], [0], [1], [0, 0, 1, 1], [], []>} : vector<2x64xf32>, vector<64x128xf32>, vector<2x128xf32> -> vector<2x128xf32>
    %654 = vector.broadcast %3 : vector<1x128xf32> to vector<2x128xf32>
    %655 = arith.addf %653, %654 : vector<2x128xf32>
    %cst_139 = arith.constant 2.000000e+00 : f32
    %656 = vector.broadcast %cst_139 : f32 to vector<2x128xf32>
    %657 = arith.mulf %655, %656 : vector<2x128xf32>
    %658 = arith.select %13, %657, %655 : vector<2x128xi1>, vector<2x128xf32>
    %659 = arith.negf %658 : vector<2x128xf32>
    %660 = math.exp %659 : vector<2x128xf32>
    %cst_140 = arith.constant 1.000000e+00 : f32
    %661 = vector.broadcast %cst_140 : f32 to vector<2x128xf32>
    %662 = arith.addf %661, %660 : vector<2x128xf32>
    %663 = arith.divf %661, %662 : vector<2x128xf32>
    %cst_141 = arith.constant 2.000000e+00 : f32
    %664 = vector.broadcast %cst_141 : f32 to vector<2x128xf32>
    %665 = arith.mulf %663, %664 : vector<2x128xf32>
    %cst_142 = arith.constant 1.000000e+00 : f32
    %666 = vector.broadcast %cst_142 : f32 to vector<2x128xf32>
    %667 = arith.subf %665, %666 : vector<2x128xf32>
    %668 = arith.select %13, %667, %663 : vector<2x128xi1>, vector<2x128xf32>
    %669 = vector.extract_strided_slice %668 {offsets = [0, 0], sizes = [2, 32], strides = [1, 1]} : vector<2x128xf32> to vector<2x32xf32>
    %670 = vector.extract_strided_slice %668 {offsets = [0, 32], sizes = [2, 32], strides = [1, 1]} : vector<2x128xf32> to vector<2x32xf32>
    %671 = vector.extract_strided_slice %668 {offsets = [0, 64], sizes = [2, 32], strides = [1, 1]} : vector<2x128xf32> to vector<2x32xf32>
    %672 = vector.extract_strided_slice %668 {offsets = [0, 96], sizes = [2, 32], strides = [1, 1]} : vector<2x128xf32> to vector<2x32xf32>
    %673 = arith.mulf %670, %614 : vector<2x32xf32>
    %674 = arith.mulf %669, %671 : vector<2x32xf32>
    %675 = arith.addf %673, %674 : vector<2x32xf32>
    %676 = math.tanh %675 : vector<2x32xf32>
    %677 = arith.mulf %672, %676 : vector<2x32xf32>
    %678 = vector.broadcast %4 : vector<1x32xf32> to vector<2x32xf32>
    %679 = arith.mulf %677, %678 : vector<2x32xf32>
    %cst_143 = arith.constant dense<0.000000e+00> : vector<2xf32>
    %680 = vector.multi_reduction <add>, %679, %cst_143 [1] : vector<2x32xf32> to vector<2xf32>
    %681 = vector.shape_cast %680 : vector<2xf32> to vector<2x1xf32>
    %682 = vector.broadcast %5 : vector<1x1xf32> to vector<2x1xf32>
    %683 = arith.addf %681, %682 : vector<2x1xf32>
    %684 = arith.negf %683 : vector<2x1xf32>
    %685 = math.exp %684 : vector<2x1xf32>
    %cst_144 = arith.constant 1.000000e+00 : f32
    %686 = vector.broadcast %cst_144 : f32 to vector<2x1xf32>
    %687 = arith.addf %686, %685 : vector<2x1xf32>
    %688 = arith.divf %686, %687 : vector<2x1xf32>
    %cst_145 = arith.constant dense<0.000000e+00> : vector<2x128xf32>
    %689 = tpu.matmul %651, %6, %cst_145 {dimension_numbers = #tpu.dot_dimension_numbers<[1], [0], [0], [1], [0, 0, 1, 1], [], []>} : vector<2x32xf32>, vector<32x128xf32>, vector<2x128xf32> -> vector<2x128xf32>
    %690 = arith.addf %315, %689 : vector<2x128xf32>
    %cst_146 = arith.constant 2.000000e+00 : f32
    %691 = vector.broadcast %cst_146 : f32 to vector<2x128xf32>
    %692 = arith.mulf %690, %691 : vector<2x128xf32>
    %693 = arith.select %13, %692, %690 : vector<2x128xi1>, vector<2x128xf32>
    %694 = arith.negf %693 : vector<2x128xf32>
    %695 = math.exp %694 : vector<2x128xf32>
    %cst_147 = arith.constant 1.000000e+00 : f32
    %696 = vector.broadcast %cst_147 : f32 to vector<2x128xf32>
    %697 = arith.addf %696, %695 : vector<2x128xf32>
    %698 = arith.divf %696, %697 : vector<2x128xf32>
    %cst_148 = arith.constant 2.000000e+00 : f32
    %699 = vector.broadcast %cst_148 : f32 to vector<2x128xf32>
    %700 = arith.mulf %698, %699 : vector<2x128xf32>
    %cst_149 = arith.constant 1.000000e+00 : f32
    %701 = vector.broadcast %cst_149 : f32 to vector<2x128xf32>
    %702 = arith.subf %700, %701 : vector<2x128xf32>
    %703 = arith.select %13, %702, %698 : vector<2x128xi1>, vector<2x128xf32>
    %704 = vector.extract_strided_slice %703 {offsets = [0, 0], sizes = [2, 32], strides = [1, 1]} : vector<2x128xf32> to vector<2x32xf32>
    %705 = vector.extract_strided_slice %703 {offsets = [0, 32], sizes = [2, 32], strides = [1, 1]} : vector<2x128xf32> to vector<2x32xf32>
    %706 = vector.extract_strided_slice %703 {offsets = [0, 64], sizes = [2, 32], strides = [1, 1]} : vector<2x128xf32> to vector<2x32xf32>
    %707 = vector.extract_strided_slice %703 {offsets = [0, 96], sizes = [2, 32], strides = [1, 1]} : vector<2x128xf32> to vector<2x32xf32>
    %708 = arith.mulf %705, %649 : vector<2x32xf32>
    %709 = arith.mulf %704, %706 : vector<2x32xf32>
    %710 = arith.addf %708, %709 : vector<2x32xf32>
    %711 = math.tanh %710 : vector<2x32xf32>
    %712 = arith.mulf %707, %711 : vector<2x32xf32>
    %713 = tpu.concatenate %712, %677 in 1 : vector<2x32xf32>, vector<2x32xf32> -> vector<2x64xf32>
    %cst_150 = arith.constant dense<0.000000e+00> : vector<2x128xf32>
    %714 = tpu.matmul %713, %7, %cst_150 {dimension_numbers = #tpu.dot_dimension_numbers<[1], [0], [0], [1], [0, 0, 1, 1], [], []>} : vector<2x64xf32>, vector<64x128xf32>, vector<2x128xf32> -> vector<2x128xf32>
    %715 = vector.broadcast %3 : vector<1x128xf32> to vector<2x128xf32>
    %716 = arith.addf %714, %715 : vector<2x128xf32>
    %cst_151 = arith.constant 2.000000e+00 : f32
    %717 = vector.broadcast %cst_151 : f32 to vector<2x128xf32>
    %718 = arith.mulf %716, %717 : vector<2x128xf32>
    %719 = arith.select %13, %718, %716 : vector<2x128xi1>, vector<2x128xf32>
    %720 = arith.negf %719 : vector<2x128xf32>
    %721 = math.exp %720 : vector<2x128xf32>
    %cst_152 = arith.constant 1.000000e+00 : f32
    %722 = vector.broadcast %cst_152 : f32 to vector<2x128xf32>
    %723 = arith.addf %722, %721 : vector<2x128xf32>
    %724 = arith.divf %722, %723 : vector<2x128xf32>
    %cst_153 = arith.constant 2.000000e+00 : f32
    %725 = vector.broadcast %cst_153 : f32 to vector<2x128xf32>
    %726 = arith.mulf %724, %725 : vector<2x128xf32>
    %cst_154 = arith.constant 1.000000e+00 : f32
    %727 = vector.broadcast %cst_154 : f32 to vector<2x128xf32>
    %728 = arith.subf %726, %727 : vector<2x128xf32>
    %729 = arith.select %13, %728, %724 : vector<2x128xi1>, vector<2x128xf32>
    %730 = vector.extract_strided_slice %729 {offsets = [0, 0], sizes = [2, 32], strides = [1, 1]} : vector<2x128xf32> to vector<2x32xf32>
    %731 = vector.extract_strided_slice %729 {offsets = [0, 32], sizes = [2, 32], strides = [1, 1]} : vector<2x128xf32> to vector<2x32xf32>
    %732 = vector.extract_strided_slice %729 {offsets = [0, 64], sizes = [2, 32], strides = [1, 1]} : vector<2x128xf32> to vector<2x32xf32>
    %733 = vector.extract_strided_slice %729 {offsets = [0, 96], sizes = [2, 32], strides = [1, 1]} : vector<2x128xf32> to vector<2x32xf32>
    %734 = arith.mulf %731, %675 : vector<2x32xf32>
    %735 = arith.mulf %730, %732 : vector<2x32xf32>
    %736 = arith.addf %734, %735 : vector<2x32xf32>
    %737 = math.tanh %736 : vector<2x32xf32>
    %738 = arith.mulf %733, %737 : vector<2x32xf32>
    %739 = vector.broadcast %4 : vector<1x32xf32> to vector<2x32xf32>
    %740 = arith.mulf %738, %739 : vector<2x32xf32>
    %cst_155 = arith.constant dense<0.000000e+00> : vector<2xf32>
    %741 = vector.multi_reduction <add>, %740, %cst_155 [1] : vector<2x32xf32> to vector<2xf32>
    %742 = vector.shape_cast %741 : vector<2xf32> to vector<2x1xf32>
    %743 = vector.broadcast %5 : vector<1x1xf32> to vector<2x1xf32>
    %744 = arith.addf %742, %743 : vector<2x1xf32>
    %745 = arith.negf %744 : vector<2x1xf32>
    %746 = math.exp %745 : vector<2x1xf32>
    %cst_156 = arith.constant 1.000000e+00 : f32
    %747 = vector.broadcast %cst_156 : f32 to vector<2x1xf32>
    %748 = arith.addf %747, %746 : vector<2x1xf32>
    %749 = arith.divf %747, %748 : vector<2x1xf32>
    %cst_157 = arith.constant dense<0.000000e+00> : vector<2x128xf32>
    %750 = tpu.matmul %712, %6, %cst_157 {dimension_numbers = #tpu.dot_dimension_numbers<[1], [0], [0], [1], [0, 0, 1, 1], [], []>} : vector<2x32xf32>, vector<32x128xf32>, vector<2x128xf32> -> vector<2x128xf32>
    %751 = arith.addf %358, %750 : vector<2x128xf32>
    %cst_158 = arith.constant 2.000000e+00 : f32
    %752 = vector.broadcast %cst_158 : f32 to vector<2x128xf32>
    %753 = arith.mulf %751, %752 : vector<2x128xf32>
    %754 = arith.select %13, %753, %751 : vector<2x128xi1>, vector<2x128xf32>
    %755 = arith.negf %754 : vector<2x128xf32>
    %756 = math.exp %755 : vector<2x128xf32>
    %cst_159 = arith.constant 1.000000e+00 : f32
    %757 = vector.broadcast %cst_159 : f32 to vector<2x128xf32>
    %758 = arith.addf %757, %756 : vector<2x128xf32>
    %759 = arith.divf %757, %758 : vector<2x128xf32>
    %cst_160 = arith.constant 2.000000e+00 : f32
    %760 = vector.broadcast %cst_160 : f32 to vector<2x128xf32>
    %761 = arith.mulf %759, %760 : vector<2x128xf32>
    %cst_161 = arith.constant 1.000000e+00 : f32
    %762 = vector.broadcast %cst_161 : f32 to vector<2x128xf32>
    %763 = arith.subf %761, %762 : vector<2x128xf32>
    %764 = arith.select %13, %763, %759 : vector<2x128xi1>, vector<2x128xf32>
    %765 = vector.extract_strided_slice %764 {offsets = [0, 0], sizes = [2, 32], strides = [1, 1]} : vector<2x128xf32> to vector<2x32xf32>
    %766 = vector.extract_strided_slice %764 {offsets = [0, 32], sizes = [2, 32], strides = [1, 1]} : vector<2x128xf32> to vector<2x32xf32>
    %767 = vector.extract_strided_slice %764 {offsets = [0, 64], sizes = [2, 32], strides = [1, 1]} : vector<2x128xf32> to vector<2x32xf32>
    %768 = vector.extract_strided_slice %764 {offsets = [0, 96], sizes = [2, 32], strides = [1, 1]} : vector<2x128xf32> to vector<2x32xf32>
    %769 = arith.mulf %766, %710 : vector<2x32xf32>
    %770 = arith.mulf %765, %767 : vector<2x32xf32>
    %771 = arith.addf %769, %770 : vector<2x32xf32>
    %772 = math.tanh %771 : vector<2x32xf32>
    %773 = arith.mulf %768, %772 : vector<2x32xf32>
    %774 = tpu.concatenate %773, %738 in 1 : vector<2x32xf32>, vector<2x32xf32> -> vector<2x64xf32>
    %cst_162 = arith.constant dense<0.000000e+00> : vector<2x128xf32>
    %775 = tpu.matmul %774, %7, %cst_162 {dimension_numbers = #tpu.dot_dimension_numbers<[1], [0], [0], [1], [0, 0, 1, 1], [], []>} : vector<2x64xf32>, vector<64x128xf32>, vector<2x128xf32> -> vector<2x128xf32>
    %776 = vector.broadcast %3 : vector<1x128xf32> to vector<2x128xf32>
    %777 = arith.addf %775, %776 : vector<2x128xf32>
    %cst_163 = arith.constant 2.000000e+00 : f32
    %778 = vector.broadcast %cst_163 : f32 to vector<2x128xf32>
    %779 = arith.mulf %777, %778 : vector<2x128xf32>
    %780 = arith.select %13, %779, %777 : vector<2x128xi1>, vector<2x128xf32>
    %781 = arith.negf %780 : vector<2x128xf32>
    %782 = math.exp %781 : vector<2x128xf32>
    %cst_164 = arith.constant 1.000000e+00 : f32
    %783 = vector.broadcast %cst_164 : f32 to vector<2x128xf32>
    %784 = arith.addf %783, %782 : vector<2x128xf32>
    %785 = arith.divf %783, %784 : vector<2x128xf32>
    %cst_165 = arith.constant 2.000000e+00 : f32
    %786 = vector.broadcast %cst_165 : f32 to vector<2x128xf32>
    %787 = arith.mulf %785, %786 : vector<2x128xf32>
    %cst_166 = arith.constant 1.000000e+00 : f32
    %788 = vector.broadcast %cst_166 : f32 to vector<2x128xf32>
    %789 = arith.subf %787, %788 : vector<2x128xf32>
    %790 = arith.select %13, %789, %785 : vector<2x128xi1>, vector<2x128xf32>
    %791 = vector.extract_strided_slice %790 {offsets = [0, 0], sizes = [2, 32], strides = [1, 1]} : vector<2x128xf32> to vector<2x32xf32>
    %792 = vector.extract_strided_slice %790 {offsets = [0, 32], sizes = [2, 32], strides = [1, 1]} : vector<2x128xf32> to vector<2x32xf32>
    %793 = vector.extract_strided_slice %790 {offsets = [0, 64], sizes = [2, 32], strides = [1, 1]} : vector<2x128xf32> to vector<2x32xf32>
    %794 = vector.extract_strided_slice %790 {offsets = [0, 96], sizes = [2, 32], strides = [1, 1]} : vector<2x128xf32> to vector<2x32xf32>
    %795 = arith.mulf %792, %736 : vector<2x32xf32>
    %796 = arith.mulf %791, %793 : vector<2x32xf32>
    %797 = arith.addf %795, %796 : vector<2x32xf32>
    %798 = math.tanh %797 : vector<2x32xf32>
    %799 = arith.mulf %794, %798 : vector<2x32xf32>
    %800 = vector.broadcast %4 : vector<1x32xf32> to vector<2x32xf32>
    %801 = arith.mulf %799, %800 : vector<2x32xf32>
    %cst_167 = arith.constant dense<0.000000e+00> : vector<2xf32>
    %802 = vector.multi_reduction <add>, %801, %cst_167 [1] : vector<2x32xf32> to vector<2xf32>
    %803 = vector.shape_cast %802 : vector<2xf32> to vector<2x1xf32>
    %804 = vector.broadcast %5 : vector<1x1xf32> to vector<2x1xf32>
    %805 = arith.addf %803, %804 : vector<2x1xf32>
    %806 = arith.negf %805 : vector<2x1xf32>
    %807 = math.exp %806 : vector<2x1xf32>
    %cst_168 = arith.constant 1.000000e+00 : f32
    %808 = vector.broadcast %cst_168 : f32 to vector<2x1xf32>
    %809 = arith.addf %808, %807 : vector<2x1xf32>
    %810 = arith.divf %808, %809 : vector<2x1xf32>
    %c0_169 = arith.constant 0 : index
    %c0_170 = arith.constant 0 : index
    %811 = vector.load %arg5[%c0_169, %c0_170] : memref<8x128xf32, #tpu.memory_space<vmem>>, vector<2x32xf32>
    tpu.vector_store %arg5[%c0_169, %c0_170], %773 {strides = array<i32>} : memref<8x128xf32, #tpu.memory_space<vmem>>, vector<2x32xf32>,
    %c2 = arith.constant 2 : index
    %c0_171 = arith.constant 0 : index
    %812 = vector.load %arg5[%c2, %c0_171] : memref<8x128xf32, #tpu.memory_space<vmem>>, vector<2x32xf32>
    tpu.vector_store %arg5[%c2, %c0_171], %799 {strides = array<i32>} : memref<8x128xf32, #tpu.memory_space<vmem>>, vector<2x32xf32>,
    %c4_172 = arith.constant 4 : index
    %c0_173 = arith.constant 0 : index
    %813 = vector.load %arg5[%c4_172, %c0_173] : memref<8x128xf32, #tpu.memory_space<vmem>>, vector<2x32xf32>
    tpu.vector_store %arg5[%c4_172, %c0_173], %771 {strides = array<i32>} : memref<8x128xf32, #tpu.memory_space<vmem>>, vector<2x32xf32>,
    %c6 = arith.constant 6 : index
    %c0_174 = arith.constant 0 : index
    %814 = vector.load %arg5[%c6, %c0_174] : memref<8x128xf32, #tpu.memory_space<vmem>>, vector<2x32xf32>
    tpu.vector_store %arg5[%c6, %c0_174], %797 {strides = array<i32>} : memref<8x128xf32, #tpu.memory_space<vmem>>, vector<2x32xf32>,
    %815 = tpu.concatenate %627, %688, %749, %810 in 1 : vector<2x1xf32>, vector<2x1xf32>, vector<2x1xf32>, vector<2x1xf32> -> vector<2x4xf32>
    %c0_175 = arith.constant 0 : index
    %c32_176 = arith.constant 32 : index
    %816 = vector.load %arg5[%c0_175, %c32_176] : memref<8x128xf32, #tpu.memory_space<vmem>>, vector<2x4xf32>
    tpu.vector_store %arg5[%c0_175, %c32_176], %815 {strides = array<i32>} : memref<8x128xf32, #tpu.memory_space<vmem>>, vector<2x4xf32>,
    return
  }
  func.func @transform_0(%arg0: i32) -> (i32, i32) {
    %c0_i32 = arith.constant 0 : i32
    %c0_i32_0 = arith.constant 0 : i32
    %c0_i32_1 = arith.constant 0 : i32
    return %c0_i32, %c0_i32_0 : i32, i32
  }
  func.func @transform_1(%arg0: i32) -> (i32, i32) {
    %c0_i32 = arith.constant 0 : i32
    %c0_i32_0 = arith.constant 0 : i32
    %c0_i32_1 = arith.constant 0 : i32
    return %c0_i32, %c0_i32_0 : i32, i32
  }
  func.func @transform_2(%arg0: i32) -> (i32, i32, i32) {
    %c0_i32 = arith.constant 0 : i32
    %c0_i32_0 = arith.constant 0 : i32
    %c0_i32_1 = arith.constant 0 : i32
    %c0_i32_2 = arith.constant 0 : i32
    return %c0_i32, %c0_i32_0, %c0_i32_1 : i32, i32, i32
  }
  func.func @transform_3(%arg0: i32) -> (i32, i32, i32) {
    %c0_i32 = arith.constant 0 : i32
    %c0_i32_0 = arith.constant 0 : i32
    %c0_i32_1 = arith.constant 0 : i32
    %c0_i32_2 = arith.constant 0 : i32
    return %c0_i32, %c0_i32_0, %c0_i32_1 : i32, i32, i32
  }
  func.func @transform_4(%arg0: i32) -> (i32, i32) {
    %c0_i32 = arith.constant 0 : i32
    %c0_i32_0 = arith.constant 0 : i32
    %c0_i32_1 = arith.constant 0 : i32
    return %c0_i32, %c0_i32_0 : i32, i32
  }
}

</mosaic_0001>

<bundles_post_ra>
// kernel: lstm_forward.1
= control target key start
LH: loop header
LB: loop body
LE: loop exit
PB: predicated region body
PF: predicated region fallthrough
CT: control target
= control target key end

     0   :  { %9 = vsyncpa [#allocation3], 0  ;;  %s3448_s0 = inlined_call_operand.hbm [shape: s32[2,8], index: 0, kind: input, shape index: {}]   ;;  %s3449_s1 = inlined_call_operand.hbm [shape: f32[104,128], index: 1, kind: input, shape index: {}]   ;;  %s3450_s2 = inlined_call_operand.vmem [shape: f32[2,2,32], index: 2, kind: input, shape index: {}]   ;;  %s3451_s3 = inlined_call_operand.hbm [shape: f32[2,2,32], index: 3, kind: input, shape index: {}]   ;;  %s3452_s4 = inlined_call_operand.vmem [shape: f32[8,128], index: 4, kind: output, shape index: {}]  }
   0x1   :  { %10 = vsyncpa [#allocation5], 0  ;;  %s2749_s15 = smov [#allocation4]  }
   0x2   :  { %s26_s16 = sshll.u32 %s2749_s15, 4  ;;  %s27_s16 = int_to_ptr.vmem [resolvable:$true] %s26_s16 }
   0x3   :  { %s2693_s17 = scalar_lea.vmem %s27_s16, 1664  ;;  %p2698_p1 = scmp.lt.s32.totalorder %s27_s16, %s27_s16 }
   0x4   :  { %p2694_p0 = scmp.ne.s32.totalorder %s27_s16, %s2693_s17  ;;  %p2699_p2 = scmp.lt.s32.totalorder %s2693_s17, %s2693_s17 }
   0x6   :  { %p2700_p3 = por %p2699_p2, %p2698_p1 }
   0x8   :  { %p2701_p4 = pnand %p2700_p3, %p2694_p0 }
   0xa   :  { %2704 = shalt.err (!%p2701_p4)
}
   0xb   :  { %s2750_s18 = smov 128   ;;  %s2751_s19 = smov 8  }
   0xc   :  { %32 = dma.hbm_to_vmem [thread:$0]  %s3449_s1, 1664, %s27_s16, [#allocation5], %s2750_s18, %s2750_s18, %s2751_s19  }
   0xd   :  { %s2752_s22 = smov [#allocation2]   ;;  %s2753_s24 = smov [#allocation6]  }
   0xe   :  { %s17_s23 = sshll.u32 %s2752_s22, 4  ;;  %s40_s25 = sshll.u32 %s2753_s24, 4  ;;  %s18_s23 = int_to_ptr.vmem [resolvable:$true] %s17_s23  ;;  %s41_s25 = int_to_ptr.vmem [resolvable:$true] %s40_s25 }
   0xf   :  { %s2713_s26 = scalar_lea.vmem %s18_s23, 32  ;;  %p2718_p6 = scmp.lt.s32.totalorder %s18_s23, %s18_s23 }
  0x10   :  { %p2714_p5 = scmp.ne.s32.totalorder %s18_s23, %s2713_s26  ;;  %p2719_p7 = scmp.lt.s32.totalorder %s2713_s26, %s2713_s26 }
  0x12   :  { %p2720_p8 = por %p2719_p7, %p2718_p6 }
  0x14   :  { %p2721_p9 = pnand %p2720_p8, %p2714_p5 }
  0x16   :  { %2724 = shalt.err (!%p2721_p9)
}
  0x17   :  { %20 = dma.hbm_to_vmem [thread:$0]  %s3448_s0, 32, %s18_s23, [#allocation3]  }
  0x18   :  { %s2733_s29 = scalar_lea.vmem %s41_s25, 64  ;;  %p2738_p11 = scmp.lt.s32.totalorder %s41_s25, %s41_s25 }
  0x19   :  { %p2734_p10 = scmp.ne.s32.totalorder %s41_s25, %s2733_s29  ;;  %p2739_p12 = scmp.lt.s32.totalorder %s2733_s29, %s2733_s29 }
  0x1b   :  { %p2740_p13 = por %p2739_p12, %p2738_p11 }
  0x1d   :  { %p2741_p0 = pnand %p2740_p13, %p2734_p10 }
  0x1f   :  { %2744 = shalt.err (!%p2741_p0)
}
  0x20   :  { %s2754_s1 = smov 32   ;;  %s2755_s30 = smov 2  }
  0x21   :  { %46 = dma.hbm_to_vmem [thread:$0]  %s3451_s3, 64, %s41_s25, [#allocation5], %s2754_s1, %s2754_s1, %s2755_s30  }
  0x22   :  { %2745 = dma.done.wait [#allocation3], 32  }
  0x23   :  { %2746 = vsyncadd [#allocation3], 4294967264 }
  0x24   :  { %2747 = dma.done.wait [#allocation5], 1728  }
  0x25   :  { %2748 = vsyncadd [#allocation5], 4294965568  ;;  %v2756_v0 = vmov 0.0   ;;  %vm2757_vm0 = vmmov 0   ;;  %v2758_v1 = vmov 0   ;;  %v2817_v2 = vld [vmem:[#allocation4 + $0x20] sm:$0xff]  ;;  %v72_v13 = vlaneseq }
  0x26   :  { %2281 = vmatprep.subr.mxu1 %v2756_v0  ;;  %56 = vst [vmem:[%s3452_s4] sm:$0xff] %v2756_v0  ;;  %2289 = vmatprep.mubr.msk.f32.mxu1 %vm2757_vm0, %v2756_v0  ;;  %v2819_v3 = vld [vmem:[#allocation4 + $0x18] sm:$0xff]  ;;  %v2824_v5 = vld [vmem:[#allocation4 + $0x10] sm:$0xff]  ;;  %v2834_v8 = vld [vmem:[#allocation4 + $0x8] sm:$0xff]  ;;  %vm292_vm5 = vcmask 261120   ;;  %s2759_s9 = smov 64   ;;  %vm412_vm13 = vcmask 523264  }
  0x27   :  { %2543 = vset.pattern.permute.xlu0 %v2758_v1  ;;  %2544 = vset.pattern.permute.xlu1 %v2758_v1  ;;  %v77_v4 = vld [vmem:[#allocation2] sm:$0x3]  ;;  %v287_v12 = vld [vmem:[#allocation6] sm:$0x3]  ;;  %v85_v14 = vshrl.u32 %v72_v13, 7  ;;  %v73_v32 = vand.u32 127, %v72_v13 }
  0x28   :  { %2311 = vmatprep.subr.mxu0 %v2756_v0  ;;  %2319 = vmatprep.mubr.msk.f32.mxu0 %vm2757_vm0, %v2756_v0  ;;  %vm78_vm1 = vcmp.eq.s32.totalorder %v77_v4, 0  ;;  %vm101_vm2 = vcmp.eq.s32.totalorder %v77_v4, 2  ;;  %vm89_vm3 = vcmp.eq.s32.totalorder %v77_v4, 1  ;;  %vm113_vm4 = vcmp.eq.s32.totalorder %v77_v4, 3  ;;  %v286_v9 = vld [vmem:[%s3450_s2] sm:$0x3] }
  0x29   :  { %2282 = vmatpush3.msra.mxu1 %v2817_v2  ;;  %2312 = vmatpush3.msra.mxu0 %v2817_v2  ;;  %v2828_v6 = vsel %vm78_vm1, 1, %v2758_v1  ;;  %v2830_v7 = vsel %vm101_vm2, 1, %v2758_v1  ;;  %v2842_v10 = vsel %vm89_vm3, 1, %v2758_v1  ;;  %v2845_v11 = vsel %vm113_vm4, 1, %v2758_v1  ;;  %v57_v18 = vld [vmem:[#allocation4] sm:$0xf] }
  0x2a   :  { %2283 = vmatprep.subr.mxu1 %v2756_v0  ;;  %2313 = vmatprep.subr.mxu0 %v2756_v0  ;;  %v86_v16 = vsub.s32 0, %v85_v14  ;;  %v97_v17 = vsub.s32 1, %v85_v14  ;;  %v109_v21 = vsub.s32 2, %v85_v14  ;;  %v121_v27 = vsub.s32 3, %v85_v14  ;;  %v2885_v55 = vld [vmem:[#allocation4 + $0x60] sm:$0xff]  ;;  %v2887_v56 = vld [vmem:[#allocation4 + $0x58] sm:$0xff] }
  0x2b   :  { %2284 = vmatpush3.msra.mxu1 %v2819_v3  ;;  %2314 = vmatpush3.msra.mxu0 %v2819_v3  ;;  %vm74_vm10 = vcmp.ge.s32.totalorder %v73_v32, 64  ;;  %vm75_vm11 = vcmp.lt.s32.totalorder %v73_v32, 96  ;;  %v2891_v57 = vld [vmem:[#allocation4 + $0x50] sm:$0xff]  ;;  %v2895_v58 = vld [vmem:[#allocation4 + $0x48] sm:$0xff]  ;;  %v2899_v59 = vld [vmem:[#allocation4 + $0x40] sm:$0xff]  ;;  %v2760_v4 = vmov 1  }
  0x2c   :  { %2285 = vmatprep.subr.mxu1 %v2756_v0  ;;  %81 = vperm.xlu0 %2543, %v2828_v6   ;;  %v2860_v20 = vrot.slane %v57_v18, %v86_v16  ;;  %v2862_v23 = vrot.slane %v57_v18, %v97_v17  ;;  %v2865_v25 = vrot.slane %v57_v18, %v109_v21  ;;  %vm2872_vm12 = vmand %vm74_vm10, %vm75_vm11  ;;  %v2903_v60 = vld [vmem:[#allocation4 + $0x38] sm:$0xff]  ;;  %v2907_v62 = vld [vmem:[#allocation4 + $0x30] sm:$0xff]  ;;  %s2767_s15 = smov 96   ;;  %s2768_s16 = smov 98  }
  0x2d   :  { %2286 = vmatpush3.msra.mxu1 %v2824_v5  ;;  %104 = vperm.xlu1 %2544, %v2830_v7   ;;  %v2869_v31 = vrot.slane %v57_v18, %v121_v27  ;;  %v2114_v63 = vld [vmem:[%s3450_s2 + $0x2] sm:$0x3]  ;;  %v2918_v1 = vld [vmem:[#allocation4 + $0x28] sm:$0xff]  ;;  %s2769_s17 = smov 97   ;;  %s2770_s18 = smov 99  }
  0x2e   :  { %2287 = vmatprep.subr.mxu1 %v2756_v0  ;;  %2315 = vmatprep.subr.mxu0 %v2756_v0 }
  0x2f   :  { %2288 = vmatpush3.msra.mxu1 %v2834_v8  ;;  %2316 = vmatpush3.msra.mxu0 %v2824_v5 }
  0x30   :  { %2290 = vmatmul.mubr.msk.f32.vlgmr.msra.gmra.mxu1 %vm292_vm5, %v286_v9  ;;  %92 = vperm.xlu0 %2543, %v2842_v10  }
  0x31   :  { %116 = vperm.xlu1 %2544, %v2845_v11   ;;  %2292 = vmatprep.subr.mxu1 %v2756_v0 }
  0x32   :  { %2317 = vmatprep.subr.mxu0 %v2756_v0  ;;  %2308 = vmatprep.mubr.msk.f32.mxu1 %vm2757_vm0, %v2756_v0 }
  0x33   :  { %2318 = vmatpush3.msra.mxu0 %v2834_v8  ;;  %2293 = vmatpush3.msra.mxu1 %v2885_v55 }
  0x34   :  { %2322 = vmatprep.subr.mxu0 %v2756_v0  ;;  %2294 = vmatprep.subr.mxu1 %v2756_v0 }
  0x35   :  { %379 = vrot.lane.b32.xlu1 %v287_v12, %s2754_s1  ;;  %2295 = vmatpush3.msra.mxu1 %v2887_v56 }
  0x36   :  { %2296 = vmatprep.subr.mxu1 %v2756_v0  ;;  %2546 = vset.pattern.permute.xlu1 %v2760_v4 }
  0x37   :  { %2297 = vmatpush3.msra.mxu1 %v2891_v57  ;;  %2545 = vset.pattern.permute.xlu0 %v2760_v4 }
  0x38   :  { %2298 = vmatprep.subr.mxu1 %v2756_v0 }
  0x39   :  { %2299 = vmatpush3.msra.mxu1 %v2895_v58 }
  0x3a   :  { %2300 = vmatprep.subr.mxu1 %v2756_v0 }
  0x3b   :  { %2301 = vmatpush3.msra.mxu1 %v2899_v59 }
  0x3c   :  { %2302 = vmatprep.subr.mxu1 %v2756_v0 }
  0x3d   :  { %2303 = vmatpush3.msra.mxu1 %v2903_v60 }
  0x3e   :  { %2304 = vmatprep.subr.mxu1 %v2756_v0 }
  0x3f   :  { %2305 = vmatpush3.msra.mxu1 %v2907_v62 }
  0x40   :  { %2306 = vmatprep.subr.mxu1 %v2756_v0 }
  0x41   :  { %2307 = vmatpush3.msra.mxu1 %v2918_v1 }
  0x42   :  { %2341 = vmatprep.subr.mxu1 %v2756_v0 }
  0xa7   :  { %v82_v15 = vpop.permute.xlu0 %81 }
  0xa8   :  { %v105_v22 = vpop.permute.xlu1 %104  ;;  %vm83_vm6 = vcmp.eq.s32.totalorder %v82_v15, 1 }
  0xa9   :  { %v88_v24 = vsel %vm83_vm6, %v2860_v20, 0.0  ;;  %vm106_vm8 = vcmp.eq.s32.totalorder %v105_v22, 1 }
  0xaa   :  { %v111_v30 = vsel %vm106_vm8, %v2865_v25, 0.0 }
  0xab   :  { %v93_v19 = vpop.permute.xlu0 %92 }
  0xac   :  { %vm94_vm7 = vcmp.eq.s32.totalorder %v93_v19, 1  ;;  %v117_v28 = vpop.permute.xlu1 %116 }
  0xad   :  { %v99_v26 = vsel %vm94_vm7, %v2862_v23, 0.0  ;;  %vm118_vm9 = vcmp.eq.s32.totalorder %v117_v28, 1 }
  0xae   :  { %v100_v29 = vadd.f32 %v99_v26, %v88_v24  ;;  %v123_v34 = vsel %vm118_vm9, %v2869_v31, 0.0 }
  0xb0   :  { %v112_v33 = vadd.f32 %v111_v30, %v100_v29  ;;  %v380_v51 = vpop.permute.xlu1 %379  ;;  %v2962_v30 = vld [vmem:[#allocation4 + $0x4] ss:$0 sm:$0xff] }
  0xb2   :  { %v124_v35 = vadd.f32 %v123_v34, %v112_v33 }
  0xf0   :  { %v362_v36 = vpop.f32.mrf.mxu1 }
  0xf1   :  { %v366_v37 = vadd.f32 %v362_v36, %v124_v35 }
  0xf2   :  { %v2291_v39 = vpop.f32.mrf.mxu1 }
  0xf3   :  { %v367_v40 = vmul.f32 2.0, %v366_v37 }
  0xf5   :  { %v368_v41 = vsel %vm2872_vm12, %v367_v40, %v366_v37 }
  0xf6   :  { %v2116_v42 = vmul.f32 -1.442695, %v368_v41 }
  0xf8   :  { %2559 = vpow2.f32 %v2116_v42 }
 0x105   :  { %v2560_v43 = vpop.eup %2559 }
 0x106   :  { %v372_v44 = vadd.f32 1.0, %v2560_v43 }
 0x108   :  { %2561 = vrcp.f32 %v372_v44 }
 0x115   :  { %v2562_v45 = vpop.eup %2561 }
 0x116   :  { %v375_v46 = vmul.f32 2.0, %v2562_v45 }
 0x118   :  { %v2117_v47 = vadd.f32 -1.0, %v375_v46 }
 0x11a   :  { %v377_v48 = vsel %vm2872_vm12, %v2117_v47, %v2562_v45 }
 0x11b   :  { %384 = vrot.lane.b32.xlu0 %v377_v48, %s2759_s9  ;;  %v382_v52 = vmul.f32 %v380_v51, %v377_v48 }
 0x18d   :  { %v385_v49 = vpop.permute.xlu0 %384 }
 0x18e   :  { %v387_v50 = vmul.f32 %v385_v49, %v377_v48 }
 0x190   :  { %389 = vrot.lane.b32.xlu0 %v387_v50, %s2754_s1 }
 0x202   :  { %v390_v53 = vpop.permute.xlu0 %389 }
 0x203   :  { %v2882_v54 = vadd.f32 %v390_v53, %v382_v52 }
 0x205   :  { %2563 = vtanh.f32 %v2882_v54 }
 0x212   :  { %v2564_v61 = vpop.eup %2563 }
 0x213   :  { %395 = vrot.lane.b32.xlu1 %v2564_v61, %s2759_s9 }
 0x217   :  { %404 = vrot.lane.b32.xlu1 %v2114_v63, %s2754_s1 }
 0x21b   :  { %131 = vperm.xlu1 %2546, %v2842_v10  }
 0x21f   :  { %137 = vperm.xlu1 %2546, %v2830_v7  }
 0x285   :  { %v396_v9 = vpop.permute.xlu1 %395 }
 0x286   :  { %v398_v12 = vmul.f32 %v396_v9, %v377_v48  ;;  %v291_v9 = vld [vmem:[#allocation6 + $0x2] sm:$0x3] }
 0x288   :  { %400 = vrot.lane.b32.xlu0 %v398_v12, %s2754_s1 }
 0x289   :  { %v405_v13 = vpop.permute.xlu1 %404 }
 0x28c   :  { %126 = vperm.xlu0 %2545, %v2828_v6  }
 0x290   :  { %143 = vperm.xlu0 %2545, %v2845_v11  }
 0x296   :  { %v132_v16 = vpop.permute.xlu1 %131 }
 0x297   :  { %vm133_vm14 = vcmp.eq.s32.totalorder %v132_v16, 1 }
 0x298   :  { %v134_v19 = vsel %vm133_vm14, %v2862_v23, 0.0 }
 0x29a   :  { %v138_v18 = vpop.permute.xlu1 %137 }
 0x29b   :  { %vm139_vm1 = vcmp.eq.s32.totalorder %v138_v18, 1 }
 0x29c   :  { %v140_v26 = vsel %vm139_vm1, %v2865_v25, 0.0 }
 0x2fa   :  { %v401_v14 = vpop.permute.xlu0 %400 }
 0x2fb   :  { %v407_v15 = vsel %vm292_vm5, %v401_v14, %v405_v13  ;;  %2320 = vmatmul.mubr.msk.f32.vlgmr.msra.gmra.mxu0 %vm292_vm5, %v401_v14 }
 0x2fc   :  { %2309 = vmatmul.mubr.msk.f32.vlgmr.msra.gmra.mxu1 %vm412_vm13, %v407_v15  ;;  %2323 = vmatpush3.msra.mxu0 %v2885_v55 }
 0x2fd   :  { %2324 = vmatprep.subr.mxu0 %v2756_v0  ;;  %2342 = vmatpush3.msra.mxu1 %v2817_v2 }
 0x2fe   :  { %2325 = vmatpush3.msra.mxu0 %v2887_v56  ;;  %2343 = vmatprep.subr.mxu1 %v2756_v0 }
 0x2ff   :  { %2326 = vmatprep.subr.mxu0 %v2756_v0  ;;  %2344 = vmatpush3.msra.mxu1 %v2819_v3 }
 0x300   :  { %2327 = vmatpush3.msra.mxu0 %v2891_v57  ;;  %2345 = vmatprep.subr.mxu1 %v2756_v0 }
 0x301   :  { %2328 = vmatprep.subr.mxu0 %v2756_v0  ;;  %2346 = vmatpush3.msra.mxu1 %v2824_v5 }
 0x302   :  { %2329 = vmatpush3.msra.mxu0 %v2895_v58  ;;  %2347 = vmatprep.subr.mxu1 %v2756_v0 }
 0x303   :  { %2330 = vmatprep.subr.mxu0 %v2756_v0  ;;  %2348 = vmatpush3.msra.mxu1 %v2834_v8 }
 0x304   :  { %2331 = vmatpush3.msra.mxu0 %v2899_v59  ;;  %2349 = vmatprep.mubr.msk.f32.mxu1 %vm2757_vm0, %v2756_v0 }
 0x305   :  { %2332 = vmatprep.subr.mxu0 %v2756_v0  ;;  %2338 = vmatprep.mubr.msk.f32.mxu0 %vm2757_vm0, %v2756_v0 }
 0x306   :  { %2333 = vmatpush3.msra.mxu0 %v2903_v60  ;;  %2352 = vmatprep.subr.mxu1 %v2756_v0 }
 0x307   :  { %2334 = vmatprep.subr.mxu0 %v2756_v0  ;;  %v127_v17 = vpop.permute.xlu0 %126 }
 0x308   :  { %2335 = vmatpush3.msra.mxu0 %v2907_v62  ;;  %vm128_vm15 = vcmp.eq.s32.totalorder %v127_v17, 1 }
 0x309   :  { %2336 = vmatprep.subr.mxu0 %v2756_v0  ;;  %v129_v21 = vsel %vm128_vm15, %v2860_v20, 0.0 }
 0x30a   :  { %2337 = vmatpush3.msra.mxu0 %v2918_v1  ;;  %v135_v24 = vadd.f32 %v134_v19, %v129_v21 }
 0x30b   :  { %2371 = vmatprep.subr.mxu0 %v2756_v0  ;;  %v144_v22 = vpop.permute.xlu0 %143 }
 0x30c   :  { %vm145_vm2 = vcmp.eq.s32.totalorder %v144_v22, 1  ;;  %v141_v27 = vadd.f32 %v140_v26, %v135_v24 }
 0x30d   :  { %v146_v28 = vsel %vm145_vm2, %v2869_v31, 0.0 }
 0x30e   :  { %v147_v29 = vadd.f32 %v146_v28, %v141_v27  ;;  %v2761_v28 = vmov 2  }
 0x30f   :  { %2548 = vset.pattern.permute.xlu1 %v2761_v28  ;;  %2547 = vset.pattern.permute.xlu0 %v2761_v28 }
 0x3bb   :  { %v586_v32 = vpop.f32.mrf.mxu0 }
 0x3bc   :  { %v590_v33 = vadd.f32 %v586_v32, %v147_v29  ;;  %v482_v34 = vpop.f32.mrf.mxu1 }
 0x3bd   :  { %v483_v35 = vadd.f32 %v2962_v30, %v482_v34  ;;  %v2321_v36 = vpop.f32.mrf.mxu0 }
 0x3be   :  { %v591_v37 = vmul.f32 2.0, %v590_v33  ;;  %v2310_v39 = vpop.f32.mrf.mxu1 }
 0x3bf   :  { %v486_v40 = vmul.f32 2.0, %v483_v35 }
 0x3c0   :  { %v592_v41 = vsel %vm2872_vm12, %v591_v37, %v590_v33 }
 0x3c1   :  { %v2123_v42 = vmul.f32 -1.442695, %v592_v41  ;;  %v487_v43 = vsel %vm2872_vm12, %v486_v40, %v483_v35 }
 0x3c2   :  { %v2120_v44 = vmul.f32 -1.442695, %v487_v43 }
 0x3c3   :  { %2565 = vpow2.f32 %v2123_v42 }
 0x3c4   :  { %2567 = vpow2.f32 %v2120_v44 }
 0x3d0   :  { %v2566_v45 = vpop.eup %2565 }
 0x3d1   :  { %v2568_v46 = vpop.eup %2567  ;;  %v596_v47 = vadd.f32 1.0, %v2566_v45 }
 0x3d2   :  { %v491_v48 = vadd.f32 1.0, %v2568_v46 }
 0x3d3   :  { %2569 = vrcp.f32 %v596_v47 }
 0x3d4   :  { %2571 = vrcp.f32 %v491_v48 }
 0x3e0   :  { %v2570_v49 = vpop.eup %2569 }
 0x3e1   :  { %v2572_v50 = vpop.eup %2571  ;;  %v599_v51 = vmul.f32 2.0, %v2570_v49 }
 0x3e2   :  { %v494_v52 = vmul.f32 2.0, %v2572_v50 }
 0x3e3   :  { %v2124_v53 = vadd.f32 -1.0, %v599_v51 }
 0x3e4   :  { %v2121_v61 = vadd.f32 -1.0, %v494_v52 }
 0x3e5   :  { %v601_v63 = vsel %vm2872_vm12, %v2124_v53, %v2570_v49 }
 0x3e6   :  { %604 = vrot.lane.b32.xlu0 %v601_v63, %s2759_s9  ;;  %v496_v4 = vsel %vm2872_vm12, %v2121_v61, %v2572_v50  ;;  %v602_v17 = vmul.f32 %v601_v63, %v2882_v54 }
 0x3e7   :  { %503 = vrot.lane.b32.xlu1 %v496_v4, %s2759_s9 }
 0x3eb   :  { %498 = vrot.lane.b32.xlu1 %v291_v9, %s2754_s1 }
 0x458   :  { %v605_v12 = vpop.permute.xlu0 %604 }
 0x459   :  { %v607_v13 = vmul.f32 %v605_v12, %v601_v63  ;;  %v504_v14 = vpop.permute.xlu1 %503 }
 0x45a   :  { %v506_v15 = vmul.f32 %v504_v14, %v496_v4 }
 0x45b   :  { %609 = vrot.lane.b32.xlu1 %v607_v13, %s2754_s1 }
 0x45c   :  { %508 = vrot.lane.b32.xlu0 %v506_v15, %s2754_s1 }
 0x45d   :  { %v499_v16 = vpop.permute.xlu1 %498 }
 0x45e   :  { %v501_v18 = vmul.f32 %v499_v16, %v496_v4 }
 0x4cd   :  { %v610_v19 = vpop.permute.xlu1 %609 }
 0x4ce   :  { %v2979_v21 = vadd.f32 %v610_v19, %v602_v17  ;;  %v509_v22 = vpop.permute.xlu0 %508 }
 0x4cf   :  { %v2981_v24 = vadd.f32 %v509_v22, %v501_v18 }
 0x4d0   :  { %2573 = vtanh.f32 %v2979_v21 }
 0x4d1   :  { %2575 = vtanh.f32 %v2981_v24 }
 0x4dd   :  { %v2574_v26 = vpop.eup %2573 }
 0x4de   :  { %v2576_v27 = vpop.eup %2575  ;;  %615 = vrot.lane.b32.xlu1 %v2574_v26, %s2759_s9 }
 0x4df   :  { %514 = vrot.lane.b32.xlu0 %v2576_v27, %s2759_s9 }
 0x550   :  { %v616_v54 = vpop.permute.xlu1 %615 }
 0x551   :  { %v515_v29 = vpop.permute.xlu0 %514  ;;  %v618_v32 = vmul.f32 %v616_v54, %v601_v63 }
 0x552   :  { %v517_v33 = vmul.f32 %v515_v29, %v496_v4 }
 0x553   :  { %620 = vrot.lane.b32.xlu0 %v618_v32, %s2754_s1 }
 0x554   :  { %624 = vrot.lane.b32.xlu1 %v517_v33, %s2759_s9 }
 0x557   :  { %149 = vperm.xlu0 %2547, %v2828_v6  }
 0x558   :  { %154 = vperm.xlu1 %2548, %v2842_v10  }
 0x55b   :  { %166 = vperm.xlu0 %2547, %v2845_v11  }
 0x55c   :  { %160 = vperm.xlu1 %2548, %v2830_v7  }
 0x5c5   :  { %v621_v34 = vpop.permute.xlu0 %620 }
 0x5c6   :  { %2350 = vmatmul.mubr.msk.f32.vlgmr.msra.gmra.mxu1 %vm292_vm5, %v621_v34  ;;  %v625_v35 = vpop.permute.xlu1 %624 }
 0x5c7   :  { %v627_v36 = vsel %vm292_vm5, %v621_v34, %v625_v35  ;;  %2353 = vmatpush3.msra.mxu1 %v2885_v55  ;;  %2368 = vmatprep.mubr.msk.f32.mxu1 %vm2757_vm0, %v2756_v0 }
 0x5c8   :  { %2339 = vmatmul.mubr.msk.f32.vlgmr.msra.gmra.mxu0 %vm412_vm13, %v627_v36  ;;  %2354 = vmatprep.subr.mxu1 %v2756_v0 }
 0x5c9   :  { %2355 = vmatpush3.msra.mxu1 %v2887_v56  ;;  %2372 = vmatpush3.msra.mxu0 %v2817_v2 }
 0x5ca   :  { %2356 = vmatprep.subr.mxu1 %v2756_v0  ;;  %2373 = vmatprep.subr.mxu0 %v2756_v0 }
 0x5cb   :  { %2357 = vmatpush3.msra.mxu1 %v2891_v57  ;;  %2374 = vmatpush3.msra.mxu0 %v2819_v3 }
 0x5cc   :  { %2358 = vmatprep.subr.mxu1 %v2756_v0  ;;  %2375 = vmatprep.subr.mxu0 %v2756_v0 }
 0x5cd   :  { %2359 = vmatpush3.msra.mxu1 %v2895_v58  ;;  %2376 = vmatpush3.msra.mxu0 %v2824_v5 }
 0x5ce   :  { %2360 = vmatprep.subr.mxu1 %v2756_v0  ;;  %2377 = vmatprep.subr.mxu0 %v2756_v0 }
 0x5cf   :  { %2361 = vmatpush3.msra.mxu1 %v2899_v59  ;;  %2378 = vmatpush3.msra.mxu0 %v2834_v8 }
 0x5d0   :  { %2362 = vmatprep.subr.mxu1 %v2756_v0  ;;  %2379 = vmatprep.mubr.msk.f32.mxu0 %vm2757_vm0, %v2756_v0 }
 0x5d1   :  { %2363 = vmatpush3.msra.mxu1 %v2903_v60  ;;  %2382 = vmatprep.subr.mxu0 %v2756_v0 }
 0x5d2   :  { %2364 = vmatprep.subr.mxu1 %v2756_v0  ;;  %v150_v39 = vpop.permute.xlu0 %149 }
 0x5d3   :  { %2365 = vmatpush3.msra.mxu1 %v2907_v62  ;;  %v155_v37 = vpop.permute.xlu1 %154  ;;  %vm151_vm4 = vcmp.eq.s32.totalorder %v150_v39, 1 }
 0x5d4   :  { %2366 = vmatprep.subr.mxu1 %v2756_v0  ;;  %vm156_vm3 = vcmp.eq.s32.totalorder %v155_v37, 1  ;;  %v152_v42 = vsel %vm151_vm4, %v2860_v20, 0.0 }
 0x5d5   :  { %2367 = vmatpush3.msra.mxu1 %v2918_v1  ;;  %v157_v41 = vsel %vm156_vm3, %v2862_v23, 0.0 }
 0x5d6   :  { %2401 = vmatprep.subr.mxu1 %v2756_v0  ;;  %v167_v43 = vpop.permute.xlu0 %166  ;;  %v158_v44 = vadd.f32 %v157_v41, %v152_v42 }
 0x5d7   :  { %v161_v40 = vpop.permute.xlu1 %160  ;;  %vm168_vm7 = vcmp.eq.s32.totalorder %v167_v43, 1 }
 0x5d8   :  { %vm162_vm6 = vcmp.eq.s32.totalorder %v161_v40, 1  ;;  %v169_v47 = vsel %vm168_vm7, %v2869_v31, 0.0 }
 0x5d9   :  { %v163_v45 = vsel %vm162_vm6, %v2865_v25, 0.0 }
 0x5da   :  { %v164_v46 = vadd.f32 %v163_v45, %v158_v44 }
 0x5dc   :  { %v170_v48 = vadd.f32 %v169_v47, %v164_v46  ;;  %v2762_v46 = vmov 3  }
 0x5dd   :  { %2549 = vset.pattern.permute.xlu1 %v2762_v46  ;;  %2550 = vset.pattern.permute.xlu0 %v2762_v46 }
 0x686   :  { %v797_v49 = vpop.f32.mrf.mxu1 }
 0x687   :  { %v801_v50 = vadd.f32 %v797_v49, %v170_v48 }
 0x688   :  { %v697_v51 = vpop.f32.mrf.mxu0  ;;  %v2351_v52 = vpop.f32.mrf.mxu1 }
 0x689   :  { %v802_v53 = vmul.f32 2.0, %v801_v50  ;;  %v698_v61 = vadd.f32 %v2962_v30, %v697_v51 }
 0x68a   :  { %v2340_v63 = vpop.f32.mrf.mxu0 }
 0x68b   :  { %v803_v4 = vsel %vm2872_vm12, %v802_v53, %v801_v50  ;;  %v701_v9 = vmul.f32 2.0, %v698_v61 }
 0x68c   :  { %v2129_v12 = vmul.f32 -1.442695, %v803_v4 }
 0x68d   :  { %v702_v13 = vsel %vm2872_vm12, %v701_v9, %v698_v61 }
 0x68e   :  { %2577 = vpow2.f32 %v2129_v12  ;;  %v2126_v14 = vmul.f32 -1.442695, %v702_v13 }
 0x690   :  { %2579 = vpow2.f32 %v2126_v14 }
 0x69b   :  { %v2578_v15 = vpop.eup %2577 }
 0x69c   :  { %v807_v16 = vadd.f32 1.0, %v2578_v15 }
 0x69d   :  { %v2580_v17 = vpop.eup %2579 }
 0x69e   :  { %2581 = vrcp.f32 %v807_v16  ;;  %v706_v18 = vadd.f32 1.0, %v2580_v17 }
 0x6a0   :  { %2583 = vrcp.f32 %v706_v18 }
 0x6ab   :  { %v2582_v19 = vpop.eup %2581 }
 0x6ac   :  { %v810_v22 = vmul.f32 2.0, %v2582_v19 }
 0x6ad   :  { %v2584_v26 = vpop.eup %2583 }
 0x6ae   :  { %v2130_v27 = vadd.f32 -1.0, %v810_v22  ;;  %v709_v28 = vmul.f32 2.0, %v2584_v26 }
 0x6b0   :  { %v812_v54 = vsel %vm2872_vm12, %v2130_v27, %v2582_v19  ;;  %v2127_v29 = vadd.f32 -1.0, %v709_v28 }
 0x6b1   :  { %815 = vrot.lane.b32.xlu0 %v812_v54, %s2759_s9  ;;  %v813_v37 = vmul.f32 %v812_v54, %v2979_v21 }
 0x6b2   :  { %v711_v32 = vsel %vm2872_vm12, %v2127_v29, %v2584_v26 }
 0x6b3   :  { %714 = vrot.lane.b32.xlu1 %v711_v32, %s2759_s9  ;;  %v712_v41 = vmul.f32 %v711_v32, %v2981_v24 }
 0x723   :  { %v816_v33 = vpop.permute.xlu0 %815 }
 0x724   :  { %v818_v34 = vmul.f32 %v816_v33, %v812_v54 }
 0x725   :  { %v715_v35 = vpop.permute.xlu1 %714 }
 0x726   :  { %v717_v36 = vmul.f32 %v715_v35, %v711_v32  ;;  %820 = vrot.lane.b32.xlu0 %v818_v34, %s2754_s1 }
 0x728   :  { %719 = vrot.lane.b32.xlu1 %v717_v36, %s2754_s1 }
 0x798   :  { %v821_v39 = vpop.permute.xlu0 %820 }
 0x799   :  { %v3042_v40 = vadd.f32 %v821_v39, %v813_v37 }
 0x79a   :  { %v720_v42 = vpop.permute.xlu1 %719 }
 0x79b   :  { %2585 = vtanh.f32 %v3042_v40  ;;  %v3046_v43 = vadd.f32 %v720_v42, %v712_v41 }
 0x79d   :  { %2587 = vtanh.f32 %v3046_v43 }
 0x7a8   :  { %v2586_v44 = vpop.eup %2585 }
 0x7a9   :  { %826 = vrot.lane.b32.xlu0 %v2586_v44, %s2759_s9 }
 0x7aa   :  { %v2588_v45 = vpop.eup %2587 }
 0x7ab   :  { %725 = vrot.lane.b32.xlu1 %v2588_v45, %s2759_s9 }
 0x81b   :  { %v827_v21 = vpop.permute.xlu0 %826 }
 0x81c   :  { %v829_v47 = vmul.f32 %v827_v21, %v812_v54 }
 0x81d   :  { %v726_v48 = vpop.permute.xlu1 %725 }
 0x81e   :  { %v728_v24 = vmul.f32 %v726_v48, %v711_v32  ;;  %831 = vrot.lane.b32.xlu1 %v829_v47, %s2754_s1 }
 0x820   :  { %835 = vrot.lane.b32.xlu0 %v728_v24, %s2759_s9 }
 0x822   :  { %172 = vperm.xlu1 %2549, %v2828_v6  }
 0x824   :  { %177 = vperm.xlu0 %2550, %v2842_v10  }
 0x826   :  { %183 = vperm.xlu1 %2549, %v2830_v7  }
 0x82a   :  { %189 = vperm.xlu1 %2549, %v2845_v11  }
 0x890   :  { %v832_v49 = vpop.permute.xlu1 %831 }
 0x891   :  { %2380 = vmatmul.mubr.msk.f32.vlgmr.msra.gmra.mxu0 %vm292_vm5, %v832_v49 }
 0x892   :  { %v836_v50 = vpop.permute.xlu0 %835  ;;  %2383 = vmatpush3.msra.mxu0 %v2885_v55  ;;  %2398 = vmatprep.mubr.msk.f32.mxu0 %vm2757_vm0, %v2756_v0 }
 0x893   :  { %v838_v51 = vsel %vm292_vm5, %v832_v49, %v836_v50  ;;  %2384 = vmatprep.subr.mxu0 %v2756_v0 }
 0x894   :  { %2369 = vmatmul.mubr.msk.f32.vlgmr.msra.gmra.mxu1 %vm412_vm13, %v838_v51  ;;  %2385 = vmatpush3.msra.mxu0 %v2887_v56 }
 0x895   :  { %2386 = vmatprep.subr.mxu0 %v2756_v0  ;;  %2402 = vmatpush3.msra.mxu1 %v2817_v2 }
 0x896   :  { %2387 = vmatpush3.msra.mxu0 %v2891_v57  ;;  %2403 = vmatprep.subr.mxu1 %v2756_v0 }
 0x897   :  { %2388 = vmatprep.subr.mxu0 %v2756_v0  ;;  %2404 = vmatpush3.msra.mxu1 %v2819_v3 }
 0x898   :  { %2389 = vmatpush3.msra.mxu0 %v2895_v58  ;;  %2405 = vmatprep.subr.mxu1 %v2756_v0 }
 0x899   :  { %2390 = vmatprep.subr.mxu0 %v2756_v0  ;;  %2406 = vmatpush3.msra.mxu1 %v2824_v5 }
 0x89a   :  { %2391 = vmatpush3.msra.mxu0 %v2899_v59  ;;  %2407 = vmatprep.subr.mxu1 %v2756_v0 }
 0x89b   :  { %2392 = vmatprep.subr.mxu0 %v2756_v0  ;;  %2408 = vmatpush3.msra.mxu1 %v2834_v8 }
 0x89c   :  { %2393 = vmatpush3.msra.mxu0 %v2903_v60  ;;  %2409 = vmatprep.mubr.msk.f32.mxu1 %vm2757_vm0, %v2756_v0 }
 0x89d   :  { %2394 = vmatprep.subr.mxu0 %v2756_v0  ;;  %2412 = vmatprep.subr.mxu1 %v2756_v0  ;;  %v173_v52 = vpop.permute.xlu1 %172 }
 0x89e   :  { %2395 = vmatpush3.msra.mxu0 %v2907_v62  ;;  %vm174_vm8 = vcmp.eq.s32.totalorder %v173_v52, 1 }
 0x89f   :  { %2396 = vmatprep.subr.mxu0 %v2756_v0  ;;  %v178_v53 = vpop.permute.xlu0 %177  ;;  %v175_v63 = vsel %vm174_vm8, %v2860_v20, 0.0 }
 0x8a0   :  { %2397 = vmatpush3.msra.mxu0 %v2918_v1  ;;  %vm179_vm9 = vcmp.eq.s32.totalorder %v178_v53, 1 }
 0x8a1   :  { %2431 = vmatprep.subr.mxu0 %v2756_v0  ;;  %v184_v61 = vpop.permute.xlu1 %183  ;;  %v180_v4 = vsel %vm179_vm9, %v2862_v23, 0.0 }
 0x8a2   :  { %vm185_vm10 = vcmp.eq.s32.totalorder %v184_v61, 1  ;;  %v181_v12 = vadd.f32 %v180_v4, %v175_v63 }
 0x8a3   :  { %v186_v13 = vsel %vm185_vm10, %v2865_v25, 0.0 }
 0x8a4   :  { %v187_v14 = vadd.f32 %v186_v13, %v181_v12 }
 0x8a5   :  { %v190_v9 = vpop.permute.xlu1 %189 }
 0x8a6   :  { %vm191_vm11 = vcmp.eq.s32.totalorder %v190_v9, 1 }
 0x8a7   :  { %v192_v15 = vsel %vm191_vm11, %v2869_v31, 0.0 }
 0x8a8   :  { %v193_v16 = vadd.f32 %v192_v15, %v187_v14  ;;  %v2763_v14 = vmov 4  }
 0x8a9   :  { %2552 = vset.pattern.permute.xlu1 %v2763_v14  ;;  %2551 = vset.pattern.permute.xlu0 %v2763_v14 }
 0x951   :  { %v1008_v17 = vpop.f32.mrf.mxu0 }
 0x952   :  { %v1012_v18 = vadd.f32 %v1008_v17, %v193_v16 }
 0x953   :  { %v2381_v19 = vpop.f32.mrf.mxu0 }
 0x954   :  { %v1013_v22 = vmul.f32 2.0, %v1012_v18  ;;  %v908_v26 = vpop.f32.mrf.mxu1 }
 0x955   :  { %v909_v27 = vadd.f32 %v2962_v30, %v908_v26 }
 0x956   :  { %v1014_v28 = vsel %vm2872_vm12, %v1013_v22, %v1012_v18  ;;  %v2370_v54 = vpop.f32.mrf.mxu1 }
 0x957   :  { %v2135_v29 = vmul.f32 -1.442695, %v1014_v28  ;;  %v912_v32 = vmul.f32 2.0, %v909_v27 }
 0x959   :  { %2589 = vpow2.f32 %v2135_v29  ;;  %v913_v33 = vsel %vm2872_vm12, %v912_v32, %v909_v27 }
 0x95a   :  { %v2132_v34 = vmul.f32 -1.442695, %v913_v33 }
 0x95c   :  { %2591 = vpow2.f32 %v2132_v34 }
 0x966   :  { %v2590_v35 = vpop.eup %2589 }
 0x967   :  { %v1018_v36 = vadd.f32 1.0, %v2590_v35 }
 0x969   :  { %v2592_v37 = vpop.eup %2591  ;;  %2593 = vrcp.f32 %v1018_v36 }
 0x96a   :  { %v917_v39 = vadd.f32 1.0, %v2592_v37 }
 0x96c   :  { %2595 = vrcp.f32 %v917_v39 }
 0x976   :  { %v2594_v41 = vpop.eup %2593 }
 0x977   :  { %v1021_v42 = vmul.f32 2.0, %v2594_v41 }
 0x979   :  { %v2596_v44 = vpop.eup %2595  ;;  %v2136_v45 = vadd.f32 -1.0, %v1021_v42 }
 0x97a   :  { %v920_v46 = vmul.f32 2.0, %v2596_v44 }
 0x97b   :  { %v1023_v21 = vsel %vm2872_vm12, %v2136_v45, %v2594_v41 }
 0x97c   :  { %1026 = vrot.lane.b32.xlu1 %v1023_v21, %s2759_s9  ;;  %v2133_v47 = vadd.f32 -1.0, %v920_v46  ;;  %v1024_v52 = vmul.f32 %v1023_v21, %v3042_v40 }
 0x97e   :  { %v922_v48 = vsel %vm2872_vm12, %v2133_v47, %v2596_v44 }
 0x97f   :  { %925 = vrot.lane.b32.xlu0 %v922_v48, %s2759_s9  ;;  %v923_v63 = vmul.f32 %v922_v48, %v3046_v43 }
 0x9ee   :  { %v1027_v24 = vpop.permute.xlu1 %1026 }
 0x9ef   :  { %v1029_v49 = vmul.f32 %v1027_v24, %v1023_v21 }
 0x9f1   :  { %v926_v50 = vpop.permute.xlu0 %925  ;;  %1031 = vrot.lane.b32.xlu1 %v1029_v49, %s2754_s1 }
 0x9f2   :  { %v928_v51 = vmul.f32 %v926_v50, %v922_v48 }
 0x9f4   :  { %930 = vrot.lane.b32.xlu0 %v928_v51, %s2754_s1 }
 0xa63   :  { %v1032_v53 = vpop.permute.xlu1 %1031 }
 0xa64   :  { %v3106_v61 = vadd.f32 %v1032_v53, %v1024_v52 }
 0xa66   :  { %2597 = vtanh.f32 %v3106_v61  ;;  %v931_v4 = vpop.permute.xlu0 %930 }
 0xa67   :  { %v3110_v9 = vadd.f32 %v931_v4, %v923_v63 }
 0xa69   :  { %2599 = vtanh.f32 %v3110_v9 }
 0xa73   :  { %v2598_v12 = vpop.eup %2597 }
 0xa74   :  { %1037 = vrot.lane.b32.xlu1 %v2598_v12, %s2759_s9 }
 0xa76   :  { %v2600_v13 = vpop.eup %2599 }
 0xa77   :  { %936 = vrot.lane.b32.xlu0 %v2600_v13, %s2759_s9 }
 0xae6   :  { %v1038_v40 = vpop.permute.xlu1 %1037 }
 0xae7   :  { %v1040_v15 = vmul.f32 %v1038_v40, %v1023_v21 }
 0xae9   :  { %v937_v16 = vpop.permute.xlu0 %936  ;;  %1042 = vrot.lane.b32.xlu0 %v1040_v15, %s2754_s1 }
 0xaea   :  { %v939_v43 = vmul.f32 %v937_v16, %v922_v48 }
 0xaec   :  { %1046 = vrot.lane.b32.xlu1 %v939_v43, %s2759_s9 }
 0xaed   :  { %195 = vperm.xlu0 %2551, %v2828_v6  }
 0xaf0   :  { %200 = vperm.xlu1 %2552, %v2842_v10  }
 0xaf1   :  { %212 = vperm.xlu0 %2551, %v2845_v11  }
 0xaf4   :  { %206 = vperm.xlu1 %2552, %v2830_v7  }
 0xb5b   :  { %v1043_v17 = vpop.permute.xlu0 %1042 }
 0xb5c   :  { %2410 = vmatmul.mubr.msk.f32.vlgmr.msra.gmra.mxu1 %vm292_vm5, %v1043_v17 }
 0xb5d   :  { %2413 = vmatpush3.msra.mxu1 %v2885_v55  ;;  %2428 = vmatprep.mubr.msk.f32.mxu1 %vm2757_vm0, %v2756_v0 }
 0xb5e   :  { %v1047_v18 = vpop.permute.xlu1 %1046  ;;  %2414 = vmatprep.subr.mxu1 %v2756_v0 }
 0xb5f   :  { %v1049_v19 = vsel %vm292_vm5, %v1043_v17, %v1047_v18  ;;  %2415 = vmatpush3.msra.mxu1 %v2887_v56 }
 0xb60   :  { %2399 = vmatmul.mubr.msk.f32.vlgmr.msra.gmra.mxu0 %vm412_vm13, %v1049_v19  ;;  %2416 = vmatprep.subr.mxu1 %v2756_v0 }
 0xb61   :  { %2432 = vmatpush3.msra.mxu0 %v2817_v2  ;;  %2417 = vmatpush3.msra.mxu1 %v2891_v57 }
 0xb62   :  { %2433 = vmatprep.subr.mxu0 %v2756_v0  ;;  %2418 = vmatprep.subr.mxu1 %v2756_v0 }
 0xb63   :  { %2434 = vmatpush3.msra.mxu0 %v2819_v3  ;;  %2419 = vmatpush3.msra.mxu1 %v2895_v58 }
 0xb64   :  { %2435 = vmatprep.subr.mxu0 %v2756_v0  ;;  %2420 = vmatprep.subr.mxu1 %v2756_v0 }
 0xb65   :  { %2436 = vmatpush3.msra.mxu0 %v2824_v5  ;;  %2421 = vmatpush3.msra.mxu1 %v2899_v59 }
 0xb66   :  { %2437 = vmatprep.subr.mxu0 %v2756_v0  ;;  %2422 = vmatprep.subr.mxu1 %v2756_v0 }
 0xb67   :  { %2438 = vmatpush3.msra.mxu0 %v2834_v8  ;;  %2439 = vmatprep.mubr.msk.f32.mxu0 %vm2757_vm0, %v2756_v0 }
 0xb68   :  { %2423 = vmatpush3.msra.mxu1 %v2903_v60  ;;  %2442 = vmatprep.subr.mxu0 %v2756_v0  ;;  %v196_v3 = vpop.permute.xlu0 %195 }
 0xb69   :  { %2424 = vmatprep.subr.mxu1 %v2756_v0  ;;  %vm197_vm15 = vcmp.eq.s32.totalorder %v196_v3, 1 }
 0xb6a   :  { %2425 = vmatpush3.msra.mxu1 %v2907_v62  ;;  %v198_v22 = vsel %vm197_vm15, %v2860_v20, 0.0 }
 0xb6b   :  { %2426 = vmatprep.subr.mxu1 %v2756_v0  ;;  %v201_v2 = vpop.permute.xlu1 %200 }
 0xb6c   :  { %2427 = vmatpush3.msra.mxu1 %v2918_v1  ;;  %vm202_vm14 = vcmp.eq.s32.totalorder %v201_v2, 1  ;;  %v213_v26 = vpop.permute.xlu0 %212 }
 0xb6d   :  { %2461 = vmatprep.subr.mxu1 %v2756_v0  ;;  %v203_v8 = vsel %vm202_vm14, %v2862_v23, 0.0  ;;  %vm214_vm2 = vcmp.eq.s32.totalorder %v213_v26, 1 }
 0xb6e   :  { %v204_v27 = vadd.f32 %v203_v8, %v198_v22  ;;  %v215_v29 = vsel %vm214_vm2, %v2869_v31, 0.0  ;;  %v2764_v8 = vmov 5   ;;  %vm1375_vm2 = vcmask 254976  }
 0xb6f   :  { %v207_v5 = vpop.permute.xlu1 %206  ;;  %2553 = vset.pattern.permute.xlu1 %v2764_v8  ;;  %2554 = vset.pattern.permute.xlu0 %v2764_v8 }
 0xb70   :  { %vm208_vm1 = vcmp.eq.s32.totalorder %v207_v5, 1 }
 0xb71   :  { %v209_v28 = vsel %vm208_vm1, %v2865_v25, 0.0 }
 0xb72   :  { %v210_v54 = vadd.f32 %v209_v28, %v204_v27  ;;  %v3190_v28 = vld [vmem:[%s3452_s4] sm:$0xff] }
 0xb74   :  { %v216_v32 = vadd.f32 %v215_v29, %v210_v54 }
 0xc1c   :  { %v1219_v0 = vpop.f32.mrf.mxu1 }
 0xc1d   :  { %v1223_v33 = vadd.f32 %v1219_v0, %v216_v32  ;;  %v3206_v32 = vld [vmem:[#allocation4 + $0x18] sm:$0xff] }
 0xc1e   :  { %v2411_v34 = vpop.f32.mrf.mxu1 }
 0xc1f   :  { %v1224_v35 = vmul.f32 2.0, %v1223_v33 }
 0xc20   :  { %v1119_v36 = vpop.f32.mrf.mxu0 }
 0xc21   :  { %v1225_v37 = vsel %vm2872_vm12, %v1224_v35, %v1223_v33  ;;  %v1120_v39 = vadd.f32 %v2962_v30, %v1119_v36 }
 0xc22   :  { %v2141_v41 = vmul.f32 -1.442695, %v1225_v37  ;;  %v2400_v42 = vpop.f32.mrf.mxu0 }
 0xc23   :  { %v1123_v44 = vmul.f32 2.0, %v1120_v39 }
 0xc24   :  { %2601 = vpow2.f32 %v2141_v41 }
 0xc25   :  { %v1124_v45 = vsel %vm2872_vm12, %v1123_v44, %v1120_v39 }
 0xc26   :  { %v2138_v46 = vmul.f32 -1.442695, %v1124_v45 }
 0xc28   :  { %2603 = vpow2.f32 %v2138_v46 }
 0xc31   :  { %v2602_v21 = vpop.eup %2601 }
 0xc32   :  { %v1229_v47 = vadd.f32 1.0, %v2602_v21 }
 0xc34   :  { %2605 = vrcp.f32 %v1229_v47 }
 0xc35   :  { %v2604_v48 = vpop.eup %2603 }
 0xc36   :  { %v1128_v24 = vadd.f32 1.0, %v2604_v48 }
 0xc38   :  { %2607 = vrcp.f32 %v1128_v24 }
 0xc41   :  { %v2606_v49 = vpop.eup %2605 }
 0xc42   :  { %v1232_v50 = vmul.f32 2.0, %v2606_v49 }
 0xc44   :  { %v2142_v51 = vadd.f32 -1.0, %v1232_v50 }
 0xc45   :  { %v2608_v52 = vpop.eup %2607 }
 0xc46   :  { %v1234_v53 = vsel %vm2872_vm12, %v2142_v51, %v2606_v49  ;;  %v1131_v63 = vmul.f32 2.0, %v2608_v52 }
 0xc47   :  { %1237 = vrot.lane.b32.xlu0 %v1234_v53, %s2759_s9  ;;  %v1235_v16 = vmul.f32 %v1234_v53, %v3106_v61 }
 0xc48   :  { %v2139_v4 = vadd.f32 -1.0, %v1131_v63 }
 0xc4a   :  { %v1133_v12 = vsel %vm2872_vm12, %v2139_v4, %v2608_v52 }
 0xc4b   :  { %1136 = vrot.lane.b32.xlu1 %v1133_v12, %s2759_s9  ;;  %v1134_v18 = vmul.f32 %v1133_v12, %v3110_v9 }
 0xcb9   :  { %v1238_v13 = vpop.permute.xlu0 %1237 }
 0xcba   :  { %v1240_v14 = vmul.f32 %v1238_v13, %v1234_v53 }
 0xcbc   :  { %1242 = vrot.lane.b32.xlu0 %v1240_v14, %s2754_s1 }
 0xcbd   :  { %v1137_v40 = vpop.permute.xlu1 %1136 }
 0xcbe   :  { %v1139_v15 = vmul.f32 %v1137_v40, %v1133_v12 }
 0xcc0   :  { %1141 = vrot.lane.b32.xlu1 %v1139_v15, %s2754_s1 }
 0xd2e   :  { %v1243_v43 = vpop.permute.xlu0 %1242 }
 0xd2f   :  { %v3170_v17 = vadd.f32 %v1243_v43, %v1235_v16 }
 0xd31   :  { %2609 = vtanh.f32 %v3170_v17 }
 0xd32   :  { %v1142_v19 = vpop.permute.xlu1 %1141 }
 0xd33   :  { %v3174_v2 = vadd.f32 %v1142_v19, %v1134_v18 }
 0xd35   :  { %2611 = vtanh.f32 %v3174_v2 }
 0xd3e   :  { %v2610_v3 = vpop.eup %2609 }
 0xd3f   :  { %1248 = vrot.lane.b32.xlu0 %v2610_v3, %s2759_s9 }
 0xd42   :  { %v2612_v5 = vpop.eup %2611 }
 0xd43   :  { %1147 = vrot.lane.b32.xlu1 %v2612_v5, %s2759_s9 }
 0xdb1   :  { %v1249_v61 = vpop.permute.xlu0 %1248 }
 0xdb2   :  { %v1251_v22 = vmul.f32 %v1249_v61, %v1234_v53 }
 0xdb4   :  { %1253 = vrot.lane.b32.xlu1 %v1251_v22, %s2754_s1 }
 0xdb5   :  { %v1148_v26 = vpop.permute.xlu1 %1147 }
 0xdb6   :  { %v1150_v9 = vmul.f32 %v1148_v26, %v1133_v12 }
 0xdb8   :  { %1257 = vrot.lane.b32.xlu0 %v1150_v9, %s2759_s9  ;;  %218 = vperm.xlu1 %2553, %v2828_v6  }
 0xdbc   :  { %229 = vperm.xlu1 %2553, %v2830_v7   ;;  %223 = vperm.xlu0 %2554, %v2842_v10  }
 0xdc0   :  { %235 = vperm.xlu1 %2553, %v2845_v11  }
 0xe26   :  { %v1254_v27 = vpop.permute.xlu1 %1253 }
 0xe27   :  { %2440 = vmatmul.mubr.msk.f32.vlgmr.msra.gmra.mxu0 %vm292_vm5, %v1254_v27 }
 0xe28   :  { %2443 = vmatpush3.msra.mxu0 %v2885_v55  ;;  %2458 = vmatprep.mubr.msk.f32.mxu0 %vm2757_vm0, %v3190_v28  ;;  %v3200_v55 = vld [vmem:[#allocation4 + $0x20] sm:$0xff] }
 0xe29   :  { %2444 = vmatprep.subr.mxu0 %v3190_v28 }
 0xe2a   :  { %v1258_v54 = vpop.permute.xlu0 %1257  ;;  %2445 = vmatpush3.msra.mxu0 %v2887_v56  ;;  %v3212_v56 = vld [vmem:[#allocation4 + $0x10] sm:$0xff] }
 0xe2b   :  { %v1260_v29 = vsel %vm292_vm5, %v1254_v27, %v1258_v54  ;;  %2446 = vmatprep.subr.mxu0 %v3190_v28 }
 0xe2c   :  { %2429 = vmatmul.mubr.msk.f32.vlgmr.msra.gmra.mxu1 %vm412_vm13, %v1260_v29  ;;  %2447 = vmatpush3.msra.mxu0 %v2891_v57  ;;  %v3219_v57 = vld [vmem:[#allocation4 + $0x8] sm:$0xff]  ;;  %v2765_v29 = vmov 6  }
 0xe2d   :  { %2462 = vmatpush3.msra.mxu1 %v3200_v55  ;;  %2448 = vmatprep.subr.mxu0 %v3190_v28 }
 0xe2e   :  { %2463 = vmatprep.subr.mxu1 %v3190_v28  ;;  %2449 = vmatpush3.msra.mxu0 %v2895_v58 }
 0xe2f   :  { %2464 = vmatpush3.msra.mxu1 %v3206_v32  ;;  %2450 = vmatprep.subr.mxu0 %v3190_v28 }
 0xe30   :  { %2465 = vmatprep.subr.mxu1 %v3190_v28  ;;  %2451 = vmatpush3.msra.mxu0 %v2899_v59 }
 0xe31   :  { %2466 = vmatpush3.msra.mxu1 %v3212_v56  ;;  %2469 = vmatprep.mubr.msk.f32.mxu1 %vm2757_vm0, %v3190_v28 }
 0xe32   :  { %2467 = vmatprep.subr.mxu1 %v3190_v28  ;;  %2452 = vmatprep.subr.mxu0 %v3190_v28 }
 0xe33   :  { %2468 = vmatpush3.msra.mxu1 %v3219_v57  ;;  %2453 = vmatpush3.msra.mxu0 %v2903_v60  ;;  %v219_v58 = vpop.permute.xlu1 %218 }
 0xe34   :  { %2454 = vmatprep.subr.mxu0 %v3190_v28  ;;  %2472 = vmatprep.subr.mxu1 %v3190_v28  ;;  %vm220_vm3 = vcmp.eq.s32.totalorder %v219_v58, 1 }
 0xe35   :  { %2455 = vmatpush3.msra.mxu0 %v2907_v62  ;;  %v221_v33 = vsel %vm220_vm3, %v2860_v20, 0.0  ;;  %2556 = vset.pattern.permute.xlu1 %v2765_v29  ;;  %vm2106_vm3 = vcmask 288000  }
 0xe36   :  { %2456 = vmatprep.subr.mxu0 %v3190_v28  ;;  %2555 = vset.pattern.permute.xlu0 %v2765_v29 }
 0xe37   :  { %2457 = vmatpush3.msra.mxu0 %v2918_v1  ;;  %v224_v59 = vpop.permute.xlu0 %223  ;;  %v230_v0 = vpop.permute.xlu1 %229 }
 0xe38   :  { %2491 = vmatprep.subr.mxu0 %v3190_v28  ;;  %vm225_vm4 = vcmp.eq.s32.totalorder %v224_v59, 1  ;;  %vm231_vm6 = vcmp.eq.s32.totalorder %v230_v0, 1 }
 0xe39   :  { %v226_v60 = vsel %vm225_vm4, %v2862_v23, 0.0  ;;  %v232_v62 = vsel %vm231_vm6, %v2865_v25, 0.0 }
 0xe3a   :  { %v227_v35 = vadd.f32 %v226_v60, %v221_v33  ;;  %v3266_v33 = vld [vmem:[#allocation4 + $0x60] sm:$0xff]  ;;  %v3272_v60 = vld [vmem:[#allocation4 + $0x58] sm:$0xff] }
 0xe3b   :  { %v236_v34 = vpop.permute.xlu1 %235 }
 0xe3c   :  { %vm237_vm7 = vcmp.eq.s32.totalorder %v236_v34, 1  ;;  %v233_v36 = vadd.f32 %v232_v62, %v227_v35  ;;  %v3277_v62 = vld [vmem:[#allocation4 + $0x50] sm:$0xff] }
 0xe3d   :  { %v238_v1 = vsel %vm237_vm7, %v2869_v31, 0.0 }
 0xe3e   :  { %v239_v37 = vadd.f32 %v238_v1, %v233_v36  ;;  %v3283_v36 = vld [vmem:[#allocation4 + $0x48] sm:$0xff]  ;;  %v3292_v1 = vld [vmem:[#allocation4 + $0x40] sm:$0xff] }
 0xee7   :  { %v1454_v39 = vpop.f32.mrf.mxu0 }
 0xee8   :  { %v1458_v41 = vadd.f32 %v1454_v39, %v239_v37 }
 0xee9   :  { %v2441_v42 = vpop.f32.mrf.mxu0 }
 0xeea   :  { %v1459_v44 = vmul.f32 2.0, %v1458_v41 }
 0xeec   :  { %v1460_v45 = vsel %vm2872_vm12, %v1459_v44, %v1458_v41  ;;  %v1330_v46 = vpop.f32.mrf.mxu1 }
 0xeed   :  { %v2149_v21 = vmul.f32 -1.442695, %v1460_v45  ;;  %v1331_v47 = vadd.f32 %v2962_v30, %v1330_v46 }
 0xeee   :  { %v2430_v48 = vpop.f32.mrf.mxu1 }
 0xeef   :  { %2613 = vpow2.f32 %v2149_v21  ;;  %v1334_v24 = vmul.f32 2.0, %v1331_v47 }
 0xef1   :  { %v1335_v49 = vsel %vm2872_vm12, %v1334_v24, %v1331_v47 }
 0xef2   :  { %v2144_v50 = vmul.f32 -1.442695, %v1335_v49 }
 0xef4   :  { %2615 = vpow2.f32 %v2144_v50 }
 0xefc   :  { %v2614_v51 = vpop.eup %2613 }
 0xefd   :  { %v1464_v52 = vadd.f32 1.0, %v2614_v51 }
 0xeff   :  { %2617 = vrcp.f32 %v1464_v52 }
 0xf01   :  { %v2616_v53 = vpop.eup %2615 }
 0xf02   :  { %v1339_v63 = vadd.f32 1.0, %v2616_v53 }
 0xf04   :  { %2619 = vrcp.f32 %v1339_v63 }
 0xf0c   :  { %v2618_v4 = vpop.eup %2617 }
 0xf0d   :  { %v1467_v12 = vmul.f32 2.0, %v2618_v4 }
 0xf0f   :  { %v2150_v13 = vadd.f32 -1.0, %v1467_v12 }
 0xf11   :  { %v2620_v14 = vpop.eup %2619  ;;  %v1469_v30 = vsel %vm2872_vm12, %v2150_v13, %v2618_v4  ;;  %v3317_v4 = vld [vmem:[#allocation4 + $0x4] ss:$0 sm:$0xff] }
 0xf12   :  { %1472 = vrot.lane.b32.xlu1 %v1469_v30, %s2759_s9  ;;  %v1342_v40 = vmul.f32 2.0, %v2620_v14  ;;  %v1470_v5 = vmul.f32 %v1469_v30, %v3170_v17 }
 0xf14   :  { %v2145_v15 = vadd.f32 -1.0, %v1342_v40 }
 0xf16   :  { %v1344_v16 = vsel %vm2872_vm12, %v2145_v15, %v2620_v14 }
 0xf17   :  { %1347 = vrot.lane.b32.xlu0 %v1344_v16, %s2759_s9  ;;  %v1345_v22 = vmul.f32 %v1344_v16, %v3174_v2 }
 0xf84   :  { %v1473_v43 = vpop.permute.xlu1 %1472 }
 0xf85   :  { %v1475_v18 = vmul.f32 %v1473_v43, %v1469_v30 }
 0xf87   :  { %1477 = vrot.lane.b32.xlu1 %v1475_v18, %s2754_s1 }
 0xf89   :  { %v1348_v19 = vpop.permute.xlu0 %1347 }
 0xf8a   :  { %v1350_v3 = vmul.f32 %v1348_v19, %v1344_v16 }
 0xf8c   :  { %1352 = vrot.lane.b32.xlu0 %v1350_v3, %s2754_s1 }
 0xff9   :  { %v1478_v8 = vpop.permute.xlu1 %1477 }
 0xffa   :  { %v3247_v61 = vadd.f32 %v1478_v8, %v1470_v5 }
 0xffc   :  { %2621 = vtanh.f32 %v3247_v61 }
 0xffe   :  { %v1353_v26 = vpop.permute.xlu0 %1352 }
 0xfff   :  { %v3251_v9 = vadd.f32 %v1353_v26, %v1345_v22 }
0x1001   :  { %2623 = vtanh.f32 %v3251_v9 }
0x1009   :  { %v2622_v27 = vpop.eup %2621 }
0x100a   :  { %1483 = vrot.lane.b32.xlu1 %v2622_v27, %s2759_s9 }
0x100e   :  { %v2624_v54 = vpop.eup %2623 }
0x100f   :  { %1358 = vrot.lane.b32.xlu0 %v2624_v54, %s2759_s9 }
0x107c   :  { %v1484_v17 = vpop.permute.xlu1 %1483 }
0x107d   :  { %v1486_v58 = vmul.f32 %v1484_v17, %v1469_v30 }
0x107f   :  { %1488 = vrot.lane.b32.xlu0 %v1486_v58, %s2754_s1 }
0x1081   :  { %v1359_v59 = vpop.permute.xlu0 %1358 }
0x1082   :  { %v3257_v2 = vmul.f32 %v1359_v59, %v1344_v16 }
0x1083   :  { %241 = vperm.xlu0 %2555, %v2828_v6  }
0x1084   :  { %1492 = vrot.lane.b32.xlu1 %v3257_v2, %s2759_s9 }
0x1087   :  { %258 = vperm.xlu0 %2555, %v2845_v11  }
0x1088   :  { %246 = vperm.xlu1 %2556, %v2842_v10  }
0x108c   :  { %252 = vperm.xlu1 %2556, %v2830_v7  }
0x10f1   :  { %v1489_v0 = vpop.permute.xlu0 %1488 }
0x10f2   :  { %2470 = vmatmul.mubr.msk.f32.vlgmr.msra.gmra.mxu1 %vm292_vm5, %v1489_v0 }
0x10f3   :  { %2473 = vmatpush3.msra.mxu1 %v3266_v33  ;;  %2488 = vmatprep.mubr.msk.f32.mxu1 %vm2757_vm0, %v3190_v28 }
0x10f4   :  { %2474 = vmatprep.subr.mxu1 %v3190_v28 }
0x10f5   :  { %2475 = vmatpush3.msra.mxu1 %v3272_v60 }
0x10f6   :  { %v1493_v34 = vpop.permute.xlu1 %1492  ;;  %2476 = vmatprep.subr.mxu1 %v3190_v28 }
0x10f7   :  { %v1495_v35 = vsel %vm292_vm5, %v1489_v0, %v1493_v34  ;;  %2477 = vmatpush3.msra.mxu1 %v3277_v62 }
0x10f8   :  { %2459 = vmatmul.mubr.msk.f32.vlgmr.msra.gmra.mxu0 %vm412_vm13, %v1495_v35  ;;  %2478 = vmatprep.subr.mxu1 %v3190_v28 }
0x10f9   :  { %2492 = vmatpush3.msra.mxu0 %v3200_v55  ;;  %2479 = vmatpush3.msra.mxu1 %v3283_v36  ;;  %v3298_v55 = vld [vmem:[#allocation4 + $0x38] sm:$0xff] }
0x10fa   :  { %2493 = vmatprep.subr.mxu0 %v3190_v28  ;;  %2480 = vmatprep.subr.mxu1 %v3190_v28 }
0x10fb   :  { %2494 = vmatpush3.msra.mxu0 %v3206_v32  ;;  %2499 = vmatprep.mubr.msk.f32.mxu0 %vm2757_vm0, %v3190_v28  ;;  %v3303_v32 = vld [vmem:[#allocation4 + $0x30] sm:$0xff] }
0x10fc   :  { %2495 = vmatprep.subr.mxu0 %v3190_v28  ;;  %2481 = vmatpush3.msra.mxu1 %v3292_v1 }
0x10fd   :  { %2496 = vmatpush3.msra.mxu0 %v3212_v56  ;;  %2482 = vmatprep.subr.mxu1 %v3190_v28  ;;  %v3308_v56 = vld [vmem:[#allocation4 + $0x28] sm:$0xff] }
0x10fe   :  { %2497 = vmatprep.subr.mxu0 %v3190_v28  ;;  %2483 = vmatpush3.msra.mxu1 %v3298_v55  ;;  %v242_v39 = vpop.permute.xlu0 %241 }
0x10ff   :  { %2498 = vmatpush3.msra.mxu0 %v3219_v57  ;;  %2484 = vmatprep.subr.mxu1 %v3190_v28  ;;  %vm243_vm9 = vcmp.eq.s32.totalorder %v242_v39, 1 }
0x1100   :  { %2485 = vmatpush3.msra.mxu1 %v3303_v32  ;;  %2502 = vmatprep.subr.mxu0 %v3190_v28  ;;  %v244_v42 = vsel %vm243_vm9, %v2860_v20, 0.0 }
0x1101   :  { %2486 = vmatprep.subr.mxu1 %v3190_v28 }
0x1102   :  { %2487 = vmatpush3.msra.mxu1 %v3308_v56  ;;  %v259_v44 = vpop.permute.xlu0 %258 }
0x1103   :  { %v247_v37 = vpop.permute.xlu1 %246  ;;  %vm260_vm11 = vcmp.eq.s32.totalorder %v259_v44, 1  ;;  %v2766_v44 = vmov 7  }
0x1104   :  { %vm248_vm8 = vcmp.eq.s32.totalorder %v247_v37, 1  ;;  %v261_v47 = vsel %vm260_vm11, %v2869_v31, 0.0  ;;  %2557 = vset.pattern.permute.xlu1 %v2766_v44  ;;  %2558 = vset.pattern.permute.xlu0 %v2766_v44 }
0x1105   :  { %v249_v57 = vsel %vm248_vm8, %v2862_v23, 0.0 }
0x1106   :  { %v250_v45 = vadd.f32 %v249_v57, %v244_v42 }
0x1107   :  { %v253_v41 = vpop.permute.xlu1 %252 }
0x1108   :  { %vm254_vm10 = vcmp.eq.s32.totalorder %v253_v41, 1 }
0x1109   :  { %v255_v46 = vsel %vm254_vm10, %v2865_v25, 0.0 }
0x110a   :  { %v256_v21 = vadd.f32 %v255_v46, %v250_v45 }
0x110c   :  { %v262_v48 = vadd.f32 %v261_v47, %v256_v21 }
0x11b2   :  { %v1680_v24 = vpop.f32.mrf.mxu1 }
0x11b3   :  { %v1684_v49 = vadd.f32 %v1680_v24, %v262_v48 }
0x11b4   :  { %v2471_v50 = vpop.f32.mrf.mxu1 }
0x11b5   :  { %v1685_v51 = vmul.f32 2.0, %v1684_v49 }
0x11b7   :  { %v1686_v52 = vsel %vm2872_vm12, %v1685_v51, %v1684_v49 }
0x11b8   :  { %v2156_v53 = vmul.f32 -1.442695, %v1686_v52  ;;  %v1565_v63 = vpop.f32.mrf.mxu0 }
0x11b9   :  { %v1566_v12 = vadd.f32 %v3317_v4, %v1565_v63 }
0x11ba   :  { %2625 = vpow2.f32 %v2156_v53  ;;  %v2460_v13 = vpop.f32.mrf.mxu0 }
0x11bb   :  { %v1569_v14 = vmul.f32 2.0, %v1566_v12 }
0x11bd   :  { %v1570_v30 = vsel %vm2872_vm12, %v1569_v14, %v1566_v12 }
0x11be   :  { %v2152_v40 = vmul.f32 -1.442695, %v1570_v30 }
0x11c0   :  { %2627 = vpow2.f32 %v2152_v40 }
0x11c7   :  { %v2626_v15 = vpop.eup %2625 }
0x11c8   :  { %v1690_v16 = vadd.f32 1.0, %v2626_v15 }
0x11ca   :  { %2629 = vrcp.f32 %v1690_v16 }
0x11cd   :  { %v2628_v43 = vpop.eup %2627 }
0x11ce   :  { %v1574_v18 = vadd.f32 1.0, %v2628_v43 }
0x11d0   :  { %2631 = vrcp.f32 %v1574_v18 }
0x11d7   :  { %v2630_v19 = vpop.eup %2629 }
0x11d8   :  { %v1693_v3 = vmul.f32 2.0, %v2630_v19 }
0x11da   :  { %v2157_v5 = vadd.f32 -1.0, %v1693_v3 }
0x11dc   :  { %v1695_v8 = vsel %vm2872_vm12, %v2157_v5, %v2630_v19 }
0x11dd   :  { %v2632_v22 = vpop.eup %2631  ;;  %1698 = vrot.lane.b32.xlu0 %v1695_v8, %s2759_s9  ;;  %v1696_v0 = vmul.f32 %v1695_v8, %v3247_v61 }
0x11de   :  { %v1577_v26 = vmul.f32 2.0, %v2632_v22 }
0x11e0   :  { %v2153_v27 = vadd.f32 -1.0, %v1577_v26 }
0x11e2   :  { %v1579_v54 = vsel %vm2872_vm12, %v2153_v27, %v2632_v22 }
0x11e3   :  { %1582 = vrot.lane.b32.xlu1 %v1579_v54, %s2759_s9  ;;  %v1580_v37 = vmul.f32 %v1579_v54, %v3251_v9 }
0x124f   :  { %v1699_v29 = vpop.permute.xlu0 %1698 }
0x1250   :  { %v1701_v17 = vmul.f32 %v1699_v29, %v1695_v8 }
0x1252   :  { %1703 = vrot.lane.b32.xlu0 %v1701_v17, %s2754_s1 }
0x1255   :  { %v1583_v58 = vpop.permute.xlu1 %1582 }
0x1256   :  { %v1585_v59 = vmul.f32 %v1583_v58, %v1579_v54 }
0x1258   :  { %1587 = vrot.lane.b32.xlu1 %v1585_v59, %s2754_s1 }
0x12c4   :  { %v1704_v34 = vpop.permute.xlu0 %1703 }
0x12c5   :  { %v3331_v35 = vadd.f32 %v1704_v34, %v1696_v0 }
0x12c7   :  { %2633 = vtanh.f32 %v3331_v35 }
0x12ca   :  { %v1588_v39 = vpop.permute.xlu1 %1587 }
0x12cb   :  { %v3335_v41 = vadd.f32 %v1588_v39, %v1580_v37 }
0x12cd   :  { %2635 = vtanh.f32 %v3335_v41 }
0x12d4   :  { %v2634_v57 = vpop.eup %2633 }
0x12d5   :  { %1709 = vrot.lane.b32.xlu0 %v2634_v57, %s2759_s9 }
0x12da   :  { %v2636_v42 = vpop.eup %2635 }
0x12db   :  { %1593 = vrot.lane.b32.xlu1 %v2636_v42, %s2759_s9 }
0x1347   :  { %v1710_v61 = vpop.permute.xlu0 %1709 }
0x1348   :  { %v1712_v45 = vmul.f32 %v1710_v61, %v1695_v8 }
0x134a   :  { %1714 = vrot.lane.b32.xlu1 %v1712_v45, %s2754_s1 }
0x134d   :  { %v1594_v46 = vpop.permute.xlu1 %1593 }
0x134e   :  { %v3341_v9 = vmul.f32 %v1594_v46, %v1579_v54  ;;  %264 = vperm.xlu1 %2557, %v2828_v6  }
0x1350   :  { %1718 = vrot.lane.b32.xlu0 %v3341_v9, %s2759_s9 }
0x1352   :  { %275 = vperm.xlu1 %2557, %v2830_v7  }
0x1354   :  { %269 = vperm.xlu0 %2558, %v2842_v10  }
0x1356   :  { %281 = vperm.xlu1 %2557, %v2845_v11  }
0x13bc   :  { %v1715_v21 = vpop.permute.xlu1 %1714 }
0x13bd   :  { %2500 = vmatmul.mubr.msk.f32.vlgmr.msra.gmra.mxu0 %vm292_vm5, %v1715_v21 }
0x13be   :  { %2503 = vmatpush3.msra.mxu0 %v3266_v33  ;;  %2518 = vmatprep.mubr.msk.f32.mxu0 %vm2757_vm0, %v3190_v28 }
0x13bf   :  { %2504 = vmatprep.subr.mxu0 %v3190_v28 }
0x13c0   :  { %2505 = vmatpush3.msra.mxu0 %v3272_v60 }
0x13c1   :  { %2506 = vmatprep.subr.mxu0 %v3190_v28 }
0x13c2   :  { %v1719_v6 = vpop.permute.xlu0 %1718  ;;  %2507 = vmatpush3.msra.mxu0 %v3277_v62 }
0x13c3   :  { %v1721_v7 = vsel %vm292_vm5, %v1715_v21, %v1719_v6  ;;  %2508 = vmatprep.subr.mxu0 %v3190_v28 }
0x13c4   :  { %2489 = vmatmul.mubr.msk.f32.vlgmr.msra.gmra.mxu1 %vm412_vm13, %v1721_v7  ;;  %2509 = vmatpush3.msra.mxu0 %v3283_v36 }
0x13c5   :  { %2510 = vmatprep.subr.mxu0 %v3190_v28 }
0x13c6   :  { %2511 = vmatpush3.msra.mxu0 %v3292_v1 }
0x13c7   :  { %2512 = vmatprep.subr.mxu0 %v3190_v28 }
0x13c8   :  { %2513 = vmatpush3.msra.mxu0 %v3298_v55 }
0x13c9   :  { %2514 = vmatprep.subr.mxu0 %v3190_v28  ;;  %v265_v10 = vpop.permute.xlu1 %264 }
0x13ca   :  { %2515 = vmatpush3.msra.mxu0 %v3303_v32  ;;  %vm266_vm0 = vcmp.eq.s32.totalorder %v265_v10, 1 }
0x13cb   :  { %2516 = vmatprep.subr.mxu0 %v3190_v28  ;;  %v267_v60 = vsel %vm266_vm0, %v2860_v20, 0.0 }
0x13cc   :  { %2517 = vmatpush3.msra.mxu0 %v3308_v56 }
0x13cd   :  { %v276_v33 = vpop.permute.xlu1 %275 }
0x13ce   :  { %vm277_vm15 = vcmp.eq.s32.totalorder %v276_v33, 1 }
0x13cf   :  { %v270_v11 = vpop.permute.xlu0 %269  ;;  %v278_v55 = vsel %vm277_vm15, %v2865_v25, 0.0 }
0x13d0   :  { %vm271_vm14 = vcmp.eq.s32.totalorder %v270_v11, 1 }
0x13d1   :  { %v272_v62 = vsel %vm271_vm14, %v2862_v23, 0.0  ;;  %v282_v36 = vpop.permute.xlu1 %281 }
0x13d2   :  { %v273_v1 = vadd.f32 %v272_v62, %v267_v60  ;;  %vm283_vm1 = vcmp.eq.s32.totalorder %v282_v36, 1 }
0x13d3   :  { %v284_v28 = vsel %vm283_vm1, %v2869_v31, 0.0 }
0x13d4   :  { %v279_v32 = vadd.f32 %v278_v55, %v273_v1  ;;  %v3407_v1 = vld [vmem:[#allocation4 + $0x5] ss:$0 sm:$0xff] }
0x13d6   :  { %v285_v47 = vadd.f32 %v284_v28, %v279_v32 }
0x147d   :  { %v1906_v56 = vpop.f32.mrf.mxu0 }
0x147e   :  { %v1910_v48 = vadd.f32 %v1906_v56, %v285_v47 }
0x147f   :  { %v2501_v24 = vpop.f32.mrf.mxu0 }
0x1480   :  { %v1911_v49 = vmul.f32 2.0, %v1910_v48 }
0x1482   :  { %v1912_v50 = vsel %vm2872_vm12, %v1911_v49, %v1910_v48 }
0x1483   :  { %v2163_v20 = vmul.f32 -1.442695, %v1912_v50 }
0x1484   :  { %v1791_v51 = vpop.f32.mrf.mxu1 }
0x1485   :  { %2637 = vpow2.f32 %v2163_v20  ;;  %v1792_v23 = vadd.f32 %v3317_v4, %v1791_v51 }
0x1486   :  { %v2490_v52 = vpop.f32.mrf.mxu1 }
0x1487   :  { %v1795_v53 = vmul.f32 2.0, %v1792_v23 }
0x1489   :  { %v1796_v25 = vsel %vm2872_vm12, %v1795_v53, %v1792_v23 }
0x148a   :  { %v2159_v63 = vmul.f32 -1.442695, %v1796_v25 }
0x148c   :  { %2639 = vpow2.f32 %v2159_v63 }
0x1492   :  { %v2638_v31 = vpop.eup %2637 }
0x1493   :  { %v1916_v12 = vadd.f32 1.0, %v2638_v31 }
0x1495   :  { %2641 = vrcp.f32 %v1916_v12 }
0x1499   :  { %v2640_v13 = vpop.eup %2639 }
0x149a   :  { %v1800_v14 = vadd.f32 1.0, %v2640_v13 }
0x149c   :  { %2643 = vrcp.f32 %v1800_v14 }
0x14a2   :  { %v2642_v30 = vpop.eup %2641 }
0x14a3   :  { %v1919_v40 = vmul.f32 2.0, %v2642_v30 }
0x14a5   :  { %v2164_v15 = vadd.f32 -1.0, %v1919_v40 }
0x14a7   :  { %v1921_v16 = vsel %vm2872_vm12, %v2164_v15, %v2642_v30 }
0x14a8   :  { %1924 = vrot.lane.b32.xlu1 %v1921_v16, %s2759_s9  ;;  %v1922_v27 = vmul.f32 %v1921_v16, %v3331_v35 }
0x14a9   :  { %v2644_v43 = vpop.eup %2643 }
0x14aa   :  { %v1803_v18 = vmul.f32 2.0, %v2644_v43 }
0x14ac   :  { %v2160_v19 = vadd.f32 -1.0, %v1803_v18 }
0x14ae   :  { %v1805_v3 = vsel %vm2872_vm12, %v2160_v19, %v2644_v43 }
0x14af   :  { %1808 = vrot.lane.b32.xlu0 %v1805_v3, %s2759_s9  ;;  %v1806_v17 = vmul.f32 %v1805_v3, %v3335_v41 }
0x151a   :  { %v1925_v5 = vpop.permute.xlu1 %1924 }
0x151b   :  { %v1927_v8 = vmul.f32 %v1925_v5, %v1921_v16 }
0x151d   :  { %1929 = vrot.lane.b32.xlu1 %v1927_v8, %s2754_s1 }
0x1521   :  { %v1809_v22 = vpop.permute.xlu0 %1808 }
0x1522   :  { %v1811_v26 = vmul.f32 %v1809_v22, %v1805_v3 }
0x1524   :  { %1813 = vrot.lane.b32.xlu0 %v1811_v26, %s2754_s1 }
0x158f   :  { %v1930_v54 = vpop.permute.xlu1 %1929 }
0x1590   :  { %v3387_v29 = vadd.f32 %v1930_v54, %v1922_v27 }
0x1592   :  { %2645 = vtanh.f32 %v3387_v29 }
0x1596   :  { %v1814_v58 = vpop.permute.xlu0 %1813 }
0x1597   :  { %v1816_v59 = vadd.f32 %v1814_v58, %v1806_v17 }
0x1599   :  { %2647 = vtanh.f32 %v1816_v59 }
0x159f   :  { %v2646_v0 = vpop.eup %2645 }
0x15a0   :  { %1935 = vrot.lane.b32.xlu1 %v2646_v0, %s2759_s9 }
0x15a6   :  { %v2648_v34 = vpop.eup %2647 }
0x15a7   :  { %1819 = vrot.lane.b32.xlu0 %v2648_v34, %s2759_s9 }
0x1612   :  { %v1936_v37 = vpop.permute.xlu1 %1935 }
0x1613   :  { %v1938_v39 = vmul.f32 %v1936_v37, %v1921_v16 }
0x1615   :  { %1940 = vrot.lane.b32.xlu0 %v1938_v39, %s2754_s1 }
0x1619   :  { %v1820_v35 = vpop.permute.xlu0 %1819 }
0x161a   :  { %v1822_v57 = vmul.f32 %v1820_v35, %v1805_v3 }
0x161c   :  { %1944 = vrot.lane.b32.xlu1 %v1822_v57, %s2759_s9 }
0x1687   :  { %v1941_v42 = vpop.permute.xlu0 %1940 }
0x1688   :  { %2064 = vst.msk [vmem:[%s3452_s4] sm:$0x3] %vm1375_vm2, %v1941_v42 }
0x168e   :  { %v1945_v41 = vpop.permute.xlu1 %1944 }
0x168f   :  { %v1947_v44 = vsel %vm292_vm5, %v1941_v42, %v1945_v41  ;;  %vm2096_vm5 = vcmask 7168  }
0x1690   :  { %2519 = vmatmul.mubr.msk.f32.vlgmr.msra.gmra.mxu0 %vm412_vm13, %v1947_v44  ;;  %vm2100_vm13 = vcmask 23552  }
0x1750   :  { %v2017_v61 = vpop.f32.mrf.mxu0 }
0x1751   :  { %v2018_v45 = vadd.f32 %v3317_v4, %v2017_v61 }
0x1752   :  { %v2520_v46 = vpop.f32.mrf.mxu0 }
0x1753   :  { %v2021_v21 = vmul.f32 2.0, %v2018_v45 }
0x1755   :  { %v2022_v6 = vsel %vm2872_vm12, %v2021_v21, %v2018_v45 }
0x1756   :  { %v2166_v7 = vmul.f32 -1.442695, %v2022_v6 }
0x1758   :  { %2649 = vpow2.f32 %v2166_v7 }
0x1765   :  { %v2650_v10 = vpop.eup %2649 }
0x1766   :  { %v2026_v11 = vadd.f32 1.0, %v2650_v10 }
0x1768   :  { %2651 = vrcp.f32 %v2026_v11 }
0x1775   :  { %v2652_v33 = vpop.eup %2651 }
0x1776   :  { %v2029_v60 = vmul.f32 2.0, %v2652_v33 }
0x1778   :  { %v2167_v62 = vadd.f32 -1.0, %v2029_v60 }
0x177a   :  { %v2031_v36 = vsel %vm2872_vm12, %v2167_v62, %v2652_v33  ;;  %vm2098_vm12 = vcmask 15360  }
0x177b   :  { %2034 = vrot.lane.b32.xlu0 %v2031_v36, %s2759_s9  ;;  %v2032_v38 = vmul.f32 %v2031_v36, %v1816_v59 }
0x177f   :  { %1367 = vrot.lane.b32.xlu0 %v3407_v1, %s2767_s15 }
0x17ed   :  { %v2035_v4 = vpop.permute.xlu0 %2034 }
0x17ee   :  { %v2037_v55 = vmul.f32 %v2035_v4, %v2031_v36 }
0x17f0   :  { %2039 = vrot.lane.b32.xlu1 %v2037_v55, %s2754_s1 }
0x17f1   :  { %v1368_v32 = vpop.permute.xlu0 %1367 }
0x17f2   :  { %v1370_v28 = vmul.f32 %v1368_v32, %v3257_v2  ;;  %v1823_v47 = vmul.f32 %v1822_v57, %v1368_v32  ;;  %v1597_v2 = vmul.f32 %v3341_v9, %v1368_v32 }
0x17f4   :  { %1372 = vrot.lane.b32.xlu0 %v1370_v28, %s2754_s1 }
0x17f8   :  { %1825 = vrot.lane.b32.xlu0 %v1823_v47, %s2754_s1 }
0x1862   :  { %v2040_v56 = vpop.permute.xlu1 %2039 }
0x1863   :  { %v2042_v48 = vadd.f32 %v2040_v56, %v2032_v38 }
0x1865   :  { %2653 = vtanh.f32 %v2042_v48 }
0x1866   :  { %v1373_v24 = vpop.permute.xlu0 %1372 }
0x1867   :  { %v1376_v49 = vsel %vm1375_vm2, %v1373_v24, 0.0 }
0x1868   :  { %1377 = vadd.xlane.f32.xlu0 %v1376_v49 }
0x186a   :  { %v1826_v50 = vpop.permute.xlu0 %1825 }
0x186b   :  { %v1828_v20 = vsel %vm1375_vm2, %v1826_v50, 0.0 }
0x186c   :  { %1829 = vadd.xlane.f32.xlu0 %v1828_v20 }
0x1872   :  { %v2654_v51 = vpop.eup %2653 }
0x1873   :  { %2045 = vrot.lane.b32.xlu1 %v2654_v51, %s2759_s9 }
0x1877   :  { %1599 = vrot.lane.b32.xlu1 %v1597_v2, %s2754_s1 }
0x18e5   :  { %v2046_v23 = vpop.permute.xlu1 %2045 }
0x18e6   :  { %v2048_v52 = vmul.f32 %v2046_v23, %v2031_v36 }
0x18e8   :  { %v2049_v53 = vmul.f32 %v2048_v52, %v1368_v32 }
0x18e9   :  { %v1600_v40 = vpop.permute.xlu1 %1599 }
0x18ea   :  { %2051 = vrot.lane.b32.xlu1 %v2049_v53, %s2754_s1  ;;  %v1602_v9 = vsel %vm1375_vm2, %v1600_v40, 0.0 }
0x18f1   :  { %v1378_v25 = vpop.xlane.xlu0 %1377 }
0x18f2   :  { %v1379_v63 = vadd.f32 %v3407_v1, %v1378_v25 }
0x18f4   :  { %v2147_v12 = vmul.f32 -1.442695, %v1379_v63 }
0x18f5   :  { %v1830_v31 = vpop.xlane.xlu0 %1829 }
0x18f6   :  { %v1831_v13 = vadd.f32 %v3407_v1, %v1830_v31  ;;  %2655 = vpow2.f32 %v2147_v12 }
0x18f8   :  { %v2161_v14 = vmul.f32 -1.442695, %v1831_v13 }
0x18fa   :  { %2657 = vpow2.f32 %v2161_v14 }
0x1903   :  { %v2656_v30 = vpop.eup %2655 }
0x1904   :  { %v1383_v15 = vadd.f32 1.0, %v2656_v30 }
0x1906   :  { %2659 = vrcp.f32 %v1383_v15 }
0x1907   :  { %v2658_v16 = vpop.eup %2657 }
0x1908   :  { %v1835_v43 = vadd.f32 1.0, %v2658_v16 }
0x190a   :  { %2661 = vrcp.f32 %v1835_v43 }
0x190e   :  { %1603 = vadd.xlane.f32.xlu1 %v1602_v9 }
0x1913   :  { %v2660_v18 = vpop.eup %2659 }
0x1917   :  { %v2662_v19 = vpop.eup %2661 }
0x191f   :  { %2081 = vrot.lane.b32.xlu1 %v2660_v18, %s2767_s15 }
0x1923   :  { %2089 = vrot.lane.b32.xlu1 %v2662_v19, %s2768_s16 }
0x195c   :  { %v2052_v3 = vpop.permute.xlu1 %2051 }
0x195d   :  { %v2054_v5 = vsel %vm1375_vm2, %v2052_v3, 0.0 }
0x195e   :  { %2055 = vadd.xlane.f32.xlu0 %v2054_v5 }
0x1997   :  { %v1604_v8 = vpop.xlane.xlu1 %1603 }
0x1998   :  { %v1605_v22 = vadd.f32 %v3407_v1, %v1604_v8 }
0x199a   :  { %v2154_v26 = vmul.f32 -1.442695, %v1605_v22 }
0x199b   :  { %v2082_v41 = vpop.permute.xlu1 %2081 }
0x199c   :  { %2663 = vpow2.f32 %v2154_v26 }
0x199f   :  { %v2090_v44 = vpop.permute.xlu1 %2089 }
0x19a9   :  { %v2664_v27 = vpop.eup %2663 }
0x19aa   :  { %v1609_v54 = vadd.f32 1.0, %v2664_v27 }
0x19ac   :  { %2665 = vrcp.f32 %v1609_v54 }
0x19b9   :  { %v2666_v17 = vpop.eup %2665 }
0x19ba   :  { %2085 = vrot.lane.b32.xlu0 %v2666_v17, %s2769_s17 }
0x19be   :  { %2066 = vrot.lane.b32.xlu0 %v2048_v52, %s2754_s1 }
0x19c2   :  { %2076 = vrot.lane.b32.xlu0 %v2042_v48, %s2767_s15 }
0x19e7   :  { %v2056_v58 = vpop.xlane.xlu0 %2055 }
0x19e8   :  { %v2057_v59 = vadd.f32 %v3407_v1, %v2056_v58 }
0x19ea   :  { %v2168_v0 = vmul.f32 -1.442695, %v2057_v59 }
0x19ec   :  { %2667 = vpow2.f32 %v2168_v0 }
0x19f9   :  { %v2668_v34 = vpop.eup %2667 }
0x19fa   :  { %v2061_v37 = vadd.f32 1.0, %v2668_v34 }
0x19fc   :  { %2669 = vrcp.f32 %v2061_v37 }
0x1a09   :  { %v2670_v39 = vpop.eup %2669 }
0x1a0a   :  { %2093 = vrot.lane.b32.xlu1 %v2670_v39, %s2770_s18 }
0x1a0e   :  { %2071 = vrot.lane.b32.xlu1 %v3387_v29, %s2767_s15 }
0x1a2c   :  { %v2086_v35 = vpop.permute.xlu0 %2085 }
0x1a2d   :  { %v2097_v61 = vsel %vm2096_vm5, %v2082_v41, %v2086_v35 }
0x1a2e   :  { %v2099_v45 = vsel %vm2098_vm12, %v2097_v61, %v2090_v44 }
0x1a30   :  { %v2067_v57 = vpop.permute.xlu0 %2066 }
0x1a31   :  { %2069 = vst.msk [vmem:[%s3452_s4 + $0x2] sm:$0x3] %vm1375_vm2, %v2067_v57 }
0x1a34   :  { %v2077_v42 = vpop.permute.xlu0 %2076 }
0x1a35   :  { %2079 = vst.msk [vmem:[%s3452_s4 + $0x6] sm:$0x3] %vm1375_vm2, %v2077_v42 }
0x1a7c   :  { %v2094_v29 = vpop.permute.xlu1 %2093 }
0x1a7d   :  { %v2101_v46 = vsel %vm2100_vm13, %v2099_v45, %v2094_v29 }
0x1a7e   :  { %2103 = vrot.lane.b32.xlu1 %v2101_v46, %s2754_s1 }
0x1a80   :  { %v2072_v21 = vpop.permute.xlu1 %2071 }
0x1a81   :  { %2074 = vst.msk [vmem:[%s3452_s4 + $0x4] sm:$0x3] %vm1375_vm2, %v2072_v21 }
0x1af0   :  { %v2104_v6 = vpop.permute.xlu1 %2103 }
0x1af1   :  { %2107 = vst.msk [vmem:[%s3452_s4] sm:$0x3] %vm2106_vm3, %v2104_v6 }
0x1af2   :  { %2112 = vsyncpa [#allocation3], 1 }
0x1af3   :  { %2113 = vsyncpa [#allocation5], 1 }

</bundles_post_ra>
